<compile_context>
chip_gen: v7x
topology: tpu7x:2x2x1
jax: 0.10.0
libtpu: 0.0.40
codegen_flags: <defaults>
</compile_context>

<pallas_src>
import functools

import jax
import jax.numpy as jnp
from jax.experimental import pallas as pl
from jax.experimental.pallas import tpu as pltpu

# ----------------------------- config -------------------------------------
IMG_C, IMG_HW = 3, 16
VIS_HIDDEN = 128          # "visual_hidden_size" (ImageBind-huge is 1024)
HIDDEN = 128              # llama hidden size (synthetic small)
N_HEADS, HEAD_DIM = 4, 32
N_LAYERS = 2
INTERMEDIATE = 256
VOCAB = 256
LORA_R, LORA_ALPHA = 8, 16
P_BEFORE_LEN = 4          # synthetic length of tokenized PROMPT_START
MAX_TGT_LEN = 8
BOS_ID, PAD_ID = 1, 0
PREFIX = 1 + P_BEFORE_LEN + 1        # bos + prompt + <img>
S_REAL = PREFIX + MAX_TGT_LEN        # 14
S_PAD = 16                           # padded to sublane multiple

_VMEM = pltpu.MemorySpace.VMEM
_SMEM = pltpu.MemorySpace.SMEM


# --------------------------- in-kernel helpers ------------------------------
def _rms(x, w, eps=1e-6):
    """x: (M, H) f32, w: (1, H) f32."""
    var = jnp.mean(x * x, axis=-1, keepdims=True)
    return x * jax.lax.rsqrt(var + eps) * w


def _rope(x, cos, sin):
    """LLaMA rotary embedding. x: (S, Dh); cos/sin: (S, Dh) (half-tiled)."""
    half = HEAD_DIM // 2
    x1 = x[:, :half]
    x2 = x[:, half:]
    rot = jnp.concatenate([-x2, x1], axis=-1)
    return x * cos + rot * sin


# --------------------------- Pallas kernels --------------------------------
def _encode_kernel(img_ref, wvis_ref, wproj_ref, bproj_ref, o_ref):
    """Synthetic visual encoder + llama_proj fused: (B, C*H*W) -> (B, H)."""
    flat = img_ref[...].astype(jnp.float32)
    vis = jnp.dot(flat, wvis_ref[...], preferred_element_type=jnp.float32)
    out = jnp.dot(vis, wproj_ref[...], preferred_element_type=jnp.float32)
    o_ref[...] = (out + bproj_ref[...]).astype(o_ref.dtype)


def pallas_encode_image(flat, wvis, wproj, bproj):
    B = flat.shape[0]
    return pl.pallas_call(
        _encode_kernel,
        out_shape=jax.ShapeDtypeStruct((B, HIDDEN), flat.dtype),
        in_specs=[pl.BlockSpec(memory_space=_VMEM)] * 4,
        out_specs=pl.BlockSpec(memory_space=_VMEM),
    )(flat, wvis, wproj, bproj.reshape(1, HIDDEN).astype(jnp.float32))


def _layer_kernel(x_ref, bias_ref, cos_ref, sin_ref, in_norm_ref, wqkv_ref,
                  wo_ref, post_norm_ref, wgu_ref, wdown_ref, o_ref, *, scale):
    """Whole decoder layer for one batch element; everything stays in VMEM."""
    x = x_ref[0].astype(jnp.float32)                 # (S, H)
    bias = bias_ref[0]                               # (S, S) additive mask
    cos = cos_ref[...]                               # (S, Dh)
    sin = sin_ref[...]
    wo = wo_ref[...]                                 # (H, H)

    # ---- attention block --------------------------------------------------
    h = _rms(x, in_norm_ref[...])                    # (S, H)
    qkv = jnp.dot(h, wqkv_ref[...],
                  preferred_element_type=jnp.float32)  # (S, 3H)

    attn_o = None
    for hd in range(N_HEADS):
        off = hd * HEAD_DIM
        q_h = _rope(qkv[:, off:off + HEAD_DIM], cos, sin)               # (S,Dh)
        k_h = _rope(qkv[:, HIDDEN + off:HIDDEN + off + HEAD_DIM], cos, sin)
        v_h = qkv[:, 2 * HIDDEN + off:2 * HIDDEN + off + HEAD_DIM]

        s = jnp.dot(q_h, k_h.T,
                    preferred_element_type=jnp.float32) * scale + bias  # (S,S)
        m = jnp.max(s, axis=-1, keepdims=True)
        p = jnp.exp(s - m)
        denom = jnp.sum(p, axis=-1, keepdims=True)
        p = p * pl.reciprocal(denom, approx=True)
        o_h = jnp.dot(p, v_h, preferred_element_type=jnp.float32)       # (S,Dh)
        # fold the o-projection per head (block-matmul): avoids lane concat
        contrib = jnp.dot(o_h, wo[off:off + HEAD_DIM, :],
                          preferred_element_type=jnp.float32)           # (S,H)
        attn_o = contrib if attn_o is None else attn_o + contrib
    x = x + attn_o

    # ---- MLP block ---------------------------------------------------------
    h2 = _rms(x, post_norm_ref[...])
    gu = jnp.dot(h2, wgu_ref[...],
                 preferred_element_type=jnp.float32)   # (S, 2*I)
    g = gu[:, :INTERMEDIATE]
    u = gu[:, INTERMEDIATE:]
    act = g * pl.reciprocal(1.0 + jnp.exp(-g), approx=True) * u
    d = jnp.dot(act, wdown_ref[...], preferred_element_type=jnp.float32)
    x = x + d

    o_ref[0] = x.astype(o_ref.dtype)


def pallas_layer(x, bias, cos, sin, in_norm, wqkv, wo, post_norm, wgu, wdown):
    """x: (B, S, H) -> (B, S, H); one fused kernel, grid over batch."""
    B, S, H = x.shape
    scale = 1.0 / (HEAD_DIM ** 0.5)
    return pl.pallas_call(
        functools.partial(_layer_kernel, scale=scale),
        out_shape=jax.ShapeDtypeStruct((B, S, H), x.dtype),
        grid=(B,),
        in_specs=[
            pl.BlockSpec((1, S, H), lambda b: (b, 0, 0)),           # x
            pl.BlockSpec((1, S, S), lambda b: (b, 0, 0)),           # bias
            pl.BlockSpec((S, HEAD_DIM), lambda b: (0, 0)),          # cos
            pl.BlockSpec((S, HEAD_DIM), lambda b: (0, 0)),          # sin
            pl.BlockSpec((1, H), lambda b: (0, 0)),                 # in_norm
            pl.BlockSpec((H, 3 * H), lambda b: (0, 0)),             # wqkv
            pl.BlockSpec((H, H), lambda b: (0, 0)),                 # wo
            pl.BlockSpec((1, H), lambda b: (0, 0)),                 # post_norm
            pl.BlockSpec((H, 2 * INTERMEDIATE), lambda b: (0, 0)),  # wgu
            pl.BlockSpec((INTERMEDIATE, H), lambda b: (0, 0)),      # wdown
        ],
        out_specs=pl.BlockSpec((1, S, H), lambda b: (b, 0, 0)),
        compiler_params=pltpu.CompilerParams(
            dimension_semantics=("parallel",)),
    )(x, bias, cos, sin, in_norm.reshape(1, H).astype(jnp.float32), wqkv, wo,
      post_norm.reshape(1, H).astype(jnp.float32), wgu, wdown)


def _head_kernel(x_ref, norm_ref, wlm_ref, ce_lab_ref, acc_lab_ref, o_ref):
    """final rmsnorm + lm_head + masked CE + argmax/gen_acc, fully fused."""
    x = x_ref[...].astype(jnp.float32)                # (N, H), N = B*S
    h = _rms(x, norm_ref[...])
    logits = jnp.dot(h, wlm_ref[...],
                     preferred_element_type=jnp.float32)   # (N, V)

    m = jnp.max(logits, axis=-1, keepdims=True)
    e = jnp.exp(logits - m)
    lse = jnp.log(jnp.sum(e, axis=-1, keepdims=True)) + m
    col = jax.lax.broadcasted_iota(jnp.int32, logits.shape, 1)

    ce_lab = ce_lab_ref[...]                          # (N, 1) int32, shifted
    onehot = (col == ce_lab).astype(jnp.float32)
    tgt = jnp.sum(logits * onehot, axis=-1, keepdims=True)
    ce_valid = (ce_lab != -100).astype(jnp.float32)
    loss_sum = jnp.sum((lse - tgt) * ce_valid)
    loss_cnt = jnp.sum(ce_valid)

    # argmax with first-index tie break (matches torch.max)
    idx = jnp.where(logits == m, col, jnp.int32(2 ** 30))
    chosen = jnp.min(idx, axis=-1, keepdims=True)     # (N, 1)
    acc_lab = acc_lab_ref[...]
    acc_valid = acc_lab != -100
    n_correct = jnp.sum(((chosen == acc_lab) & acc_valid).astype(jnp.float32))
    n_valid = jnp.sum(acc_valid.astype(jnp.float32))

    o_ref[0, 0] = loss_sum
    o_ref[0, 1] = loss_cnt
    o_ref[0, 2] = n_correct
    o_ref[0, 3] = n_valid


def pallas_head(x2, final_norm, lm_head, ce_labels, acc_labels):
    N, H = x2.shape
    return pl.pallas_call(
        _head_kernel,
        out_shape=jax.ShapeDtypeStruct((1, 4), jnp.float32),
        in_specs=[pl.BlockSpec(memory_space=_VMEM)] * 5,
        out_specs=pl.BlockSpec(memory_space=_SMEM),
    )(x2, final_norm.reshape(1, H).astype(jnp.float32), lm_head,
      ce_labels.reshape(N, 1).astype(jnp.int32),
      acc_labels.reshape(N, 1).astype(jnp.int32))


# --------------------------- model glue ------------------------------------
def init_params(key):
    def nrm(k, shape, scale=0.02):
        return (scale * jax.random.normal(k, shape)).astype(jnp.float32)

    keys = iter(jax.random.split(key, 10 + N_LAYERS * 16))
    params = {
        "vis_w": nrm(next(keys), (IMG_C * IMG_HW * IMG_HW, VIS_HIDDEN)),
        "proj_w": nrm(next(keys), (VIS_HIDDEN, HIDDEN)),
        "proj_b": nrm(next(keys), (HIDDEN,)),
        "embed": nrm(next(keys), (VOCAB, HIDDEN)),
        "final_norm": jnp.ones((HIDDEN,), jnp.float32),
        "lm_head": nrm(next(keys), (HIDDEN, VOCAB)),
        # synthetic tokenization of PROMPT_START = '### Human: <Img>'
        "p_before_ids": (jnp.arange(P_BEFORE_LEN, dtype=jnp.int32) + 5),
        "layers": [],
    }
    for _ in range(N_LAYERS):
        layer = {
            "in_norm": jnp.ones((HIDDEN,), jnp.float32),
            "post_norm": jnp.ones((HIDDEN,), jnp.float32),
            "w_gate": nrm(next(keys), (HIDDEN, INTERMEDIATE)),
            "w_up": nrm(next(keys), (HIDDEN, INTERMEDIATE)),
            "w_down": nrm(next(keys), (INTERMEDIATE, HIDDEN)),
        }
        for name in ("q", "k", "v", "o"):
            layer[f"w{name}"] = nrm(next(keys), (HIDDEN, HIDDEN))
            layer[f"w{name}_a"] = nrm(next(keys), (HIDDEN, LORA_R))
            layer[f"w{name}_b"] = nrm(next(keys), (LORA_R, HIDDEN))
        params["layers"].append(layer)
    return params


def forward(params, images, input_ids, target_ids, attention_mask):
    """Mirrors OpenLLAMAPEFTModel.forward: returns (loss, gen_acc)."""
    B = images.shape[0]

    # ---- encode_image: visual encoder + llama_proj fused into one kernel
    flat = images.reshape(B, -1)                                  # NCHW flatten
    img_embeds = pallas_encode_image(flat, params["vis_w"],
                                     params["proj_w"], params["proj_b"])
    img_embeds = img_embeds[:, None, :]                           # (B, 1, H)

    # ---- prompt_wrap (embedding lookups + concat: trace-time glue)
    embed = params["embed"]
    bos_ids = jnp.full((B, 1), BOS_ID, dtype=jnp.int32)
    p_before_ids = jnp.broadcast_to(params["p_before_ids"][None, :],
                                    (B, P_BEFORE_LEN))
    bos_embeds = jnp.take(embed, bos_ids, axis=0)
    p_before_embeds = jnp.take(embed, p_before_ids, axis=0)
    p_after_embeds = jnp.take(embed, input_ids, axis=0)

    pad = S_PAD - S_REAL
    inputs_embeds = jnp.concatenate(
        [bos_embeds, p_before_embeds, img_embeds, p_after_embeds,
         jnp.zeros((B, pad, HIDDEN), jnp.float32)], axis=1)       # (B, S_PAD, H)
    targets = jnp.concatenate(
        [jnp.full((B, PREFIX), -100, jnp.int32), target_ids,
         jnp.full((B, pad), -100, jnp.int32)], axis=1)            # (B, S_PAD)
    attn_mask = jnp.concatenate(
        [jnp.ones((B, PREFIX), jnp.int32), attention_mask,
         jnp.zeros((B, pad), jnp.int32)], axis=1)                 # (B, S_PAD)

    B, S, H = inputs_embeds.shape

    # ---- hoisted: causal+padding additive bias and RoPE tables (layer-invariant)
    causal = jnp.tril(jnp.ones((S, S), jnp.float32)) > 0
    allowed = causal[None, :, :] & (attn_mask > 0)[:, None, :]
    bias = jnp.where(allowed, 0.0, -1e9).astype(jnp.float32)      # (B, S, S)

    half = HEAD_DIM // 2
    inv_freq = 1.0 / (10000.0 ** (jnp.arange(half, dtype=jnp.float32) / half))
    ang = jnp.arange(S, dtype=jnp.float32)[:, None] * inv_freq[None, :]
    cos = jnp.concatenate([jnp.cos(ang), jnp.cos(ang)], axis=-1)  # (S, Dh)
    sin = jnp.concatenate([jnp.sin(ang), jnp.sin(ang)], axis=-1)

    # ---- decoder layers: one fused pallas_call each
    scaling = LORA_ALPHA / LORA_R
    x = inputs_embeds
    for layer in params["layers"]:
        # fold LoRA into the base weight at trace time (rank-8, negligible)
        def eff(name):
            return layer[f"w{name}"] + scaling * (
                layer[f"w{name}_a"] @ layer[f"w{name}_b"])

        wqkv = jnp.concatenate([eff("q"), eff("k"), eff("v")], axis=1)  # (H,3H)
        wgu = jnp.concatenate([layer["w_gate"], layer["w_up"]], axis=1)  # (H,2I)
        x = pallas_layer(x, bias, cos, sin, layer["in_norm"], wqkv, eff("o"),
                         layer["post_norm"], wgu, layer["w_down"])

    # ---- shifted labels for HF causal-LM loss and for gen_acc
    # CE: logits[:, :-1] vs targets[:, 1:]  ->  per-row label targets[b, s+1]
    ce_labels = jnp.concatenate(
        [targets[:, 1:], jnp.full((B, 1), -100, jnp.int32)], axis=1)
    # gen_acc: argmax(logits)[:, 1:-1] vs targets[:, 2:]  ->  same shift but
    # position 0 excluded (position S-1 already -100)
    acc_labels = ce_labels.at[:, 0].set(-100)

    # ---- fused final-norm + lm_head + masked CE + argmax accuracy
    stats = pallas_head(x.reshape(B * S, H), params["final_norm"],
                        params["lm_head"], ce_labels.reshape(-1),
                        acc_labels.reshape(-1))
    loss = stats[0, 0] / jnp.maximum(stats[0, 1], 1.0)
    gen_acc = stats[0, 2] / jnp.maximum(stats[0, 3], 1.0)
    return loss, gen_acc


# ------------------------------- main ---------------------------------------
if __name__ == "__main__":
    B = 2
    key = jax.random.PRNGKey(0)
    k_img, k_ids = jax.random.split(key)

    images = jax.random.normal(k_img, (B, IMG_C, IMG_HW, IMG_HW),
                               dtype=jnp.float32)
    raw_ids = jax.random.randint(k_ids, (B, MAX_TGT_LEN), 3, VOCAB).astype(
        jnp.int32)
    # batch item 0: full 8 tokens; item 1: 6 tokens + 2 pads (like pad_sequence)
    pad_mask = jnp.array([[1] * 8, [1] * 6 + [0] * 2], dtype=jnp.int32)
    input_ids = jnp.where(pad_mask == 1, raw_ids, PAD_ID)
    attention_mask = pad_mask
    # first 4 tokens of each conversation are the human turn (-100 targets)
    human_mask = jnp.array([[1, 1, 1, 1, 0, 0, 0, 0]] * 2, dtype=jnp.int32)
    target_ids = jnp.where((human_mask == 0) & (pad_mask == 1),
                           input_ids, -100).astype(jnp.int32)

    params = init_params(jax.random.PRNGKey(1))

    fwd = jax.jit(forward)
    loss, gen_acc = fwd(params, images, input_ids, target_ids, attention_mask)
    jax.block_until_ready((loss, gen_acc))
    assert jnp.isfinite(loss) and jnp.isfinite(gen_acc)
    print("KERNEL_OK")
</pallas_src>

<mosaic_0001>
module attributes {stable_mosaic.version = 11 : i64} {
  func.func @_encode_kernel(%arg0: memref<2x768xf32, #tpu.memory_space<vmem>>, %arg1: memref<768x128xf32, #tpu.memory_space<vmem>>, %arg2: memref<128x128xf32, #tpu.memory_space<vmem>>, %arg3: memref<1x128xf32, #tpu.memory_space<vmem>>, %arg4: memref<2x128xf32, #tpu.memory_space<vmem>>) attributes {dimension_semantics = [], scalar_prefetch = 0 : i64, scratch_operands = 0 : i64, tpu.core_type = #tpu.core_type<tc>} {
    %c0 = arith.constant 0 : index
    %c0_0 = arith.constant 0 : index
    %0 = vector.load %arg0[%c0, %c0_0] : memref<2x768xf32, #tpu.memory_space<vmem>>, vector<2x768xf32>
    %c0_1 = arith.constant 0 : index
    %c0_2 = arith.constant 0 : index
    %1 = vector.load %arg1[%c0_1, %c0_2] : memref<768x128xf32, #tpu.memory_space<vmem>>, vector<768x128xf32>
    %cst = arith.constant dense<0.000000e+00> : vector<2x128xf32>
    %2 = tpu.matmul %0, %1, %cst {dimension_numbers = #tpu.dot_dimension_numbers<[1], [0], [0], [1], [0, 0, 1, 1], [], []>} : vector<2x768xf32>, vector<768x128xf32>, vector<2x128xf32> -> vector<2x128xf32>
    %c0_3 = arith.constant 0 : index
    %c0_4 = arith.constant 0 : index
    %3 = vector.load %arg2[%c0_3, %c0_4] : memref<128x128xf32, #tpu.memory_space<vmem>>, vector<128x128xf32>
    %cst_5 = arith.constant dense<0.000000e+00> : vector<2x128xf32>
    %4 = tpu.matmul %2, %3, %cst_5 {dimension_numbers = #tpu.dot_dimension_numbers<[1], [0], [0], [1], [0, 0, 1, 1], [], []>} : vector<2x128xf32>, vector<128x128xf32>, vector<2x128xf32> -> vector<2x128xf32>
    %c0_6 = arith.constant 0 : index
    %c0_7 = arith.constant 0 : index
    %5 = vector.load %arg3[%c0_6, %c0_7] : memref<1x128xf32, #tpu.memory_space<vmem>>, vector<1x128xf32>
    %6 = vector.broadcast %5 : vector<1x128xf32> to vector<2x128xf32>
    %7 = arith.addf %4, %6 : vector<2x128xf32>
    %c0_8 = arith.constant 0 : index
    %c0_9 = arith.constant 0 : index
    %8 = vector.load %arg4[%c0_8, %c0_9] : memref<2x128xf32, #tpu.memory_space<vmem>>, vector<2x128xf32>
    tpu.vector_store %arg4[%c0_8, %c0_9], %7 {strides = array<i32>} : memref<2x128xf32, #tpu.memory_space<vmem>>, vector<2x128xf32>,
    return
  }
}

module attributes {stable_mosaic.version = 11 : i64} {
  func.func @_layer_kernel(%arg0: i32, %arg1: memref<1x16x128xf32, #tpu.memory_space<vmem>>, %arg2: memref<1x16x16xf32, #tpu.memory_space<vmem>>, %arg3: memref<16x32xf32, #tpu.memory_space<vmem>>, %arg4: memref<16x32xf32, #tpu.memory_space<vmem>>, %arg5: memref<1x128xf32, #tpu.memory_space<vmem>>, %arg6: memref<128x384xf32, #tpu.memory_space<vmem>>, %arg7: memref<128x128xf32, #tpu.memory_space<vmem>>, %arg8: memref<1x128xf32, #tpu.memory_space<vmem>>, %arg9: memref<128x512xf32, #tpu.memory_space<vmem>>, %arg10: memref<256x128xf32, #tpu.memory_space<vmem>>, %arg11: memref<1x16x128xf32, #tpu.memory_space<vmem>>) attributes {dimension_semantics = [#tpu.dimension_semantics<parallel>], iteration_bounds = array<i64: 2>, scalar_prefetch = 0 : i64, scratch_operands = 0 : i64, tpu.core_type = #tpu.core_type<tc>, window_params = [{transform_indices = @transform_0, window_bounds = array<i64: 1, 16, 128>}, {transform_indices = @transform_1, window_bounds = array<i64: 1, 16, 16>}, {pipeline_mode = #tpu.pipeline_mode<synchronous>, transform_indices = @transform_2, window_bounds = array<i64: 16, 32>}, {pipeline_mode = #tpu.pipeline_mode<synchronous>, transform_indices = @transform_3, window_bounds = array<i64: 16, 32>}, {pipeline_mode = #tpu.pipeline_mode<synchronous>, transform_indices = @transform_4, window_bounds = array<i64: 1, 128>}, {pipeline_mode = #tpu.pipeline_mode<synchronous>, transform_indices = @transform_5, window_bounds = array<i64: 128, 384>}, {pipeline_mode = #tpu.pipeline_mode<synchronous>, transform_indices = @transform_6, window_bounds = array<i64: 128, 128>}, {pipeline_mode = #tpu.pipeline_mode<synchronous>, transform_indices = @transform_7, window_bounds = array<i64: 1, 128>}, {pipeline_mode = #tpu.pipeline_mode<synchronous>, transform_indices = @transform_8, window_bounds = array<i64: 128, 512>}, {pipeline_mode = #tpu.pipeline_mode<synchronous>, transform_indices = @transform_9, window_bounds = array<i64: 256, 128>}, {transform_indices = @transform_10, window_bounds = array<i64: 1, 16, 128>}]} {
    %c0 = arith.constant 0 : index
    %c0_0 = arith.constant 0 : index
    %c0_1 = arith.constant 0 : index
    %0 = vector.load %arg1[%c0, %c0_0, %c0_1] : memref<1x16x128xf32, #tpu.memory_space<vmem>>, vector<1x16x128xf32>
    %1 = vector.shape_cast %0 : vector<1x16x128xf32> to vector<16x128xf32>
    %c0_2 = arith.constant 0 : index
    %c0_3 = arith.constant 0 : index
    %c0_4 = arith.constant 0 : index
    %2 = vector.load %arg2[%c0_2, %c0_3, %c0_4] : memref<1x16x16xf32, #tpu.memory_space<vmem>>, vector<1x16x16xf32>
    %3 = vector.shape_cast %2 : vector<1x16x16xf32> to vector<16x16xf32>
    %c0_5 = arith.constant 0 : index
    %c0_6 = arith.constant 0 : index
    %4 = vector.load %arg3[%c0_5, %c0_6] : memref<16x32xf32, #tpu.memory_space<vmem>>, vector<16x32xf32>
    %c0_7 = arith.constant 0 : index
    %c0_8 = arith.constant 0 : index
    %5 = vector.load %arg4[%c0_7, %c0_8] : memref<16x32xf32, #tpu.memory_space<vmem>>, vector<16x32xf32>
    %c0_9 = arith.constant 0 : index
    %c0_10 = arith.constant 0 : index
    %6 = vector.load %arg7[%c0_9, %c0_10] : memref<128x128xf32, #tpu.memory_space<vmem>>, vector<128x128xf32>
    %c0_11 = arith.constant 0 : index
    %c0_12 = arith.constant 0 : index
    %7 = vector.load %arg5[%c0_11, %c0_12] : memref<1x128xf32, #tpu.memory_space<vmem>>, vector<1x128xf32>
    %8 = arith.mulf %1, %1 : vector<16x128xf32>
    %cst = arith.constant dense<0.000000e+00> : vector<16xf32>
    %9 = vector.multi_reduction <add>, %8, %cst [1] : vector<16x128xf32> to vector<16xf32>
    %10 = vector.shape_cast %9 : vector<16xf32> to vector<16x1xf32>
    %cst_13 = arith.constant 1.280000e+02 : f32
    %11 = vector.broadcast %cst_13 : f32 to vector<16x1xf32>
    %12 = arith.divf %10, %11 : vector<16x1xf32>
    %cst_14 = arith.constant 9.99999997E-7 : f32
    %13 = vector.broadcast %cst_14 : f32 to vector<16x1xf32>
    %14 = arith.addf %12, %13 : vector<16x1xf32>
    %15 = math.rsqrt %14 : vector<16x1xf32>
    %16 = vector.broadcast %15 : vector<16x1xf32> to vector<16x128xf32>
    %17 = arith.mulf %1, %16 : vector<16x128xf32>
    %18 = vector.broadcast %7 : vector<1x128xf32> to vector<16x128xf32>
    %19 = arith.mulf %17, %18 : vector<16x128xf32>
    %c0_15 = arith.constant 0 : index
    %c0_16 = arith.constant 0 : index
    %20 = vector.load %arg6[%c0_15, %c0_16] : memref<128x384xf32, #tpu.memory_space<vmem>>, vector<128x384xf32>
    %cst_17 = arith.constant dense<0.000000e+00> : vector<16x384xf32>
    %21 = tpu.matmul %19, %20, %cst_17 {dimension_numbers = #tpu.dot_dimension_numbers<[1], [0], [0], [1], [0, 0, 1, 1], [], []>} : vector<16x128xf32>, vector<128x384xf32>, vector<16x384xf32> -> vector<16x384xf32>
    %22 = vector.extract_strided_slice %21 {offsets = [0, 0], sizes = [16, 32], strides = [1, 1]} : vector<16x384xf32> to vector<16x32xf32>
    %23 = vector.extract_strided_slice %22 {offsets = [0, 0], sizes = [16, 16], strides = [1, 1]} : vector<16x32xf32> to vector<16x16xf32>
    %24 = vector.extract_strided_slice %22 {offsets = [0, 16], sizes = [16, 16], strides = [1, 1]} : vector<16x32xf32> to vector<16x16xf32>
    %cst_18 = arith.constant 0.000000e+00 : f32
    %25 = vector.broadcast %cst_18 : f32 to vector<16x16xf32>
    %26 = arith.subf %25, %24 : vector<16x16xf32>
    %27 = tpu.concatenate %26, %23 in 1 : vector<16x16xf32>, vector<16x16xf32> -> vector<16x32xf32>
    %28 = arith.mulf %22, %4 : vector<16x32xf32>
    %29 = arith.mulf %27, %5 : vector<16x32xf32>
    %30 = arith.addf %28, %29 : vector<16x32xf32>
    %31 = vector.extract_strided_slice %21 {offsets = [0, 128], sizes = [16, 32], strides = [1, 1]} : vector<16x384xf32> to vector<16x32xf32>
    %32 = vector.extract_strided_slice %31 {offsets = [0, 0], sizes = [16, 16], strides = [1, 1]} : vector<16x32xf32> to vector<16x16xf32>
    %33 = vector.extract_strided_slice %31 {offsets = [0, 16], sizes = [16, 16], strides = [1, 1]} : vector<16x32xf32> to vector<16x16xf32>
    %cst_19 = arith.constant 0.000000e+00 : f32
    %34 = vector.broadcast %cst_19 : f32 to vector<16x16xf32>
    %35 = arith.subf %34, %33 : vector<16x16xf32>
    %36 = tpu.concatenate %35, %32 in 1 : vector<16x16xf32>, vector<16x16xf32> -> vector<16x32xf32>
    %37 = arith.mulf %31, %4 : vector<16x32xf32>
    %38 = arith.mulf %36, %5 : vector<16x32xf32>
    %39 = arith.addf %37, %38 : vector<16x32xf32>
    %40 = vector.extract_strided_slice %21 {offsets = [0, 256], sizes = [16, 32], strides = [1, 1]} : vector<16x384xf32> to vector<16x32xf32>
    %41 = tpu.transpose %39, [1, 0] : vector<16x32xf32> -> vector<32x16xf32>
    %cst_20 = arith.constant dense<0.000000e+00> : vector<16x16xf32>
    %42 = tpu.matmul %30, %41, %cst_20 {dimension_numbers = #tpu.dot_dimension_numbers<[1], [0], [0], [1], [0, 0, 1, 1], [], []>} : vector<16x32xf32>, vector<32x16xf32>, vector<16x16xf32> -> vector<16x16xf32>
    %cst_21 = arith.constant 0.176776692 : f32
    %43 = vector.broadcast %cst_21 : f32 to vector<16x16xf32>
    %44 = arith.mulf %42, %43 : vector<16x16xf32>
    %45 = arith.addf %44, %3 : vector<16x16xf32>
    %cst_22 = arith.constant dense<0xFF800000> : vector<16xf32>
    %46 = vector.multi_reduction <maximumf>, %45, %cst_22 [1] : vector<16x16xf32> to vector<16xf32>
    %47 = vector.shape_cast %46 : vector<16xf32> to vector<16x1xf32>
    %48 = vector.broadcast %47 : vector<16x1xf32> to vector<16x16xf32>
    %49 = arith.subf %45, %48 : vector<16x16xf32>
    %50 = math.exp %49 : vector<16x16xf32>
    %cst_23 = arith.constant dense<0.000000e+00> : vector<16xf32>
    %51 = vector.multi_reduction <add>, %50, %cst_23 [1] : vector<16x16xf32> to vector<16xf32>
    %52 = vector.shape_cast %51 : vector<16xf32> to vector<16x1xf32>
    %53 = tpu.reciprocal %52 {approx = true} : vector<16x1xf32> -> vector<16x1xf32>
    %54 = vector.broadcast %53 : vector<16x1xf32> to vector<16x16xf32>
    %55 = arith.mulf %50, %54 : vector<16x16xf32>
    %cst_24 = arith.constant dense<0.000000e+00> : vector<16x32xf32>
    %56 = tpu.matmul %55, %40, %cst_24 {dimension_numbers = #tpu.dot_dimension_numbers<[1], [0], [0], [1], [0, 0, 1, 1], [], []>} : vector<16x16xf32>, vector<16x32xf32>, vector<16x32xf32> -> vector<16x32xf32>
    %57 = vector.extract_strided_slice %6 {offsets = [0, 0], sizes = [32, 128], strides = [1, 1]} : vector<128x128xf32> to vector<32x128xf32>
    %cst_25 = arith.constant dense<0.000000e+00> : vector<16x128xf32>
    %58 = tpu.matmul %56, %57, %cst_25 {dimension_numbers = #tpu.dot_dimension_numbers<[1], [0], [0], [1], [0, 0, 1, 1], [], []>} : vector<16x32xf32>, vector<32x128xf32>, vector<16x128xf32> -> vector<16x128xf32>
    %59 = vector.extract_strided_slice %21 {offsets = [0, 32], sizes = [16, 32], strides = [1, 1]} : vector<16x384xf32> to vector<16x32xf32>
    %60 = vector.extract_strided_slice %59 {offsets = [0, 0], sizes = [16, 16], strides = [1, 1]} : vector<16x32xf32> to vector<16x16xf32>
    %61 = vector.extract_strided_slice %59 {offsets = [0, 16], sizes = [16, 16], strides = [1, 1]} : vector<16x32xf32> to vector<16x16xf32>
    %cst_26 = arith.constant 0.000000e+00 : f32
    %62 = vector.broadcast %cst_26 : f32 to vector<16x16xf32>
    %63 = arith.subf %62, %61 : vector<16x16xf32>
    %64 = tpu.concatenate %63, %60 in 1 : vector<16x16xf32>, vector<16x16xf32> -> vector<16x32xf32>
    %65 = arith.mulf %59, %4 : vector<16x32xf32>
    %66 = arith.mulf %64, %5 : vector<16x32xf32>
    %67 = arith.addf %65, %66 : vector<16x32xf32>
    %68 = vector.extract_strided_slice %21 {offsets = [0, 160], sizes = [16, 32], strides = [1, 1]} : vector<16x384xf32> to vector<16x32xf32>
    %69 = vector.extract_strided_slice %68 {offsets = [0, 0], sizes = [16, 16], strides = [1, 1]} : vector<16x32xf32> to vector<16x16xf32>
    %70 = vector.extract_strided_slice %68 {offsets = [0, 16], sizes = [16, 16], strides = [1, 1]} : vector<16x32xf32> to vector<16x16xf32>
    %cst_27 = arith.constant 0.000000e+00 : f32
    %71 = vector.broadcast %cst_27 : f32 to vector<16x16xf32>
    %72 = arith.subf %71, %70 : vector<16x16xf32>
    %73 = tpu.concatenate %72, %69 in 1 : vector<16x16xf32>, vector<16x16xf32> -> vector<16x32xf32>
    %74 = arith.mulf %68, %4 : vector<16x32xf32>
    %75 = arith.mulf %73, %5 : vector<16x32xf32>
    %76 = arith.addf %74, %75 : vector<16x32xf32>
    %77 = vector.extract_strided_slice %21 {offsets = [0, 288], sizes = [16, 32], strides = [1, 1]} : vector<16x384xf32> to vector<16x32xf32>
    %78 = tpu.transpose %76, [1, 0] : vector<16x32xf32> -> vector<32x16xf32>
    %cst_28 = arith.constant dense<0.000000e+00> : vector<16x16xf32>
    %79 = tpu.matmul %67, %78, %cst_28 {dimension_numbers = #tpu.dot_dimension_numbers<[1], [0], [0], [1], [0, 0, 1, 1], [], []>} : vector<16x32xf32>, vector<32x16xf32>, vector<16x16xf32> -> vector<16x16xf32>
    %cst_29 = arith.constant 0.176776692 : f32
    %80 = vector.broadcast %cst_29 : f32 to vector<16x16xf32>
    %81 = arith.mulf %79, %80 : vector<16x16xf32>
    %82 = arith.addf %81, %3 : vector<16x16xf32>
    %cst_30 = arith.constant dense<0xFF800000> : vector<16xf32>
    %83 = vector.multi_reduction <maximumf>, %82, %cst_30 [1] : vector<16x16xf32> to vector<16xf32>
    %84 = vector.shape_cast %83 : vector<16xf32> to vector<16x1xf32>
    %85 = vector.broadcast %84 : vector<16x1xf32> to vector<16x16xf32>
    %86 = arith.subf %82, %85 : vector<16x16xf32>
    %87 = math.exp %86 : vector<16x16xf32>
    %cst_31 = arith.constant dense<0.000000e+00> : vector<16xf32>
    %88 = vector.multi_reduction <add>, %87, %cst_31 [1] : vector<16x16xf32> to vector<16xf32>
    %89 = vector.shape_cast %88 : vector<16xf32> to vector<16x1xf32>
    %90 = tpu.reciprocal %89 {approx = true} : vector<16x1xf32> -> vector<16x1xf32>
    %91 = vector.broadcast %90 : vector<16x1xf32> to vector<16x16xf32>
    %92 = arith.mulf %87, %91 : vector<16x16xf32>
    %cst_32 = arith.constant dense<0.000000e+00> : vector<16x32xf32>
    %93 = tpu.matmul %92, %77, %cst_32 {dimension_numbers = #tpu.dot_dimension_numbers<[1], [0], [0], [1], [0, 0, 1, 1], [], []>} : vector<16x16xf32>, vector<16x32xf32>, vector<16x32xf32> -> vector<16x32xf32>
    %94 = vector.extract_strided_slice %6 {offsets = [32, 0], sizes = [32, 128], strides = [1, 1]} : vector<128x128xf32> to vector<32x128xf32>
    %cst_33 = arith.constant dense<0.000000e+00> : vector<16x128xf32>
    %95 = tpu.matmul %93, %94, %cst_33 {dimension_numbers = #tpu.dot_dimension_numbers<[1], [0], [0], [1], [0, 0, 1, 1], [], []>} : vector<16x32xf32>, vector<32x128xf32>, vector<16x128xf32> -> vector<16x128xf32>
    %96 = arith.addf %58, %95 : vector<16x128xf32>
    %97 = vector.extract_strided_slice %21 {offsets = [0, 64], sizes = [16, 32], strides = [1, 1]} : vector<16x384xf32> to vector<16x32xf32>
    %98 = vector.extract_strided_slice %97 {offsets = [0, 0], sizes = [16, 16], strides = [1, 1]} : vector<16x32xf32> to vector<16x16xf32>
    %99 = vector.extract_strided_slice %97 {offsets = [0, 16], sizes = [16, 16], strides = [1, 1]} : vector<16x32xf32> to vector<16x16xf32>
    %cst_34 = arith.constant 0.000000e+00 : f32
    %100 = vector.broadcast %cst_34 : f32 to vector<16x16xf32>
    %101 = arith.subf %100, %99 : vector<16x16xf32>
    %102 = tpu.concatenate %101, %98 in 1 : vector<16x16xf32>, vector<16x16xf32> -> vector<16x32xf32>
    %103 = arith.mulf %97, %4 : vector<16x32xf32>
    %104 = arith.mulf %102, %5 : vector<16x32xf32>
    %105 = arith.addf %103, %104 : vector<16x32xf32>
    %106 = vector.extract_strided_slice %21 {offsets = [0, 192], sizes = [16, 32], strides = [1, 1]} : vector<16x384xf32> to vector<16x32xf32>
    %107 = vector.extract_strided_slice %106 {offsets = [0, 0], sizes = [16, 16], strides = [1, 1]} : vector<16x32xf32> to vector<16x16xf32>
    %108 = vector.extract_strided_slice %106 {offsets = [0, 16], sizes = [16, 16], strides = [1, 1]} : vector<16x32xf32> to vector<16x16xf32>
    %cst_35 = arith.constant 0.000000e+00 : f32
    %109 = vector.broadcast %cst_35 : f32 to vector<16x16xf32>
    %110 = arith.subf %109, %108 : vector<16x16xf32>
    %111 = tpu.concatenate %110, %107 in 1 : vector<16x16xf32>, vector<16x16xf32> -> vector<16x32xf32>
    %112 = arith.mulf %106, %4 : vector<16x32xf32>
    %113 = arith.mulf %111, %5 : vector<16x32xf32>
    %114 = arith.addf %112, %113 : vector<16x32xf32>
    %115 = vector.extract_strided_slice %21 {offsets = [0, 320], sizes = [16, 32], strides = [1, 1]} : vector<16x384xf32> to vector<16x32xf32>
    %116 = tpu.transpose %114, [1, 0] : vector<16x32xf32> -> vector<32x16xf32>
    %cst_36 = arith.constant dense<0.000000e+00> : vector<16x16xf32>
    %117 = tpu.matmul %105, %116, %cst_36 {dimension_numbers = #tpu.dot_dimension_numbers<[1], [0], [0], [1], [0, 0, 1, 1], [], []>} : vector<16x32xf32>, vector<32x16xf32>, vector<16x16xf32> -> vector<16x16xf32>
    %cst_37 = arith.constant 0.176776692 : f32
    %118 = vector.broadcast %cst_37 : f32 to vector<16x16xf32>
    %119 = arith.mulf %117, %118 : vector<16x16xf32>
    %120 = arith.addf %119, %3 : vector<16x16xf32>
    %cst_38 = arith.constant dense<0xFF800000> : vector<16xf32>
    %121 = vector.multi_reduction <maximumf>, %120, %cst_38 [1] : vector<16x16xf32> to vector<16xf32>
    %122 = vector.shape_cast %121 : vector<16xf32> to vector<16x1xf32>
    %123 = vector.broadcast %122 : vector<16x1xf32> to vector<16x16xf32>
    %124 = arith.subf %120, %123 : vector<16x16xf32>
    %125 = math.exp %124 : vector<16x16xf32>
    %cst_39 = arith.constant dense<0.000000e+00> : vector<16xf32>
    %126 = vector.multi_reduction <add>, %125, %cst_39 [1] : vector<16x16xf32> to vector<16xf32>
    %127 = vector.shape_cast %126 : vector<16xf32> to vector<16x1xf32>
    %128 = tpu.reciprocal %127 {approx = true} : vector<16x1xf32> -> vector<16x1xf32>
    %129 = vector.broadcast %128 : vector<16x1xf32> to vector<16x16xf32>
    %130 = arith.mulf %125, %129 : vector<16x16xf32>
    %cst_40 = arith.constant dense<0.000000e+00> : vector<16x32xf32>
    %131 = tpu.matmul %130, %115, %cst_40 {dimension_numbers = #tpu.dot_dimension_numbers<[1], [0], [0], [1], [0, 0, 1, 1], [], []>} : vector<16x16xf32>, vector<16x32xf32>, vector<16x32xf32> -> vector<16x32xf32>
    %132 = vector.extract_strided_slice %6 {offsets = [64, 0], sizes = [32, 128], strides = [1, 1]} : vector<128x128xf32> to vector<32x128xf32>
    %cst_41 = arith.constant dense<0.000000e+00> : vector<16x128xf32>
    %133 = tpu.matmul %131, %132, %cst_41 {dimension_numbers = #tpu.dot_dimension_numbers<[1], [0], [0], [1], [0, 0, 1, 1], [], []>} : vector<16x32xf32>, vector<32x128xf32>, vector<16x128xf32> -> vector<16x128xf32>
    %134 = arith.addf %96, %133 : vector<16x128xf32>
    %135 = vector.extract_strided_slice %21 {offsets = [0, 96], sizes = [16, 32], strides = [1, 1]} : vector<16x384xf32> to vector<16x32xf32>
    %136 = vector.extract_strided_slice %135 {offsets = [0, 0], sizes = [16, 16], strides = [1, 1]} : vector<16x32xf32> to vector<16x16xf32>
    %137 = vector.extract_strided_slice %135 {offsets = [0, 16], sizes = [16, 16], strides = [1, 1]} : vector<16x32xf32> to vector<16x16xf32>
    %cst_42 = arith.constant 0.000000e+00 : f32
    %138 = vector.broadcast %cst_42 : f32 to vector<16x16xf32>
    %139 = arith.subf %138, %137 : vector<16x16xf32>
    %140 = tpu.concatenate %139, %136 in 1 : vector<16x16xf32>, vector<16x16xf32> -> vector<16x32xf32>
    %141 = arith.mulf %135, %4 : vector<16x32xf32>
    %142 = arith.mulf %140, %5 : vector<16x32xf32>
    %143 = arith.addf %141, %142 : vector<16x32xf32>
    %144 = vector.extract_strided_slice %21 {offsets = [0, 224], sizes = [16, 32], strides = [1, 1]} : vector<16x384xf32> to vector<16x32xf32>
    %145 = vector.extract_strided_slice %144 {offsets = [0, 0], sizes = [16, 16], strides = [1, 1]} : vector<16x32xf32> to vector<16x16xf32>
    %146 = vector.extract_strided_slice %144 {offsets = [0, 16], sizes = [16, 16], strides = [1, 1]} : vector<16x32xf32> to vector<16x16xf32>
    %cst_43 = arith.constant 0.000000e+00 : f32
    %147 = vector.broadcast %cst_43 : f32 to vector<16x16xf32>
    %148 = arith.subf %147, %146 : vector<16x16xf32>
    %149 = tpu.concatenate %148, %145 in 1 : vector<16x16xf32>, vector<16x16xf32> -> vector<16x32xf32>
    %150 = arith.mulf %144, %4 : vector<16x32xf32>
    %151 = arith.mulf %149, %5 : vector<16x32xf32>
    %152 = arith.addf %150, %151 : vector<16x32xf32>
    %153 = vector.extract_strided_slice %21 {offsets = [0, 352], sizes = [16, 32], strides = [1, 1]} : vector<16x384xf32> to vector<16x32xf32>
    %154 = tpu.transpose %152, [1, 0] : vector<16x32xf32> -> vector<32x16xf32>
    %cst_44 = arith.constant dense<0.000000e+00> : vector<16x16xf32>
    %155 = tpu.matmul %143, %154, %cst_44 {dimension_numbers = #tpu.dot_dimension_numbers<[1], [0], [0], [1], [0, 0, 1, 1], [], []>} : vector<16x32xf32>, vector<32x16xf32>, vector<16x16xf32> -> vector<16x16xf32>
    %cst_45 = arith.constant 0.176776692 : f32
    %156 = vector.broadcast %cst_45 : f32 to vector<16x16xf32>
    %157 = arith.mulf %155, %156 : vector<16x16xf32>
    %158 = arith.addf %157, %3 : vector<16x16xf32>
    %cst_46 = arith.constant dense<0xFF800000> : vector<16xf32>
    %159 = vector.multi_reduction <maximumf>, %158, %cst_46 [1] : vector<16x16xf32> to vector<16xf32>
    %160 = vector.shape_cast %159 : vector<16xf32> to vector<16x1xf32>
    %161 = vector.broadcast %160 : vector<16x1xf32> to vector<16x16xf32>
    %162 = arith.subf %158, %161 : vector<16x16xf32>
    %163 = math.exp %162 : vector<16x16xf32>
    %cst_47 = arith.constant dense<0.000000e+00> : vector<16xf32>
    %164 = vector.multi_reduction <add>, %163, %cst_47 [1] : vector<16x16xf32> to vector<16xf32>
    %165 = vector.shape_cast %164 : vector<16xf32> to vector<16x1xf32>
    %166 = tpu.reciprocal %165 {approx = true} : vector<16x1xf32> -> vector<16x1xf32>
    %167 = vector.broadcast %166 : vector<16x1xf32> to vector<16x16xf32>
    %168 = arith.mulf %163, %167 : vector<16x16xf32>
    %cst_48 = arith.constant dense<0.000000e+00> : vector<16x32xf32>
    %169 = tpu.matmul %168, %153, %cst_48 {dimension_numbers = #tpu.dot_dimension_numbers<[1], [0], [0], [1], [0, 0, 1, 1], [], []>} : vector<16x16xf32>, vector<16x32xf32>, vector<16x32xf32> -> vector<16x32xf32>
    %170 = vector.extract_strided_slice %6 {offsets = [96, 0], sizes = [32, 128], strides = [1, 1]} : vector<128x128xf32> to vector<32x128xf32>
    %cst_49 = arith.constant dense<0.000000e+00> : vector<16x128xf32>
    %171 = tpu.matmul %169, %170, %cst_49 {dimension_numbers = #tpu.dot_dimension_numbers<[1], [0], [0], [1], [0, 0, 1, 1], [], []>} : vector<16x32xf32>, vector<32x128xf32>, vector<16x128xf32> -> vector<16x128xf32>
    %172 = arith.addf %134, %171 : vector<16x128xf32>
    %173 = arith.addf %1, %172 : vector<16x128xf32>
    %c0_50 = arith.constant 0 : index
    %c0_51 = arith.constant 0 : index
    %174 = vector.load %arg8[%c0_50, %c0_51] : memref<1x128xf32, #tpu.memory_space<vmem>>, vector<1x128xf32>
    %175 = arith.mulf %173, %173 : vector<16x128xf32>
    %cst_52 = arith.constant dense<0.000000e+00> : vector<16xf32>
    %176 = vector.multi_reduction <add>, %175, %cst_52 [1] : vector<16x128xf32> to vector<16xf32>
    %177 = vector.shape_cast %176 : vector<16xf32> to vector<16x1xf32>
    %cst_53 = arith.constant 1.280000e+02 : f32
    %178 = vector.broadcast %cst_53 : f32 to vector<16x1xf32>
    %179 = arith.divf %177, %178 : vector<16x1xf32>
    %cst_54 = arith.constant 9.99999997E-7 : f32
    %180 = vector.broadcast %cst_54 : f32 to vector<16x1xf32>
    %181 = arith.addf %179, %180 : vector<16x1xf32>
    %182 = math.rsqrt %181 : vector<16x1xf32>
    %183 = vector.broadcast %182 : vector<16x1xf32> to vector<16x128xf32>
    %184 = arith.mulf %173, %183 : vector<16x128xf32>
    %185 = vector.broadcast %174 : vector<1x128xf32> to vector<16x128xf32>
    %186 = arith.mulf %184, %185 : vector<16x128xf32>
    %c0_55 = arith.constant 0 : index
    %c0_56 = arith.constant 0 : index
    %187 = vector.load %arg9[%c0_55, %c0_56] : memref<128x512xf32, #tpu.memory_space<vmem>>, vector<128x512xf32>
    %cst_57 = arith.constant dense<0.000000e+00> : vector<16x512xf32>
    %188 = tpu.matmul %186, %187, %cst_57 {dimension_numbers = #tpu.dot_dimension_numbers<[1], [0], [0], [1], [0, 0, 1, 1], [], []>} : vector<16x128xf32>, vector<128x512xf32>, vector<16x512xf32> -> vector<16x512xf32>
    %189 = vector.extract_strided_slice %188 {offsets = [0, 0], sizes = [16, 256], strides = [1, 1]} : vector<16x512xf32> to vector<16x256xf32>
    %190 = vector.extract_strided_slice %188 {offsets = [0, 256], sizes = [16, 256], strides = [1, 1]} : vector<16x512xf32> to vector<16x256xf32>
    %cst_58 = arith.constant 0.000000e+00 : f32
    %191 = vector.broadcast %cst_58 : f32 to vector<16x256xf32>
    %192 = arith.subf %191, %189 : vector<16x256xf32>
    %193 = math.exp %192 : vector<16x256xf32>
    %cst_59 = arith.constant 1.000000e+00 : f32
    %194 = vector.broadcast %cst_59 : f32 to vector<16x256xf32>
    %195 = arith.addf %194, %193 : vector<16x256xf32>
    %196 = tpu.reciprocal %195 {approx = true} : vector<16x256xf32> -> vector<16x256xf32>
    %197 = arith.mulf %189, %196 : vector<16x256xf32>
    %198 = arith.mulf %197, %190 : vector<16x256xf32>
    %c0_60 = arith.constant 0 : index
    %c0_61 = arith.constant 0 : index
    %199 = vector.load %arg10[%c0_60, %c0_61] : memref<256x128xf32, #tpu.memory_space<vmem>>, vector<256x128xf32>
    %cst_62 = arith.constant dense<0.000000e+00> : vector<16x128xf32>
    %200 = tpu.matmul %198, %199, %cst_62 {dimension_numbers = #tpu.dot_dimension_numbers<[1], [0], [0], [1], [0, 0, 1, 1], [], []>} : vector<16x256xf32>, vector<256x128xf32>, vector<16x128xf32> -> vector<16x128xf32>
    %201 = arith.addf %173, %200 : vector<16x128xf32>
    %c0_63 = arith.constant 0 : index
    %c0_64 = arith.constant 0 : index
    %c0_65 = arith.constant 0 : index
    %202 = vector.load %arg11[%c0_63, %c0_64, %c0_65] : memref<1x16x128xf32, #tpu.memory_space<vmem>>, vector<1x16x128xf32>
    %203 = vector.shape_cast %202 : vector<1x16x128xf32> to vector<16x128xf32>
    %204 = vector.shape_cast %201 : vector<16x128xf32> to vector<1x16x128xf32>
    tpu.vector_store %arg11[%c0_63, %c0_64, %c0_65], %204 {strides = array<i32>} : memref<1x16x128xf32, #tpu.memory_space<vmem>>, vector<1x16x128xf32>,
    return
  }
  func.func @transform_0(%arg0: i32) -> (i32, i32, i32) {
    %c0_i32 = arith.constant 0 : i32
    %c0_i32_0 = arith.constant 0 : i32
    %c0_i32_1 = arith.constant 0 : i32
    return %arg0, %c0_i32, %c0_i32_0 : i32, i32, i32
  }
  func.func @transform_1(%arg0: i32) -> (i32, i32, i32) {
    %c0_i32 = arith.constant 0 : i32
    %c0_i32_0 = arith.constant 0 : i32
    %c0_i32_1 = arith.constant 0 : i32
    return %arg0, %c0_i32, %c0_i32_0 : i32, i32, i32
  }
  func.func @transform_2(%arg0: i32) -> (i32, i32) {
    %c0_i32 = arith.constant 0 : i32
    %c0_i32_0 = arith.constant 0 : i32
    %c0_i32_1 = arith.constant 0 : i32
    return %c0_i32, %c0_i32_0 : i32, i32
  }
  func.func @transform_3(%arg0: i32) -> (i32, i32) {
    %c0_i32 = arith.constant 0 : i32
    %c0_i32_0 = arith.constant 0 : i32
    %c0_i32_1 = arith.constant 0 : i32
    return %c0_i32, %c0_i32_0 : i32, i32
  }
  func.func @transform_4(%arg0: i32) -> (i32, i32) {
    %c0_i32 = arith.constant 0 : i32
    %c0_i32_0 = arith.constant 0 : i32
    %c0_i32_1 = arith.constant 0 : i32
    return %c0_i32, %c0_i32_0 : i32, i32
  }
  func.func @transform_5(%arg0: i32) -> (i32, i32) {
    %c0_i32 = arith.constant 0 : i32
    %c0_i32_0 = arith.constant 0 : i32
    %c0_i32_1 = arith.constant 0 : i32
    return %c0_i32, %c0_i32_0 : i32, i32
  }
  func.func @transform_6(%arg0: i32) -> (i32, i32) {
    %c0_i32 = arith.constant 0 : i32
    %c0_i32_0 = arith.constant 0 : i32
    %c0_i32_1 = arith.constant 0 : i32
    return %c0_i32, %c0_i32_0 : i32, i32
  }
  func.func @transform_7(%arg0: i32) -> (i32, i32) {
    %c0_i32 = arith.constant 0 : i32
    %c0_i32_0 = arith.constant 0 : i32
    %c0_i32_1 = arith.constant 0 : i32
    return %c0_i32, %c0_i32_0 : i32, i32
  }
  func.func @transform_8(%arg0: i32) -> (i32, i32) {
    %c0_i32 = arith.constant 0 : i32
    %c0_i32_0 = arith.constant 0 : i32
    %c0_i32_1 = arith.constant 0 : i32
    return %c0_i32, %c0_i32_0 : i32, i32
  }
  func.func @transform_9(%arg0: i32) -> (i32, i32) {
    %c0_i32 = arith.constant 0 : i32
    %c0_i32_0 = arith.constant 0 : i32
    %c0_i32_1 = arith.constant 0 : i32
    return %c0_i32, %c0_i32_0 : i32, i32
  }
  func.func @transform_10(%arg0: i32) -> (i32, i32, i32) {
    %c0_i32 = arith.constant 0 : i32
    %c0_i32_0 = arith.constant 0 : i32
    %c0_i32_1 = arith.constant 0 : i32
    return %arg0, %c0_i32, %c0_i32_0 : i32, i32, i32
  }
}

module attributes {stable_mosaic.version = 11 : i64} {
  func.func @_head_kernel(%arg0: memref<32x128xf32, #tpu.memory_space<vmem>>, %arg1: memref<1x128xf32, #tpu.memory_space<vmem>>, %arg2: memref<128x256xf32, #tpu.memory_space<vmem>>, %arg3: memref<32x1xi32, #tpu.memory_space<vmem>>, %arg4: memref<32x1xi32, #tpu.memory_space<vmem>>, %arg5: memref<1x4xf32, #tpu.memory_space<smem>>) attributes {dimension_semantics = [], scalar_prefetch = 0 : i64, scratch_operands = 0 : i64, tpu.core_type = #tpu.core_type<tc>} {
    %c0 = arith.constant 0 : index
    %c0_0 = arith.constant 0 : index
    %0 = vector.load %arg0[%c0, %c0_0] : memref<32x128xf32, #tpu.memory_space<vmem>>, vector<32x128xf32>
    %c0_1 = arith.constant 0 : index
    %c0_2 = arith.constant 0 : index
    %1 = vector.load %arg1[%c0_1, %c0_2] : memref<1x128xf32, #tpu.memory_space<vmem>>, vector<1x128xf32>
    %2 = arith.mulf %0, %0 : vector<32x128xf32>
    %cst = arith.constant dense<0.000000e+00> : vector<32xf32>
    %3 = vector.multi_reduction <add>, %2, %cst [1] : vector<32x128xf32> to vector<32xf32>
    %4 = vector.shape_cast %3 : vector<32xf32> to vector<32x1xf32>
    %cst_3 = arith.constant 1.280000e+02 : f32
    %5 = vector.broadcast %cst_3 : f32 to vector<32x1xf32>
    %6 = arith.divf %4, %5 : vector<32x1xf32>
    %cst_4 = arith.constant 9.99999997E-7 : f32
    %7 = vector.broadcast %cst_4 : f32 to vector<32x1xf32>
    %8 = arith.addf %6, %7 : vector<32x1xf32>
    %9 = math.rsqrt %8 : vector<32x1xf32>
    %10 = vector.broadcast %9 : vector<32x1xf32> to vector<32x128xf32>
    %11 = arith.mulf %0, %10 : vector<32x128xf32>
    %12 = vector.broadcast %1 : vector<1x128xf32> to vector<32x128xf32>
    %13 = arith.mulf %11, %12 : vector<32x128xf32>
    %c0_5 = arith.constant 0 : index
    %c0_6 = arith.constant 0 : index
    %14 = vector.load %arg2[%c0_5, %c0_6] : memref<128x256xf32, #tpu.memory_space<vmem>>, vector<128x256xf32>
    %cst_7 = arith.constant dense<0.000000e+00> : vector<32x256xf32>
    %15 = tpu.matmul %13, %14, %cst_7 {dimension_numbers = #tpu.dot_dimension_numbers<[1], [0], [0], [1], [0, 0, 1, 1], [], []>} : vector<32x128xf32>, vector<128x256xf32>, vector<32x256xf32> -> vector<32x256xf32>
    %cst_8 = arith.constant dense<0xFF800000> : vector<32xf32>
    %16 = vector.multi_reduction <maximumf>, %15, %cst_8 [1] : vector<32x256xf32> to vector<32xf32>
    %17 = vector.shape_cast %16 : vector<32xf32> to vector<32x1xf32>
    %18 = vector.broadcast %17 : vector<32x1xf32> to vector<32x256xf32>
    %19 = arith.subf %15, %18 : vector<32x256xf32>
    %20 = math.exp %19 : vector<32x256xf32>
    %cst_9 = arith.constant dense<0.000000e+00> : vector<32xf32>
    %21 = vector.multi_reduction <add>, %20, %cst_9 [1] : vector<32x256xf32> to vector<32xf32>
    %22 = vector.shape_cast %21 : vector<32xf32> to vector<32x1xf32>
    %23 = math.log %22 : vector<32x1xf32>
    %24 = arith.addf %23, %17 : vector<32x1xf32>
    %25 = tpu.iota {dimensions = array<i32: 1>} : vector<32x256xi32>
    %c0_10 = arith.constant 0 : index
    %c0_11 = arith.constant 0 : index
    %26 = vector.load %arg3[%c0_10, %c0_11] : memref<32x1xi32, #tpu.memory_space<vmem>>, vector<32x1xi32>
    %27 = vector.broadcast %26 : vector<32x1xi32> to vector<32x256xi32>
    %28 = arith.cmpi eq, %25, %27 : vector<32x256xi32>
    %29 = arith.extui %28 : vector<32x256xi1> to vector<32x256xi32>
    %30 = arith.sitofp %29 : vector<32x256xi32> to vector<32x256xf32>
    %31 = arith.mulf %15, %30 : vector<32x256xf32>
    %cst_12 = arith.constant dense<0.000000e+00> : vector<32xf32>
    %32 = vector.multi_reduction <add>, %31, %cst_12 [1] : vector<32x256xf32> to vector<32xf32>
    %33 = vector.shape_cast %32 : vector<32xf32> to vector<32x1xf32>
    %c-100_i32 = arith.constant -100 : i32
    %34 = vector.broadcast %c-100_i32 : i32 to vector<32x1xi32>
    %35 = arith.cmpi ne, %26, %34 : vector<32x1xi32>
    %36 = arith.extui %35 : vector<32x1xi1> to vector<32x1xi32>
    %37 = arith.sitofp %36 : vector<32x1xi32> to vector<32x1xf32>
    %38 = arith.subf %24, %33 : vector<32x1xf32>
    %39 = arith.mulf %38, %37 : vector<32x1xf32>
    %40 = vector.shape_cast %39 : vector<32x1xf32> to vector<1x32x1xf32>
    %cst_13 = arith.constant dense<0.000000e+00> : vector<1xf32>
    %41 = vector.multi_reduction <add>, %40, %cst_13 [1, 2] : vector<1x32x1xf32> to vector<1xf32>
    %42 = vector.shape_cast %41 : vector<1xf32> to vector<1x1x1xf32>
    %43 = vector.extract %42[0, 0, 0] : f32 from vector<1x1x1xf32>
    %44 = vector.shape_cast %37 : vector<32x1xf32> to vector<1x32x1xf32>
    %cst_14 = arith.constant dense<0.000000e+00> : vector<1xf32>
    %45 = vector.multi_reduction <add>, %44, %cst_14 [1, 2] : vector<1x32x1xf32> to vector<1xf32>
    %46 = vector.shape_cast %45 : vector<1xf32> to vector<1x1x1xf32>
    %47 = vector.extract %46[0, 0, 0] : f32 from vector<1x1x1xf32>
    %48 = vector.broadcast %17 : vector<32x1xf32> to vector<32x256xf32>
    %49 = arith.cmpf oeq, %15, %48 : vector<32x256xf32>
    %c1073741824_i32 = arith.constant 1073741824 : i32
    %50 = vector.broadcast %c1073741824_i32 : i32 to vector<32x256xi32>
    %51 = arith.select %49, %25, %50 : vector<32x256xi1>, vector<32x256xi32>
    %cst_15 = arith.constant dense<2147483647> : vector<32xi32>
    %52 = vector.multi_reduction <minsi>, %51, %cst_15 [1] : vector<32x256xi32> to vector<32xi32>
    %53 = vector.shape_cast %52 : vector<32xi32> to vector<32x1xi32>
    %c0_16 = arith.constant 0 : index
    %c0_17 = arith.constant 0 : index
    %54 = vector.load %arg4[%c0_16, %c0_17] : memref<32x1xi32, #tpu.memory_space<vmem>>, vector<32x1xi32>
    %c-100_i32_18 = arith.constant -100 : i32
    %55 = vector.broadcast %c-100_i32_18 : i32 to vector<32x1xi32>
    %56 = arith.cmpi ne, %54, %55 : vector<32x1xi32>
    %57 = arith.cmpi eq, %53, %54 : vector<32x1xi32>
    %58 = arith.andi %57, %56 : vector<32x1xi1>
    %59 = arith.extui %58 : vector<32x1xi1> to vector<32x1xi32>
    %60 = arith.sitofp %59 : vector<32x1xi32> to vector<32x1xf32>
    %61 = vector.shape_cast %60 : vector<32x1xf32> to vector<1x32x1xf32>
    %cst_19 = arith.constant dense<0.000000e+00> : vector<1xf32>
    %62 = vector.multi_reduction <add>, %61, %cst_19 [1, 2] : vector<1x32x1xf32> to vector<1xf32>
    %63 = vector.shape_cast %62 : vector<1xf32> to vector<1x1x1xf32>
    %64 = vector.extract %63[0, 0, 0] : f32 from vector<1x1x1xf32>
    %65 = arith.extui %56 : vector<32x1xi1> to vector<32x1xi32>
    %66 = arith.sitofp %65 : vector<32x1xi32> to vector<32x1xf32>
    %67 = vector.shape_cast %66 : vector<32x1xf32> to vector<1x32x1xf32>
    %cst_20 = arith.constant dense<0.000000e+00> : vector<1xf32>
    %68 = vector.multi_reduction <add>, %67, %cst_20 [1, 2] : vector<1x32x1xf32> to vector<1xf32>
    %69 = vector.shape_cast %68 : vector<1xf32> to vector<1x1x1xf32>
    %70 = vector.extract %69[0, 0, 0] : f32 from vector<1x1x1xf32>
    %c0_21 = arith.constant 0 : index
    %c0_22 = arith.constant 0 : index
    %71 = memref.load %arg5[%c0_21, %c0_22] : memref<1x4xf32, #tpu.memory_space<smem>>
    memref.store %43, %arg5[%c0_21, %c0_22] : memref<1x4xf32, #tpu.memory_space<smem>>
    %c0_23 = arith.constant 0 : index
    %c1 = arith.constant 1 : index
    %72 = memref.load %arg5[%c0_23, %c1] : memref<1x4xf32, #tpu.memory_space<smem>>
    memref.store %47, %arg5[%c0_23, %c1] : memref<1x4xf32, #tpu.memory_space<smem>>
    %c0_24 = arith.constant 0 : index
    %c2 = arith.constant 2 : index
    %73 = memref.load %arg5[%c0_24, %c2] : memref<1x4xf32, #tpu.memory_space<smem>>
    memref.store %64, %arg5[%c0_24, %c2] : memref<1x4xf32, #tpu.memory_space<smem>>
    %c0_25 = arith.constant 0 : index
    %c3 = arith.constant 3 : index
    %74 = memref.load %arg5[%c0_25, %c3] : memref<1x4xf32, #tpu.memory_space<smem>>
    memref.store %70, %arg5[%c0_25, %c3] : memref<1x4xf32, #tpu.memory_space<smem>>
    return
  }
}

</mosaic_0001>

<bundles_post_ra>
// kernel: forward.4
= control target key start
LH: loop header
LB: loop body
LE: loop exit
PB: predicated region body
PF: predicated region fallthrough
CT: control target
= control target key end

     0   :  { %9 = vsyncpa [#allocation3], 0  ;;  %s782_s15 = smov [#allocation2]   ;;  %s886_s0 = inlined_call_operand.vmem [shape: f32[2,768], index: 0, kind: input, shape index: {}]   ;;  %s887_s1 = inlined_call_operand.hbm [shape: f32[768,128], index: 1, kind: input, shape index: {}]   ;;  %s888_s2 = inlined_call_operand.vmem [shape: f32[128,128], index: 2, kind: input, shape index: {}]   ;;  %s889_s3 = inlined_call_operand.vmem [shape: f32[1,128], index: 3, kind: input, shape index: {}]   ;;  %s890_s4 = inlined_call_operand.vmem [shape: f32[2,128], index: 4, kind: output, shape index: {}]  }
   0x1   :  { %s17_s16 = sshll.u32 %s782_s15, 4  ;;  %s758_s19 = scalar_lea.hbm %s887_s1, 12288  ;;  %s18_s16 = int_to_ptr.vmem [resolvable:$true] %s17_s16 }
   0x2   :  { %p759_p0 = scmp.ne.s32.totalorder %s887_s1, %s758_s19  ;;  %p762_p1 = scmp.lt.u32.totalorder %s758_s19, %s887_s1 }
   0x4   :  { %p764_p2 = pnand %p762_p1, %p759_p0 }
   0x6   :  { %767 = shalt.err (!%p764_p2)
}
   0x7   :  { %s768_s24 = scalar_lea.vmem %s18_s16, 12288  ;;  %p773_p4 = scmp.lt.s32.totalorder %s18_s16, %s18_s16 }
   0x8   :  { %p769_p3 = scmp.ne.s32.totalorder %s18_s16, %s768_s24  ;;  %p774_p5 = scmp.lt.s32.totalorder %s768_s24, %s768_s24 }
   0xa   :  { %p775_p6 = por %p774_p5, %p773_p4 }
   0xc   :  { %p776_p7 = pnand %p775_p6, %p769_p3 }
   0xe   :  { %779 = shalt.err (!%p776_p7)
}
   0xf   :  { %s783_s25 = smov 128   ;;  %s784_s26 = smov 8  }
  0x10   :  { %23 = dma.hbm_to_vmem [thread:$0]  %s887_s1, 12288, %s18_s16, [#allocation3], %s783_s25, %s783_s25, %s784_s26  }
  0x11   :  { %780 = dma.done.wait [#allocation3], 12288  }
  0x12   :  { %781 = vsyncadd [#allocation3], 4294955008  ;;  %v49_v0 = vld [vmem:[#allocation2 + $0x80] sm:$0xff]  ;;  %v50_v1 = vld [vmem:[#allocation2 + $0x88] sm:$0xff]  ;;  %v785_v47 = vmov 1983009808   ;;  %v135_v49 = vlaneseq }
  0x13   :  { %v81_v2 = vld [vmem:[#allocation2 + $0x180] sm:$0xff]  ;;  %v630_v3 = vpack.c.bf16 %v50_v1, %v49_v0  ;;  %v82_v4 = vld [vmem:[#allocation2 + $0x188] sm:$0xff]  ;;  %v51_v11 = vld [vmem:[#allocation2 + $0x90] sm:$0xff]  ;;  %v133_v48 = vunpack.c.l.s4 %v785_v47  ;;  %vm787_vm0 = vmmov 0  }
  0x14   :  { %v33_v5 = vld [vmem:[#allocation2] sm:$0xff]  ;;  %v34_v6 = vld [vmem:[#allocation2 + $0x8] sm:$0xff]  ;;  %v662_v7 = vpack.c.bf16 %v82_v4, %v81_v2  ;;  %v52_v13 = vld [vmem:[#allocation2 + $0x98] sm:$0xff]  ;;  %v136_v0 = vshrl.u32 %v135_v49, 7 }
  0x15   :  { %v632_v8 = vpack.c.bf16 %v34_v6, %v33_v5  ;;  %v65_v9 = vld [vmem:[#allocation2 + $0x100] sm:$0xff]  ;;  %v66_v10 = vld [vmem:[#allocation2 + $0x108] sm:$0xff]  ;;  %631 = vmatprep.subr.bf16.mxu0 %v630_v3  ;;  %v83_v14 = vld [vmem:[#allocation2 + $0x190] sm:$0xff]  ;;  %v634_v16 = vpack.c.bf16 %v52_v13, %v51_v11  ;;  %v134_v63 = vunpack.c.0.s8 %v133_v48 }
  0x16   :  { %v664_v12 = vpack.c.bf16 %v66_v10, %v65_v9  ;;  %v84_v15 = vld [vmem:[#allocation2 + $0x198] sm:$0xff]  ;;  %663 = vmatprep.subr.bf16.mxu1 %v662_v7  ;;  %v35_v18 = vld [vmem:[#allocation2 + $0x10] sm:$0xff]  ;;  %v53_v23 = vld [vmem:[#allocation2 + $0xa0] sm:$0xff] }
  0x17   :  { %633 = vmatpush3.bf16.msra.mxu0 %v632_v8  ;;  %v666_v17 = vpack.c.bf16 %v84_v15, %v83_v14  ;;  %v36_v19 = vld [vmem:[#allocation2 + $0x18] sm:$0xff]  ;;  %v67_v20 = vld [vmem:[#allocation2 + $0x110] sm:$0xff]  ;;  %v54_v24 = vld [vmem:[#allocation2 + $0xa8] sm:$0xff]  ;;  %v137_v13 = vsub.s32 %v134_v63, %v136_v0 }
  0x18   :  { %665 = vmatpush3.bf16.msra.mxu1 %v664_v12  ;;  %v636_v21 = vpack.c.bf16 %v36_v19, %v35_v18  ;;  %v68_v22 = vld [vmem:[#allocation2 + $0x118] sm:$0xff]  ;;  %635 = vmatprep.subr.bf16.mxu0 %v634_v16  ;;  %v638_v26 = vpack.c.bf16 %v54_v24, %v53_v23  ;;  %v85_v27 = vld [vmem:[#allocation2 + $0x1a0] sm:$0xff]  ;;  %v86_v28 = vld [vmem:[#allocation2 + $0x1a8] sm:$0xff] }
  0x19   :  { %667 = vmatprep.subr.bf16.mxu1 %v666_v17  ;;  %v668_v25 = vpack.c.bf16 %v68_v22, %v67_v20  ;;  %v37_v29 = vld [vmem:[#allocation2 + $0x20] sm:$0xff]  ;;  %v670_v30 = vpack.c.bf16 %v86_v28, %v85_v27  ;;  %v38_v31 = vld [vmem:[#allocation2 + $0x28] sm:$0xff]  ;;  %v55_v35 = vld [vmem:[#allocation2 + $0xb0] sm:$0xff] }
  0x1a   :  { %v69_v32 = vld [vmem:[#allocation2 + $0x120] sm:$0xff]  ;;  %v70_v33 = vld [vmem:[#allocation2 + $0x128] sm:$0xff]  ;;  %v640_v34 = vpack.c.bf16 %v38_v31, %v37_v29  ;;  %v56_v36 = vld [vmem:[#allocation2 + $0xb8] sm:$0xff] }
  0x1b   :  { %637 = vmatpush3.bf16.msra.mxu0 %v636_v21  ;;  %v87_v37 = vld [vmem:[#allocation2 + $0x1b0] sm:$0xff]  ;;  %v672_v38 = vpack.c.bf16 %v70_v33, %v69_v32  ;;  %v642_v39 = vpack.c.bf16 %v56_v36, %v55_v35  ;;  %v88_v40 = vld [vmem:[#allocation2 + $0x1b8] sm:$0xff]  ;;  %v57_v46 = vld [vmem:[#allocation2 + $0xc0] sm:$0xff] }
  0x1c   :  { %669 = vmatpush3.bf16.msra.mxu1 %v668_v25  ;;  %639 = vmatprep.subr.bf16.mxu0 %v638_v26  ;;  %v39_v41 = vld [vmem:[#allocation2 + $0x30] sm:$0xff]  ;;  %v40_v42 = vld [vmem:[#allocation2 + $0x38] sm:$0xff]  ;;  %v674_v43 = vpack.c.bf16 %v88_v40, %v87_v37  ;;  %v58_v50 = vld [vmem:[#allocation2 + $0xc8] sm:$0xff] }
  0x1d   :  { %671 = vmatprep.subr.bf16.mxu1 %v670_v30  ;;  %v71_v44 = vld [vmem:[#allocation2 + $0x130] sm:$0xff]  ;;  %v72_v45 = vld [vmem:[#allocation2 + $0x138] sm:$0xff]  ;;  %v89_v51 = vld [vmem:[#allocation2 + $0x1c0] sm:$0xff]  ;;  %v644_v53 = vpack.c.bf16 %v40_v42, %v39_v41  ;;  %v646_v55 = vpack.c.bf16 %v58_v50, %v57_v46 }
  0x1e   :  { %v90_v52 = vld [vmem:[#allocation2 + $0x1c8] sm:$0xff]  ;;  %v676_v54 = vpack.c.bf16 %v72_v45, %v71_v44  ;;  %v41_v56 = vld [vmem:[#allocation2 + $0x40] sm:$0xff]  ;;  %v59_v61 = vld [vmem:[#allocation2 + $0xd0] sm:$0xff] }
  0x1f   :  { %641 = vmatpush3.bf16.msra.mxu0 %v640_v34  ;;  %v42_v57 = vld [vmem:[#allocation2 + $0x48] sm:$0xff]  ;;  %v73_v58 = vld [vmem:[#allocation2 + $0x140] sm:$0xff]  ;;  %v678_v59 = vpack.c.bf16 %v90_v52, %v89_v51  ;;  %v60_v62 = vld [vmem:[#allocation2 + $0xd8] sm:$0xff] }
  0x20   :  { %673 = vmatpush3.bf16.msra.mxu1 %v672_v38  ;;  %643 = vmatprep.subr.bf16.mxu0 %v642_v39  ;;  %v74_v60 = vld [vmem:[#allocation2 + $0x148] sm:$0xff]  ;;  %v91_v1 = vld [vmem:[#allocation2 + $0x1d0] sm:$0xff]  ;;  %v92_v2 = vld [vmem:[#allocation2 + $0x1d8] sm:$0xff]  ;;  %v648_v3 = vpack.c.bf16 %v42_v57, %v41_v56  ;;  %v650_v5 = vpack.c.bf16 %v60_v62, %v59_v61 }
  0x21   :  { %675 = vmatprep.subr.bf16.mxu1 %v674_v43  ;;  %v680_v4 = vpack.c.bf16 %v74_v60, %v73_v58  ;;  %v43_v6 = vld [vmem:[#allocation2 + $0x50] sm:$0xff]  ;;  %v44_v7 = vld [vmem:[#allocation2 + $0x58] sm:$0xff]  ;;  %v682_v9 = vpack.c.bf16 %v92_v2, %v91_v1  ;;  %v61_v11 = vld [vmem:[#allocation2 + $0xe0] sm:$0xff] }
  0x22   :  { %v75_v8 = vld [vmem:[#allocation2 + $0x150] sm:$0xff]  ;;  %v76_v10 = vld [vmem:[#allocation2 + $0x158] sm:$0xff]  ;;  %v62_v12 = vld [vmem:[#allocation2 + $0xe8] sm:$0xff]  ;;  %v652_v16 = vpack.c.bf16 %v44_v7, %v43_v6 }
  0x23   :  { %645 = vmatpush3.bf16.msra.mxu0 %v644_v53  ;;  %v93_v14 = vld [vmem:[#allocation2 + $0x1e0] sm:$0xff]  ;;  %v94_v15 = vld [vmem:[#allocation2 + $0x1e8] sm:$0xff]  ;;  %v684_v18 = vpack.c.bf16 %v76_v10, %v75_v8  ;;  %v654_v19 = vpack.c.bf16 %v62_v12, %v61_v11  ;;  %v63_v25 = vld [vmem:[#allocation2 + $0xf0] sm:$0xff] }
  0x24   :  { %677 = vmatpush3.bf16.msra.mxu1 %v676_v54  ;;  %647 = vmatprep.subr.bf16.mxu0 %v646_v55  ;;  %v45_v17 = vld [vmem:[#allocation2 + $0x60] sm:$0xff]  ;;  %v46_v20 = vld [vmem:[#allocation2 + $0x68] sm:$0xff]  ;;  %v686_v23 = vpack.c.bf16 %v94_v15, %v93_v14  ;;  %v64_v26 = vld [vmem:[#allocation2 + $0xf8] sm:$0xff] }
  0x25   :  { %679 = vmatprep.subr.bf16.mxu1 %v678_v59  ;;  %v77_v21 = vld [vmem:[#allocation2 + $0x160] sm:$0xff]  ;;  %v78_v24 = vld [vmem:[#allocation2 + $0x168] sm:$0xff]  ;;  %v95_v29 = vld [vmem:[#allocation2 + $0x1f0] sm:$0xff]  ;;  %v656_v31 = vpack.c.bf16 %v46_v20, %v45_v17  ;;  %v658_v35 = vpack.c.bf16 %v64_v26, %v63_v25 }
  0x26   :  { %v31_v22 = vld [vmem:[%s886_s0] sm:$0xff]  ;;  %v96_v30 = vld [vmem:[#allocation2 + $0x1f8] sm:$0xff]  ;;  %v688_v34 = vpack.c.bf16 %v78_v24, %v77_v21  ;;  %v47_v36 = vld [vmem:[#allocation2 + $0x70] sm:$0xff] }
  0x27   :  { %649 = vmatpush3.bf16.msra.mxu0 %v648_v3  ;;  %v138_v27 = vrot.slane %v31_v22, %v137_v13  ;;  %v131_v28 = vcombine.high %v31_v22, %v31_v22  ;;  %v48_v37 = vld [vmem:[#allocation2 + $0x78] sm:$0xff]  ;;  %v79_v38 = vld [vmem:[#allocation2 + $0x170] sm:$0xff]  ;;  %v690_v39 = vpack.c.bf16 %v96_v30, %v95_v29  ;;  %v113_v42 = vld [vmem:[#allocation2 + $0x280] sm:$0xff] }
  0x28   :  { %681 = vmatpush3.bf16.msra.mxu1 %v680_v4  ;;  %651 = vmatprep.subr.bf16.mxu0 %v650_v5  ;;  %v80_v40 = vld [vmem:[#allocation2 + $0x178] sm:$0xff]  ;;  %v114_v43 = vld [vmem:[#allocation2 + $0x288] sm:$0xff]  ;;  %v660_v44 = vpack.c.bf16 %v48_v37, %v47_v36  ;;  %v97_v47 = vld [vmem:[#allocation2 + $0x200] sm:$0xff] }
  0x29   :  { %683 = vmatprep.subr.bf16.mxu1 %v682_v9  ;;  %v146_v32 = vcombine.high %v138_v27, %v138_v27  ;;  %v145_v33 = vrot.slane %v131_v28, %v137_v13  ;;  %v692_v45 = vpack.c.bf16 %v80_v40, %v79_v38  ;;  %v694_v46 = vpack.c.bf16 %v114_v43, %v113_v42  ;;  %v98_v48 = vld [vmem:[#allocation2 + $0x208] sm:$0xff]  ;;  %v115_v49 = vld [vmem:[#allocation2 + $0x290] sm:$0xff]  ;;  %v116_v50 = vld [vmem:[#allocation2 + $0x298] sm:$0xff] }
  0x2a   :  { %v696_v51 = vpack.c.bf16 %v98_v48, %v97_v47  ;;  %v471_v52 = vld.sshfl [vmem:[%s886_s0 + $0x8] sm:$0x33 pattern:$0x76325410]  ;;  %v698_v53 = vpack.c.bf16 %v116_v50, %v115_v49  ;;  %v99_v54 = vld [vmem:[#allocation2 + $0x210] sm:$0xff]  ;;  %v100_v55 = vld [vmem:[#allocation2 + $0x218] sm:$0xff] }
  0x2b   :  { %653 = vmatpush3.bf16.msra.mxu0 %v652_v16  ;;  %226 = vmatprep.mubr.f32.mxu0 %v146_v32  ;;  %v147_v41 = vcombine.high %v145_v33, %v145_v33  ;;  %v155_v56 = vcombine.high %v471_v52, %v471_v52  ;;  %v117_v57 = vld [vmem:[#allocation2 + $0x2a0] sm:$0xff]  ;;  %v118_v58 = vld [vmem:[#allocation2 + $0x2a8] sm:$0xff]  ;;  %v700_v59 = vpack.c.bf16 %v100_v55, %v99_v54  ;;  %v119_v63 = vld [vmem:[#allocation2 + $0x2b0] sm:$0xff]  ;;  %v788_v55 = vmov 0.0  }
  0x2c   :  { %685 = vmatpush3.bf16.msra.mxu1 %v684_v18  ;;  %655 = vmatprep.subr.bf16.mxu0 %v654_v19  ;;  %v702_v60 = vpack.c.bf16 %v118_v58, %v117_v57  ;;  %v101_v61 = vld [vmem:[#allocation2 + $0x220] sm:$0xff]  ;;  %v102_v62 = vld [vmem:[#allocation2 + $0x228] sm:$0xff]  ;;  %v120_v0 = vld [vmem:[#allocation2 + $0x2b8] sm:$0xff] }
  0x2d   :  { %687 = vmatprep.subr.bf16.mxu1 %v686_v23  ;;  %296 = vmatprep.mubr.f32.mxu1 %v147_v41  ;;  %v704_v1 = vpack.c.bf16 %v102_v62, %v101_v61  ;;  %v706_v2 = vpack.c.bf16 %v120_v0, %v119_v63  ;;  %v103_v3 = vld [vmem:[#allocation2 + $0x230] sm:$0xff]  ;;  %v104_v4 = vld [vmem:[#allocation2 + $0x238] sm:$0xff]  ;;  %v121_v5 = vld [vmem:[#allocation2 + $0x2c0] sm:$0xff] }
  0x2e   :  { %v122_v6 = vld [vmem:[#allocation2 + $0x2c8] sm:$0xff]  ;;  %v708_v7 = vpack.c.bf16 %v104_v4, %v103_v3  ;;  %v105_v9 = vld [vmem:[#allocation2 + $0x240] sm:$0xff]  ;;  %v123_v11 = vld [vmem:[#allocation2 + $0x2d0] sm:$0xff] }
  0x2f   :  { %657 = vmatpush3.bf16.msra.mxu0 %v656_v31  ;;  %v710_v8 = vpack.c.bf16 %v122_v6, %v121_v5  ;;  %v106_v10 = vld [vmem:[#allocation2 + $0x248] sm:$0xff]  ;;  %v124_v12 = vld [vmem:[#allocation2 + $0x2d8] sm:$0xff]  ;;  %v107_v15 = vld [vmem:[#allocation2 + $0x250] sm:$0xff] }
  0x30   :  { %689 = vmatpush3.bf16.msra.mxu1 %v688_v34  ;;  %659 = vmatprep.subr.bf16.mxu0 %v658_v35  ;;  %v712_v13 = vpack.c.bf16 %v106_v10, %v105_v9  ;;  %v714_v14 = vpack.c.bf16 %v124_v12, %v123_v11  ;;  %v108_v16 = vld [vmem:[#allocation2 + $0x258] sm:$0xff]  ;;  %v125_v17 = vld [vmem:[#allocation2 + $0x2e0] sm:$0xff]  ;;  %v126_v18 = vld [vmem:[#allocation2 + $0x2e8] sm:$0xff] }
  0x31   :  { %691 = vmatprep.subr.bf16.mxu1 %v690_v39  ;;  %v716_v19 = vpack.c.bf16 %v108_v16, %v107_v15  ;;  %v718_v20 = vpack.c.bf16 %v126_v18, %v125_v17  ;;  %v109_v21 = vld [vmem:[#allocation2 + $0x260] sm:$0xff]  ;;  %v110_v22 = vld [vmem:[#allocation2 + $0x268] sm:$0xff]  ;;  %v127_v23 = vld [vmem:[#allocation2 + $0x2f0] sm:$0xff] }
  0x32   :  { %v128_v24 = vld [vmem:[#allocation2 + $0x2f8] sm:$0xff]  ;;  %v720_v25 = vpack.c.bf16 %v110_v22, %v109_v21  ;;  %v372_v30 = vld [vmem:[%s888_s2] sm:$0xff]  ;;  %v373_v31 = vld [vmem:[%s888_s2 + $0x8] sm:$0xff] }
  0x33   :  { %661 = vmatpush3.bf16.msra.mxu0 %v660_v44  ;;  %v722_v26 = vpack.c.bf16 %v128_v24, %v127_v23  ;;  %v112_v28 = vld [vmem:[#allocation2 + $0x278] sm:$0xff]  ;;  %v374_v32 = vld [vmem:[%s888_s2 + $0x10] sm:$0xff]  ;;  %v727_v34 = vpack.c.bf16 %v373_v31, %v372_v30  ;;  %v376_v37 = vld [vmem:[%s888_s2 + $0x20] sm:$0xff] }
  0x34   :  { %693 = vmatpush3.bf16.msra.mxu1 %v692_v45  ;;  %695 = vmatprep.subr.bf16.mxu0 %v694_v46  ;;  %v375_v35 = vld [vmem:[%s888_s2 + $0x18] sm:$0xff]  ;;  %v377_v38 = vld [vmem:[%s888_s2 + $0x28] sm:$0xff]  ;;  %v378_v40 = vld [vmem:[%s888_s2 + $0x30] sm:$0xff] }
  0x35   :  { %v730_v36 = vpack.c.bf16 %v375_v35, %v374_v32  ;;  %v733_v39 = vpack.c.bf16 %v377_v38, %v376_v37  ;;  %v379_v41 = vld [vmem:[%s888_s2 + $0x38] sm:$0xff]  ;;  %v380_v43 = vld [vmem:[%s888_s2 + $0x40] sm:$0xff]  ;;  %v381_v44 = vld [vmem:[%s888_s2 + $0x48] sm:$0xff] }
  0x36   :  { %227 = vmatmul.mubr.f32.vlgmr.msra.gmra.mrb[0].mxu0 %v138_v27  ;;  %v111_v27 = vld [vmem:[#allocation2 + $0x270] sm:$0xff]  ;;  %v736_v42 = vpack.c.bf16 %v379_v41, %v378_v40  ;;  %v739_v45 = vpack.c.bf16 %v381_v44, %v380_v43  ;;  %v383_v47 = vld [vmem:[%s888_s2 + $0x58] sm:$0xff]  ;;  %v384_v49 = vld [vmem:[%s888_s2 + $0x60] sm:$0xff] }
  0x37   :  { %297 = vmatmul.mubr.f32.vlgmr.msra.gmra.mrb[0].mxu1 %v145_v33  ;;  %697 = vmatpush3.bf16.msra.mxu0 %v696_v51  ;;  %v724_v29 = vpack.c.bf16 %v112_v28, %v111_v27  ;;  %v786_v33 = vmov 0.0|0.0   ;;  %v382_v46 = vld [vmem:[%s888_s2 + $0x50] sm:$0xff]  ;;  %v385_v50 = vld [vmem:[%s888_s2 + $0x68] sm:$0xff]  ;;  %v472_v3 = vld [vmem:[%s889_s3] ss:$0 sm:$0xff] }
  0x38   :  { %699 = vmatprep.subr.bf16.mxu0 %v698_v53  ;;  %366 = vmatprep.mubr.f32.mxu0 %v155_v56  ;;  %v742_v48 = vpack.c.bf16 %v383_v47, %v382_v46  ;;  %v745_v51 = vpack.c.bf16 %v385_v50, %v384_v49  ;;  %v387_v53 = vld [vmem:[%s888_s2 + $0x78] sm:$0xff] }
  0x39   :  { %726 = vmatprep.subr.bf16.mxu1 %v786_v33  ;;  %627 = vmatprep.mubr.msk.f32.mxu1 %vm787_vm0, %v788_v55 }
  0x3a   :  { %728 = vmatpush3.bf16.msra.mxu1 %v727_v34 }
  0x3b   :  { %701 = vmatpush3.bf16.msra.mxu0 %v700_v59  ;;  %729 = vmatprep.subr.bf16.mxu1 %v786_v33 }
  0x3c   :  { %703 = vmatprep.subr.bf16.mxu0 %v702_v60 }
  0x3e   :  { %731 = vmatpush3.bf16.msra.mxu1 %v730_v36 }
  0x3f   :  { %705 = vmatpush3.bf16.msra.mxu0 %v704_v1  ;;  %732 = vmatprep.subr.bf16.mxu1 %v786_v33 }
  0x40   :  { %707 = vmatprep.subr.bf16.mxu0 %v706_v2 }
  0x42   :  { %734 = vmatpush3.bf16.msra.mxu1 %v733_v39 }
  0x43   :  { %709 = vmatpush3.bf16.msra.mxu0 %v708_v7  ;;  %735 = vmatprep.subr.bf16.mxu1 %v786_v33 }
  0x44   :  { %711 = vmatprep.subr.bf16.mxu0 %v710_v8 }
  0x46   :  { %737 = vmatpush3.bf16.msra.mxu1 %v736_v42 }
  0x47   :  { %713 = vmatpush3.bf16.msra.mxu0 %v712_v13  ;;  %738 = vmatprep.subr.bf16.mxu1 %v786_v33 }
  0x48   :  { %715 = vmatprep.subr.bf16.mxu0 %v714_v14 }
  0x4a   :  { %740 = vmatpush3.bf16.msra.mxu1 %v739_v45 }
  0x4b   :  { %717 = vmatpush3.bf16.msra.mxu0 %v716_v19  ;;  %741 = vmatprep.subr.bf16.mxu1 %v786_v33 }
  0x4c   :  { %719 = vmatprep.subr.bf16.mxu0 %v718_v20 }
  0x4e   :  { %743 = vmatpush3.bf16.msra.mxu1 %v742_v48 }
  0x4f   :  { %721 = vmatpush3.bf16.msra.mxu0 %v720_v25  ;;  %744 = vmatprep.subr.bf16.mxu1 %v786_v33 }
  0x50   :  { %723 = vmatprep.subr.bf16.mxu0 %v722_v26 }
  0x52   :  { %746 = vmatpush3.bf16.msra.mxu1 %v745_v51 }
  0x53   :  { %725 = vmatpush3.bf16.msra.mxu0 %v724_v29  ;;  %747 = vmatprep.subr.bf16.mxu1 %v786_v33 }
  0x56   :  { %367 = vmatmul.mubr.f32.vlgmr.msra.gmra.mrb[2].mxu0 %v471_v52  ;;  %v386_v52 = vld [vmem:[%s888_s2 + $0x70] sm:$0xff] }
  0x57   :  { %v748_v54 = vpack.c.bf16 %v387_v53, %v386_v52 }
  0x59   :  { %749 = vmatpush3.bf16.msra.mxu1 %v748_v54 }
 0x109   :  { %v505_v56 = vpop.f32.mrb[0].mxu0 }
 0x10a   :  { %v540_v57 = vpop.f32.mrb[0].mxu1  ;;  %v506_v58 = vpop.f32.mrb[1].mxu0 }
 0x10b   :  { %v507_v59 = vadd.f32 %v506_v58, %v505_v56  ;;  %v541_v60 = vpop.f32.mrb[1].mxu1 }
 0x10c   :  { %v542_v61 = vadd.f32 %v541_v60, %v540_v57 }
 0x10e   :  { %v299_v62 = vadd.f32 %v542_v61, %v507_v59 }
 0x129   :  { %v575_v63 = vpop.f32.mrb[2].mxu0 }
 0x12a   :  { %v576_v0 = vpop.f32.mrb[3].mxu0 }
 0x12b   :  { %v577_v1 = vadd.f32 %v576_v0, %v575_v63 }
 0x12d   :  { %v369_v2 = vadd.f32 %v577_v1, %v299_v62 }
 0x12f   :  { %628 = vmatmul.mubr.f32.vlgmr.msra.gmra.mrb[2].mxu1 %v369_v2 }
 0x202   :  { %v461_v4 = vpop.f32.mrb[2].mxu1 }
 0x203   :  { %v462_v5 = vadd.f32 %v472_v3, %v461_v4  ;;  %v629_v6 = vpop.f32.mrb[3].mxu1 }
 0x205   :  { %465 = vst [vmem:[%s890_s4] sm:$0x3] %v462_v5 }
 0x206   :  { %470 = vsyncpa [#allocation3], 1 }

// kernel: forward.7
= control target key start
LH: loop header
LB: loop body
LE: loop exit
PB: predicated region body
PF: predicated region fallthrough
CT: control target
= control target key end

     0   :  { %s1081_s0 = inlined_call_operand.vmem [shape: f32[32,128], index: 0, kind: input, shape index: {}]   ;;  %s1082_s1 = inlined_call_operand.vmem [shape: f32[1,128], index: 1, kind: input, shape index: {}]   ;;  %s1083_s2 = inlined_call_operand.vmem [shape: f32[128,256], index: 2, kind: input, shape index: {}]   ;;  %s1084_s3 = inlined_call_operand.vmem [shape: s32[32,1], index: 3, kind: input, shape index: {}]   ;;  %s1085_s4 = inlined_call_operand.vmem [shape: s32[32,1], index: 4, kind: input, shape index: {}]   ;;  %s1086_s5 = inlined_call_operand.vmem [shape: f32[1,4], index: 5, kind: output, shape index: {}]  }
   0x1   :  { %v693_v0 = vld [vmem:[%s1081_s0] sm:$0xff]  ;;  %v698_v1 = vld [vmem:[%s1081_s0 + $0x10] sm:$0xff]  ;;  %v703_v2 = vld [vmem:[%s1081_s0 + $0x8] sm:$0xff] }
   0x2   :  { %v26_v3 = vmul.f32 %v693_v0, %v693_v0  ;;  %v28_v4 = vmul.f32 %v698_v1, %v698_v1  ;;  %v712_v5 = vld [vmem:[%s1081_s0 + $0x18] sm:$0xff]  ;;  %v66_v6 = vld [vmem:[%s1083_s2 + $0x8] sm:$0xff]  ;;  %v65_v9 = vld [vmem:[%s1083_s2] sm:$0xff]  ;;  %v27_v12 = vmul.f32 %v703_v2, %v703_v2 }
   0x3   :  { %v68_v7 = vld [vmem:[%s1083_s2 + $0x18] sm:$0xff]  ;;  %v67_v10 = vld [vmem:[%s1083_s2 + $0x10] sm:$0xff]  ;;  %v70_v11 = vld [vmem:[%s1083_s2 + $0x28] sm:$0xff]  ;;  %v29_v13 = vmul.f32 %v712_v5, %v712_v5 }
   0x4   :  { %v550_v8 = vpack.c.bf16 %v68_v7, %v66_v6  ;;  %30 = vadd.xlane.f32.xlu0 %v26_v3  ;;  %34 = vadd.xlane.f32.xlu1 %v28_v4  ;;  %v552_v14 = vpack.c.bf16 %v67_v10, %v65_v9  ;;  %v72_v15 = vld [vmem:[%s1083_s2 + $0x38] sm:$0xff]  ;;  %v69_v16 = vld [vmem:[%s1083_s2 + $0x20] sm:$0xff]  ;;  %v71_v17 = vld [vmem:[%s1083_s2 + $0x30] sm:$0xff] }
   0x5   :  { %v554_v18 = vpack.c.bf16 %v72_v15, %v70_v11  ;;  %v74_v19 = vld [vmem:[%s1083_s2 + $0x48] sm:$0xff]  ;;  %v76_v20 = vld [vmem:[%s1083_s2 + $0x58] sm:$0xff]  ;;  %v556_v21 = vpack.c.bf16 %v71_v17, %v69_v16  ;;  %v73_v23 = vld [vmem:[%s1083_s2 + $0x40] sm:$0xff] }
   0x6   :  { %551 = vmatprep.subr.bf16.mxu0 %v550_v8  ;;  %582 = vmatprep.subr.bf16.mxu1 %v550_v8  ;;  %v558_v22 = vpack.c.bf16 %v76_v20, %v74_v19  ;;  %v75_v24 = vld [vmem:[%s1083_s2 + $0x50] sm:$0xff] }
   0x7   :  { %553 = vmatpush1.bf16.msra.mxu0 %v552_v14  ;;  %590 = vmatpush1.bf16.msra.mxu1 %v552_v14 }
   0x8   :  { %555 = vmatprep.subr.bf16.mxu0 %v554_v18  ;;  %583 = vmatprep.subr.bf16.mxu1 %v554_v18 }
   0x9   :  { %10 = vsyncpa [#allocation3], 0  ;;  %32 = vadd.xlane.f32.xlu0 %v27_v12  ;;  %36 = vadd.xlane.f32.xlu1 %v29_v13  ;;  %v78_v25 = vld [vmem:[%s1083_s2 + $0x68] sm:$0xff]  ;;  %v80_v26 = vld [vmem:[%s1083_s2 + $0x78] sm:$0xff]  ;;  %v560_v27 = vpack.c.bf16 %v75_v24, %v73_v23  ;;  %v657_v54 = vmov 0.0   ;;  %s520_s29 = sshll.u32 %s1086_s5, 4  ;;  %s521_s29 = int_to_ptr.vmem [resolvable:$true] %s520_s29 }
   0xa   :  { %v562_v28 = vpack.c.bf16 %v80_v26, %v78_v25  ;;  %v77_v29 = vld [vmem:[%s1083_s2 + $0x60] sm:$0xff]  ;;  %v79_v30 = vld [vmem:[%s1083_s2 + $0x70] sm:$0xff]  ;;  %v82_v32 = vld [vmem:[%s1083_s2 + $0x88] sm:$0xff]  ;;  %161 = vmatprep.mubr.f32.mxu0 %v657_v54  ;;  %173 = vmatprep.mubr.f32.mxu1 %v657_v54  ;;  %s643_s8 = scalar_lea.vmem %s521_s29, 16  ;;  %p648_p1 = scmp.lt.s32.totalorder %s521_s29, %s521_s29 }
   0xb   :  { %557 = vmatpush1.bf16.msra.mxu0 %v556_v21  ;;  %591 = vmatpush1.bf16.msra.mxu1 %v556_v21  ;;  %v564_v31 = vpack.c.bf16 %v79_v30, %v77_v29  ;;  %v84_v33 = vld [vmem:[%s1083_s2 + $0x98] sm:$0xff]  ;;  %v81_v35 = vld [vmem:[%s1083_s2 + $0x80] sm:$0xff]  ;;  %v83_v36 = vld [vmem:[%s1083_s2 + $0x90] sm:$0xff]  ;;  %p644_p0 = scmp.ne.s32.totalorder %s521_s29, %s643_s8  ;;  %p649_p2 = scmp.lt.s32.totalorder %s643_s8, %s643_s8 }
   0xc   :  { %559 = vmatprep.subr.bf16.mxu0 %v558_v22  ;;  %584 = vmatprep.subr.bf16.mxu1 %v558_v22  ;;  %v566_v34 = vpack.c.bf16 %v84_v33, %v82_v32  ;;  %v568_v37 = vpack.c.bf16 %v83_v36, %v81_v35  ;;  %v86_v38 = vld [vmem:[%s1083_s2 + $0xa8] sm:$0xff]  ;;  %v88_v39 = vld [vmem:[%s1083_s2 + $0xb8] sm:$0xff]  ;;  %v85_v41 = vld [vmem:[%s1083_s2 + $0xa0] sm:$0xff]  ;;  %v246_v33 = vlaneseq }
   0xd   :  { %v570_v40 = vpack.c.bf16 %v88_v39, %v86_v38  ;;  %v87_v42 = vld [vmem:[%s1083_s2 + $0xb0] sm:$0xff]  ;;  %v90_v44 = vld [vmem:[%s1083_s2 + $0xc8] sm:$0xff]  ;;  %v92_v45 = vld [vmem:[%s1083_s2 + $0xd8] sm:$0xff]  ;;  %p650_p3 = por %p649_p2, %p648_p1 }
   0xe   :  { %v572_v43 = vpack.c.bf16 %v87_v42, %v85_v41  ;;  %v574_v46 = vpack.c.bf16 %v92_v45, %v90_v44  ;;  %v89_v47 = vld [vmem:[%s1083_s2 + $0xc0] sm:$0xff]  ;;  %v91_v48 = vld [vmem:[%s1083_s2 + $0xd0] sm:$0xff]  ;;  %v94_v49 = vld [vmem:[%s1083_s2 + $0xe8] sm:$0xff] }
   0xf   :  { %561 = vmatpush1.bf16.msra.mxu0 %v560_v27  ;;  %592 = vmatpush1.bf16.msra.mxu1 %v560_v27  ;;  %v576_v50 = vpack.c.bf16 %v91_v48, %v89_v47  ;;  %v96_v51 = vld [vmem:[%s1083_s2 + $0xf8] sm:$0xff]  ;;  %v93_v52 = vld [vmem:[%s1083_s2 + $0xe0] sm:$0xff]  ;;  %v95_v53 = vld [vmem:[%s1083_s2 + $0xf0] sm:$0xff]  ;;  %p651_p4 = pnand %p650_p3, %p644_p0 }
  0x10   :  { %563 = vmatprep.subr.bf16.mxu0 %v562_v28  ;;  %585 = vmatprep.subr.bf16.mxu1 %v562_v28  ;;  %v578_v55 = vpack.c.bf16 %v96_v51, %v94_v49  ;;  %v580_v56 = vpack.c.bf16 %v95_v53, %v93_v52  ;;  %v529_v10 = vld [vmem:[%s1082_s1] ss:$0 sm:$0xff]  ;;  %v858_v32 = vld [vmem:[%s1084_s3 + $0x10] sm:$0xff] }
  0x13   :  { %565 = vmatpush1.bf16.msra.mxu0 %v564_v31  ;;  %593 = vmatpush1.bf16.msra.mxu1 %v564_v31  ;;  %v852_v31 = vld [vmem:[%s1084_s3 + $0x8] sm:$0xff] }
  0x14   :  { %567 = vmatprep.subr.bf16.mxu0 %v566_v34  ;;  %586 = vmatprep.subr.bf16.mxu1 %v566_v34  ;;  %v861_v34 = vand.u32 127, %v246_v33 }
  0x16   :  { %v864_v35 = vadd.s32 128, %v861_v34 }
  0x17   :  { %569 = vmatpush1.bf16.msra.mxu0 %v568_v37  ;;  %594 = vmatpush1.bf16.msra.mxu1 %v568_v37 }
  0x18   :  { %571 = vmatprep.subr.bf16.mxu0 %v570_v40  ;;  %587 = vmatprep.subr.bf16.mxu1 %v570_v40 }
  0x1b   :  { %573 = vmatpush1.bf16.msra.mxu0 %v572_v43  ;;  %595 = vmatpush1.bf16.msra.mxu1 %v572_v43 }
  0x1c   :  { %575 = vmatprep.subr.bf16.mxu0 %v574_v46  ;;  %588 = vmatprep.subr.bf16.mxu1 %v574_v46 }
  0x1f   :  { %577 = vmatpush1.bf16.msra.mxu0 %v576_v50  ;;  %596 = vmatpush1.bf16.msra.mxu1 %v576_v50 }
  0x20   :  { %579 = vmatprep.subr.bf16.mxu0 %v578_v55  ;;  %589 = vmatprep.subr.bf16.mxu1 %v578_v55 }
  0x23   :  { %581 = vmatpush1.bf16.msra.mxu0 %v580_v56  ;;  %597 = vmatpush1.bf16.msra.mxu1 %v580_v56 }
  0x91   :  { %v31_v57 = vpop.xlane.xlu0 %30  ;;  %v35_v58 = vpop.xlane.xlu1 %34 }
  0x92   :  { %v39_v59 = vmul.f32 0.0078125, %v31_v57  ;;  %v41_v60 = vmul.f32 0.0078125, %v35_v58 }
  0x94   :  { %v43_v61 = vadd.f32 1e-06, %v39_v59  ;;  %v45_v62 = vadd.f32 1e-06, %v41_v60 }
  0x96   :  { %v33_v63 = vpop.xlane.xlu0 %32  ;;  %v37_v3 = vpop.xlane.xlu1 %36  ;;  %611 = vrsqrt.f32 %v43_v61 }
  0x97   :  { %v40_v4 = vmul.f32 0.0078125, %v33_v63  ;;  %v42_v6 = vmul.f32 0.0078125, %v37_v3  ;;  %613 = vrsqrt.f32 %v45_v62 }
  0x99   :  { %v44_v7 = vadd.f32 1e-06, %v40_v4  ;;  %v46_v8 = vadd.f32 1e-06, %v42_v6 }
  0x9b   :  { %615 = vrsqrt.f32 %v44_v7 }
  0x9c   :  { %617 = vrsqrt.f32 %v46_v8 }
  0xa0   :  { %v612_v9 = vpop.eup %611 }
  0xa1   :  { %v614_v11 = vpop.eup %613  ;;  %v51_v12 = vmul.f32 %v612_v9, %v693_v0  ;;  %v658_v0 = vmov 0  }
  0xa2   :  { %v53_v13 = vmul.f32 %v614_v11, %v698_v1  ;;  %610 = vset.pattern.permute.xlu1 %v658_v0  ;;  %609 = vset.pattern.permute.xlu0 %v658_v0 }
  0xa3   :  { %v61_v14 = vmul.f32 %v529_v10, %v51_v12 }
  0xa4   :  { %v63_v16 = vmul.f32 %v529_v10, %v53_v13 }
  0xa5   :  { %v616_v15 = vpop.eup %615  ;;  %162 = vmatmul.mubr.f32.vlgmr.msra.gmra.mrb[0].mxu0 %v61_v14 }
  0xa6   :  { %v618_v17 = vpop.eup %617  ;;  %v52_v18 = vmul.f32 %v616_v15, %v703_v2  ;;  %167 = vmatprep.mubr.f32.mxu0 %v657_v54  ;;  %174 = vmatmul.mubr.f32.vlgmr.msra.gmra.mrb[0].mxu1 %v63_v16 }
  0xa7   :  { %v54_v19 = vmul.f32 %v618_v17, %v712_v5  ;;  %179 = vmatprep.mubr.f32.mxu1 %v657_v54 }
  0xa8   :  { %v62_v20 = vmul.f32 %v529_v10, %v52_v18 }
  0xa9   :  { %v64_v21 = vmul.f32 %v529_v10, %v54_v19 }
  0xaa   :  { %168 = vmatmul.mubr.f32.gmra.mrb[2].mxu0 %v62_v20 }
  0xab   :  { %180 = vmatmul.mubr.f32.gmra.mrb[2].mxu1 %v64_v21 }
 0x178   :  { %v825_v1 = vpop.f32.mrb[0].mxu0 }
 0x179   :  { %v827_v22 = vpop.f32.mrb[1].mxu0  ;;  %v829_v23 = vpop.f32.mrb[0].mxu1 }
 0x17a   :  { %v831_v2 = vpop.f32.mrb[1].mxu1  ;;  %v186_v5 = vmax.f32 %v825_v1, %v827_v22 }
 0x17b   :  { %v192_v24 = vmax.f32 %v829_v23, %v831_v2 }
 0x17c   :  { %187 = vmax.xlane.f32.xlu0 %v186_v5 }
 0x17d   :  { %v837_v25 = vpop.f32.mrb[2].mxu0 }
 0x17e   :  { %v839_v26 = vpop.f32.mrb[3].mxu0  ;;  %v841_v27 = vpop.f32.mrb[2].mxu1 }
 0x17f   :  { %v189_v28 = vmax.f32 %v837_v25, %v839_v26  ;;  %v845_v29 = vpop.f32.mrb[3].mxu1 }
 0x180   :  { %v195_v30 = vmax.f32 %v841_v27, %v845_v29  ;;  %193 = vmax.xlane.f32.xlu0 %v192_v24 }
 0x181   :  { %190 = vmax.xlane.f32.xlu1 %v189_v28 }
 0x185   :  { %196 = vmax.xlane.f32.xlu1 %v195_v30 }
 0x196   :  { %257 = vperm.xlu1 %610, %v852_v31  }
 0x19a   :  { %260 = vperm.xlu1 %610, %v858_v32  }
 0x209   :  { %v866_v36 = vpop.xlane.xlu0 %187 }
 0x20a   :  { %v198_v37 = vsub.f32 %v825_v1, %v866_v36  ;;  %v199_v38 = vsub.f32 %v827_v22, %v866_v36  ;;  %vm362_vm0 = vcmp.eq.f32.partialorder %v825_v1, %v866_v36  ;;  %vm363_vm1 = vcmp.eq.f32.partialorder %v827_v22, %v866_v36 }
 0x20b   :  { %v370_v39 = vsel %vm362_vm0, %v861_v34, 1073741824  ;;  %v371_v40 = vsel %vm363_vm1, %v864_v35, 1073741824 }
 0x20c   :  { %v206_v41 = vmul.f32 1.442695, %v198_v37  ;;  %v208_v42 = vmul.f32 1.442695, %v199_v38  ;;  %vm378_vm2 = vcmp.lt.s32.totalorder %v370_v39, %v371_v40 }
 0x20d   :  { %v880_v44 = vpop.xlane.xlu0 %193  ;;  %v882_v45 = vsel %vm378_vm2, %v370_v39, %v371_v40 }
 0x20e   :  { %v878_v43 = vpop.xlane.xlu1 %190  ;;  %619 = vpow2.f32 %v206_v41  ;;  %v202_v48 = vsub.f32 %v829_v23, %v880_v44  ;;  %v203_v49 = vsub.f32 %v831_v2, %v880_v44  ;;  %v381_v50 = vshra.s32 %v882_v45, 16 }
 0x20f   :  { %v200_v46 = vsub.f32 %v837_v25, %v878_v43  ;;  %v201_v47 = vsub.f32 %v839_v26, %v878_v43  ;;  %621 = vpow2.f32 %v208_v42  ;;  %vm364_vm3 = vcmp.eq.f32.partialorder %v837_v25, %v878_v43 }
 0x210   :  { %v214_v53 = vmul.f32 1.442695, %v202_v48  ;;  %vm365_vm4 = vcmp.eq.f32.partialorder %v839_v26, %v878_v43  ;;  %v216_v55 = vmul.f32 1.442695, %v203_v49  ;;  %v899_v57 = vcvt.s32.f32 %v381_v50 }
 0x211   :  { %v210_v51 = vmul.f32 1.442695, %v200_v46  ;;  %v212_v52 = vmul.f32 1.442695, %v201_v47  ;;  %v372_v58 = vsel %vm364_vm3, %v861_v34, 1073741824  ;;  %v373_v59 = vsel %vm365_vm4, %v864_v35, 1073741824 }
 0x212   :  { %v897_v56 = vpop.xlane.xlu1 %196  ;;  %vm394_vm5 = vcmp.lt.s32.totalorder %v372_v58, %v373_v59  ;;  %384 = vmin.xlane.f32.xlu0 %v899_v57  ;;  %vm366_vm6 = vcmp.eq.f32.partialorder %v829_v23, %v880_v44  ;;  %vm367_vm7 = vcmp.eq.f32.partialorder %v831_v2, %v880_v44 }
 0x213   :  { %623 = vpow2.f32 %v210_v51  ;;  %v204_v60 = vsub.f32 %v841_v27, %v897_v56  ;;  %v205_v61 = vsub.f32 %v845_v29, %v897_v56  ;;  %v908_v62 = vsel %vm394_vm5, %v372_v58, %v373_v59  ;;  %v944_v51 = vld [vmem:[%s1084_s3 + $0x18] sm:$0xff] }
 0x214   :  { %625 = vpow2.f32 %v212_v52  ;;  %v397_v4 = vshra.s32 %v908_v62, 16  ;;  %v374_v7 = vsel %vm366_vm6, %v861_v34, 1073741824  ;;  %v375_v8 = vsel %vm367_vm7, %v864_v35, 1073741824 }
 0x215   :  { %627 = vpow2.f32 %v214_v53  ;;  %v218_v63 = vmul.f32 1.442695, %v204_v60  ;;  %v220_v3 = vmul.f32 1.442695, %v205_v61  ;;  %vm368_vm8 = vcmp.eq.f32.partialorder %v841_v27, %v897_v56 }
 0x216   :  { %629 = vpow2.f32 %v216_v55  ;;  %v258_v6 = vpop.permute.xlu1 %257  ;;  %v921_v9 = vcvt.s32.f32 %v397_v4  ;;  %vm410_vm11 = vcmp.lt.s32.totalorder %v374_v7, %v375_v8  ;;  %vm369_vm12 = vcmp.eq.f32.partialorder %v845_v29, %v897_v56 }
 0x217   :  { %631 = vpow2.f32 %v218_v63  ;;  %vm267_vm9 = vcmp.eq.s32.totalorder %v861_v34, %v258_v6  ;;  %vm268_vm10 = vcmp.eq.s32.totalorder %v864_v35, %v258_v6  ;;  %v411_v13 = vsel %vm410_vm11, %v374_v7, %v375_v8 }
 0x218   :  { %633 = vpow2.f32 %v220_v3  ;;  %v532_v10 = vsel %vm267_vm9, 1.0, %v657_v54  ;;  %v533_v11 = vsel %vm268_vm10, 1.0, %v657_v54  ;;  %v620_v12 = vpop.eup %619  ;;  %400 = vmin.xlane.f32.xlu1 %v921_v9  ;;  %v376_v14 = vsel %vm368_vm8, %v861_v34, 1073741824 }
 0x219   :  { %v291_v15 = vmul.f32 %v532_v10, %v837_v25  ;;  %v622_v16 = vpop.eup %621  ;;  %v413_v17 = vshra.s32 %v411_v13, 16  ;;  %v377_v19 = vsel %vm369_vm12, %v864_v35, 1073741824  ;;  %v292_v20 = vmul.f32 %v533_v11, %v839_v26 }
 0x21a   :  { %v261_v18 = vpop.permute.xlu1 %260  ;;  %vm426_vm15 = vcmp.lt.s32.totalorder %v376_v14, %v377_v19  ;;  %v222_v21 = vadd.f32 %v622_v16, %v620_v12  ;;  %v412_v52 = vand.u32 65535, %v411_v13  ;;  %vm310_vm8 = vcmp.ne.s32.totalorder %v852_v31, 4294967196 }
 0x21b   :  { %vm269_vm13 = vcmp.eq.s32.totalorder %v861_v34, %v261_v18  ;;  %vm270_vm14 = vcmp.eq.s32.totalorder %v864_v35, %v261_v18  ;;  %v415_v0 = vcvt.s32.f32 %v413_v17  ;;  %v936_v28 = vsel %vm426_vm15, %v376_v14, %v377_v19  ;;  %v1001_v17 = vld [vmem:[%s1085_s4] sm:$0xff]  ;;  %v1010_v19 = vld [vmem:[%s1085_s4 + $0x18] sm:$0xff] }
 0x21c   :  { %v534_v5 = vsel %vm269_vm13, 1.0, %v657_v54  ;;  %v535_v24 = vsel %vm270_vm14, 1.0, %v657_v54  ;;  %v429_v30 = vshra.s32 %v936_v28, 16  ;;  %v300_v33 = vadd.f32 %v292_v20, %v291_v15 }
 0x21d   :  { %v624_v25 = vpop.eup %623  ;;  %v293_v37 = vmul.f32 %v534_v5, %v829_v23  ;;  %416 = vmin.xlane.f32.xlu0 %v415_v0  ;;  %v294_v38 = vmul.f32 %v535_v24, %v831_v2  ;;  %v249_v23 = vld [vmem:[%s1084_s3] sm:$0xff]  ;;  %v414_v58 = vcvt.s32.f32 %v412_v52  ;;  %v380_v15 = vand.u32 65535, %v882_v45 }
 0x21e   :  { %v626_v26 = vpop.eup %625  ;;  %v431_v40 = vcvt.s32.f32 %v429_v30  ;;  %vm309_vm9 = vcmp.ne.s32.totalorder %v249_v23, 4294967196  ;;  %vm312_vm10 = vcmp.ne.s32.totalorder %v944_v51, 4294967196  ;;  %vm311_vm11 = vcmp.ne.s32.totalorder %v858_v32, 4294967196 }
 0x21f   :  { %v628_v39 = vpop.eup %627  ;;  %v225_v41 = vadd.f32 %v626_v26, %v624_v25  ;;  %v303_v46 = vadd.f32 %v294_v38, %v293_v37  ;;  %vm329_vm12 = vcmask 7168   ;;  %v996_v31 = vsel %vm309_vm9, 1.0, %v657_v54 }
 0x220   :  { %v630_v42 = vpop.eup %629  ;;  %432 = vmin.xlane.f32.xlu1 %v431_v40  ;;  %v346_v18 = vsel %vm329_vm12, %v996_v31, 0.0  ;;  %v1014_v20 = vsel %vm312_vm10, 1.0, %v657_v54  ;;  %vm446_vm15 = vcmp.ne.s32.totalorder %v1001_v17, 4294967196 }
 0x221   :  { %v632_v47 = vpop.eup %631  ;;  %v228_v48 = vadd.f32 %v630_v42, %v628_v39  ;;  %v351_v24 = vsel %vm329_vm12, %v1014_v20, 0.0 }
 0x222   :  { %v634_v49 = vpop.eup %633 }
 0x223   :  { %v231_v50 = vadd.f32 %v634_v49, %v632_v47 }
 0x231   :  { %263 = vperm.xlu1 %610, %v944_v51  }
 0x233   :  { %254 = vperm.xlu0 %609, %v249_v23  }
 0x252   :  { %226 = vadd.xlane.f32.xlu0 %v225_v41 }
 0x255   :  { %223 = vadd.xlane.f32.xlu1 %v222_v21  ;;  %v1018_v21 = vsel %vm311_vm11, 1.0, %v657_v54 }
 0x256   :  { %301 = vadd.xlane.f32.xlu0 %v300_v33  ;;  %v349_v5 = vsel %vm329_vm12, %v1018_v21, 0.0 }
 0x259   :  { %229 = vadd.xlane.f32.xlu1 %v228_v48 }
 0x29f   :  { %v950_v2 = vpop.xlane.xlu0 %384 }
 0x2a0   :  { %vm386_vm5 = vcmp.eq.f32.partialorder %v899_v57, %v950_v2  ;;  %v984_v57 = vld [vmem:[%s1085_s4 + $0x8] sm:$0xff] }
 0x2a1   :  { %vm447_vm13 = vcmp.ne.s32.totalorder %v984_v57, 4294967196 }
 0x2a2   :  { %v547_v25 = vsel %vm447_vm13, 1.0, %v657_v54 }
 0x2a3   :  { %v491_v38 = vsel %vm329_vm12, %v547_v25, 0.0 }
 0x2a5   :  { %v952_v53 = vpop.xlane.xlu1 %400 }
 0x2a6   :  { %vm402_vm6 = vcmp.eq.f32.partialorder %v921_v9, %v952_v53  ;;  %v993_v9 = vld [vmem:[%s1085_s4 + $0x10] sm:$0xff] }
 0x2a7   :  { %vm448_vm14 = vcmp.ne.s32.totalorder %v993_v9, 4294967196 }
 0x2a8   :  { %v548_v30 = vsel %vm448_vm14, 1.0, %v657_v54 }
 0x2a9   :  { %v493_v39 = vsel %vm329_vm12, %v548_v30, 0.0 }
 0x2aa   :  { %v954_v55 = vpop.xlane.xlu0 %416 }
 0x2ab   :  { %vm418_vm0 = vcmp.eq.f32.partialorder %v415_v0, %v954_v55 }
 0x2ac   :  { %v419_v59 = vsel %vm418_vm0, %v414_v58, inf  ;;  %vm449_vm0 = vcmp.ne.s32.totalorder %v1010_v19, 4294967196 }
 0x2ad   :  { %420 = vmin.xlane.f32.xlu0 %v419_v59  ;;  %v957_v60 = vpop.xlane.xlu1 %432  ;;  %v549_v33 = vsel %vm449_vm0, 1.0, %v657_v54 }
 0x2ae   :  { %vm434_vm7 = vcmp.eq.f32.partialorder %v431_v40, %v957_v60  ;;  %v495_v42 = vsel %vm329_vm12, %v549_v33, 0.0 }
 0x2b1   :  { %304 = vadd.xlane.f32.xlu0 %v303_v46  ;;  %v264_v61 = vpop.permute.xlu1 %263 }
 0x2b2   :  { %vm271_vm1 = vcmp.eq.s32.totalorder %v861_v34, %v264_v61  ;;  %vm272_vm2 = vcmp.eq.s32.totalorder %v864_v35, %v264_v61  ;;  %v255_v63 = vpop.permute.xlu0 %254 }
 0x2b3   :  { %v536_v3 = vsel %vm271_vm1, 1.0, %v657_v54  ;;  %v537_v4 = vsel %vm272_vm2, 1.0, %v657_v54  ;;  %vm265_vm3 = vcmp.eq.s32.totalorder %v861_v34, %v255_v63  ;;  %vm266_vm4 = vcmp.eq.s32.totalorder %v864_v35, %v255_v63 }
 0x2b4   :  { %v530_v6 = vsel %vm265_vm3, 1.0, %v657_v54  ;;  %v531_v7 = vsel %vm266_vm4, 1.0, %v657_v54  ;;  %v295_v8 = vmul.f32 %v536_v3, %v841_v27  ;;  %v296_v10 = vmul.f32 %v537_v4, %v845_v29 }
 0x2b5   :  { %v289_v11 = vmul.f32 %v530_v6, %v825_v1  ;;  %v290_v12 = vmul.f32 %v531_v7, %v827_v22  ;;  %v382_v34 = vcvt.s32.f32 %v380_v15  ;;  %v396_v35 = vand.u32 65535, %v908_v62 }
 0x2b6   :  { %v306_v13 = vadd.f32 %v296_v10, %v295_v8  ;;  %v428_v22 = vand.u32 65535, %v936_v28  ;;  %v988_v62 = vsel %vm310_vm8, 1.0, %v657_v54  ;;  %v546_v28 = vsel %vm446_vm15, 1.0, %v657_v54 }
 0x2b7   :  { %v297_v14 = vadd.f32 %v290_v12, %v289_v11  ;;  %v387_v16 = vsel %vm386_vm5, %v382_v34, inf  ;;  %v398_v1 = vcvt.s32.f32 %v396_v35  ;;  %v347_v32 = vsel %vm329_vm12, %v988_v62, 0.0 }
 0x2b8   :  { %v430_v29 = vcvt.s32.f32 %v428_v22  ;;  %v348_v0 = vadd.f32 %v347_v32, %v346_v18  ;;  %v490_v26 = vsel %vm329_vm12, %v546_v28, 0.0  ;;  %v423_v63 = vcvt.f32.s32 %v954_v55 }
 0x2b9   :  { %298 = vadd.xlane.f32.xlu1 %v297_v14  ;;  %v403_v27 = vsel %vm402_vm6, %v398_v1, inf  ;;  %v492_v40 = vadd.f32 %v491_v38, %v490_v26  ;;  %v391_v7 = vcvt.f32.s32 %v950_v2  ;;  %v439_v2 = vcvt.f32.s32 %v957_v60 }
 0x2ba   :  { %v435_v45 = vsel %vm434_vm7, %v430_v29, inf  ;;  %v350_v37 = vadd.f32 %v349_v5, %v348_v0  ;;  %v424_v11 = vshll.u32 %v423_v63, 16 }
 0x2bb   :  { %v494_v46 = vadd.f32 %v493_v39, %v492_v40  ;;  %v392_v34 = vshll.u32 %v391_v7, 16  ;;  %v440_v60 = vshll.u32 %v439_v2, 16 }
 0x2bc   :  { %v352_v41 = vadd.f32 %v351_v24, %v350_v37 }
 0x2bd   :  { %232 = vadd.xlane.f32.xlu1 %v231_v50  ;;  %v496_v47 = vadd.f32 %v495_v42, %v494_v46 }
 0x2c1   :  { %388 = vmin.xlane.f32.xlu1 %v387_v16 }
 0x2c5   :  { %404 = vmin.xlane.f32.xlu1 %v403_v27 }
 0x2c9   :  { %436 = vmin.xlane.f32.xlu1 %v435_v45 }
 0x2cd   :  { %307 = vadd.xlane.f32.xlu1 %v306_v13  ;;  %v407_v13 = vcvt.f32.s32 %v952_v53 }
 0x2cf   :  { %v408_v27 = vshll.u32 %v407_v13, 16 }
 0x2d1   :  { %353 = vadd.xlane.f32.xlu1 %v352_v41 }
 0x2d5   :  { %497 = vadd.xlane.f32.xlu1 %v496_v47 }
 0x2df   :  { %v227_v48 = vpop.xlane.xlu0 %226 }
 0x2e0   :  { %635 = vlog2.f32 %v227_v48 }
 0x2e2   :  { %v224_v49 = vpop.xlane.xlu1 %223 }
 0x2e3   :  { %637 = vlog2.f32 %v224_v49  ;;  %v302_v51 = vpop.xlane.xlu0 %301 }
 0x2e6   :  { %v230_v50 = vpop.xlane.xlu1 %229 }
 0x2e7   :  { %639 = vlog2.f32 %v230_v50 }
 0x2ea   :  { %v636_v23 = vpop.eup %635 }
 0x2eb   :  { %v237_v59 = vmul.f32 0.6931472, %v636_v23 }
 0x2ed   :  { %v638_v52 = vpop.eup %637  ;;  %v243_v10 = vadd.f32 %v237_v59, %v878_v43 }
 0x2ee   :  { %v235_v3 = vmul.f32 0.6931472, %v638_v52 }
 0x2ef   :  { %v322_v1 = vsub.f32 %v243_v10, %v302_v51 }
 0x2f0   :  { %v242_v12 = vadd.f32 %v235_v3, %v866_v36 }
 0x2f1   :  { %v640_v6 = vpop.eup %639  ;;  %v326_v32 = vmul.f32 %v988_v62, %v322_v1 }
 0x2f2   :  { %v239_v14 = vmul.f32 0.6931472, %v640_v6 }
 0x2f3   :  { %v331_v62 = vsel %vm329_vm12, %v326_v32, 0.0 }
 0x2f4   :  { %v244_v29 = vadd.f32 %v239_v14, %v880_v44 }
 0x33a   :  { %v421_v61 = vpop.xlane.xlu0 %420 }
 0x33b   :  { %v422_v8 = vcvt.f32.s32 %v421_v61 }
 0x33d   :  { %v425_v35 = vadd.s32 %v424_v11, %v422_v8 }
 0x33e   :  { %v305_v45 = vpop.xlane.xlu0 %304 }
 0x33f   :  { %vm452_vm1 = vcmp.eq.s32.totalorder %v425_v35, %v993_v9  ;;  %v323_v0 = vsub.f32 %v244_v29, %v305_v45 }
 0x340   :  { %vm456_vm4 = vmand %vm452_vm1, %vm448_vm14 }
 0x341   :  { %v327_v30 = vmul.f32 %v1018_v21, %v323_v0  ;;  %v544_v37 = vsel %vm456_vm4, 1.0, %v657_v54 }
 0x343   :  { %v333_v42 = vsel %vm329_vm12, %v327_v30, 0.0 }
 0x346   :  { %v299_v58 = vpop.xlane.xlu1 %298 }
 0x347   :  { %v321_v16 = vsub.f32 %v242_v12, %v299_v58 }
 0x349   :  { %v325_v36 = vmul.f32 %v996_v31, %v321_v16 }
 0x34a   :  { %v233_v4 = vpop.xlane.xlu1 %232 }
 0x34b   :  { %641 = vlog2.f32 %v233_v4  ;;  %v330_v28 = vsel %vm329_vm12, %v325_v36, 0.0 }
 0x34c   :  { %v332_v38 = vadd.f32 %v331_v62, %v330_v28 }
 0x34e   :  { %v389_v15 = vpop.xlane.xlu1 %388  ;;  %v334_v48 = vadd.f32 %v333_v42, %v332_v38 }
 0x34f   :  { %v390_v55 = vcvt.f32.s32 %v389_v15 }
 0x351   :  { %v393_v22 = vadd.s32 %v392_v34, %v390_v55 }
 0x352   :  { %v405_v43 = vpop.xlane.xlu1 %404 }
 0x353   :  { %vm450_vm2 = vcmp.eq.s32.totalorder %v393_v22, %v1001_v17  ;;  %v406_v53 = vcvt.f32.s32 %v405_v43 }
 0x354   :  { %vm454_vm3 = vmand %vm450_vm2, %vm446_vm15 }
 0x355   :  { %v642_v18 = vpop.eup %641  ;;  %v409_v5 = vadd.s32 %v408_v27, %v406_v53  ;;  %v542_v31 = vsel %vm454_vm3, 1.0, %v657_v54 }
 0x356   :  { %v241_v44 = vmul.f32 0.6931472, %v642_v18  ;;  %v437_v24 = vpop.xlane.xlu1 %436  ;;  %v466_v39 = vsel %vm329_vm12, %v542_v31, 0.0 }
 0x357   :  { %vm451_vm5 = vcmp.eq.s32.totalorder %v409_v5, %v984_v57  ;;  %v438_v25 = vcvt.f32.s32 %v437_v24 }
 0x358   :  { %vm455_vm6 = vmand %vm451_vm5, %vm447_vm13  ;;  %v245_v17 = vadd.f32 %v241_v44, %v897_v56  ;;  %v469_v56 = vsel %vm329_vm12, %v544_v37, 0.0 }
 0x359   :  { %v543_v9 = vsel %vm455_vm6, 1.0, %v657_v54  ;;  %v441_v33 = vadd.s32 %v440_v60, %v438_v25 }
 0x35a   :  { %v308_v26 = vpop.xlane.xlu1 %307  ;;  %v467_v40 = vsel %vm329_vm12, %v543_v9, 0.0 }
 0x35b   :  { %vm453_vm7 = vcmp.eq.s32.totalorder %v441_v33, %v1010_v19  ;;  %v324_v41 = vsub.f32 %v245_v17, %v308_v26  ;;  %v468_v57 = vadd.f32 %v467_v40, %v466_v39 }
 0x35c   :  { %vm457_vm8 = vmand %vm453_vm7, %vm449_vm0 }
 0x35d   :  { %v328_v21 = vmul.f32 %v1014_v20, %v324_v41  ;;  %v545_v46 = vsel %vm457_vm8, 1.0, %v657_v54  ;;  %v470_v47 = vadd.f32 %v469_v56, %v468_v57 }
 0x35e   :  { %v471_v49 = vsel %vm329_vm12, %v545_v46, 0.0  ;;  %v354_v19 = vpop.xlane.xlu1 %353 }
 0x35f   :  { %v335_v50 = vsel %vm329_vm12, %v328_v21, 0.0  ;;  %v472_v51 = vadd.f32 %v471_v49, %v470_v47  ;;  %v355_v52 = vrot.slane %v354_v19, 4 }
 0x360   :  { %v336_v23 = vadd.f32 %v335_v50, %v334_v48 }
 0x361   :  { %v356_v59 = vadd.f32 %v355_v52, %v354_v19 }
 0x362   :  { %337 = vadd.xlane.f32.xlu0 %v336_v23  ;;  %v498_v58 = vpop.xlane.xlu1 %497 }
 0x363   :  { %v499_v61 = vrot.slane %v498_v58, 4  ;;  %v357_v20 = vrot.slane %v356_v59, 2 }
 0x365   :  { %v500_v63 = vadd.f32 %v499_v61, %v498_v58  ;;  %v358_v8 = vadd.f32 %v357_v20, %v356_v59 }
 0x366   :  { %473 = vadd.xlane.f32.xlu0 %v472_v51 }
 0x367   :  { %v501_v6 = vrot.slane %v500_v63, 2  ;;  %v359_v15 = vrot.slane %v358_v8, 1 }
 0x369   :  { %v502_v14 = vadd.f32 %v501_v6, %v500_v63  ;;  %v360_v1 = vadd.f32 %v359_v15, %v358_v8 }
 0x36b   :  { %v503_v22 = vrot.slane %v502_v14, 1 }
 0x36d   :  { %v504_v29 = vadd.f32 %v503_v22, %v502_v14 }
 0x3ef   :  { %v338_v3 = vpop.xlane.xlu0 %337 }
 0x3f0   :  { %v339_v4 = vrot.slane %v338_v3, 4 }
 0x3f2   :  { %v340_v54 = vadd.f32 %v339_v4, %v338_v3 }
 0x3f3   :  { %v474_v7 = vpop.xlane.xlu0 %473 }
 0x3f4   :  { %v341_v10 = vrot.slane %v340_v54, 2  ;;  %v475_v11 = vrot.slane %v474_v7, 4 }
 0x3f6   :  { %v476_v12 = vadd.f32 %v475_v11, %v474_v7  ;;  %v342_v13 = vadd.f32 %v341_v10, %v340_v54 }
 0x3f8   :  { %v477_v34 = vrot.slane %v476_v12, 2  ;;  %v343_v35 = vrot.slane %v342_v13, 1 }
 0x3fa   :  { %v478_v16 = vadd.f32 %v477_v34, %v476_v12  ;;  %v344_v55 = vadd.f32 %v343_v35, %v342_v13 }
 0x3fc   :  { %598 = vpush %v344_v55  ;;  %v479_v27 = vrot.slane %v478_v16, 1 }
 0x3fd   :  { %600 = vpush %v360_v1 }
 0x3fe   :  { %v480_v2 = vadd.f32 %v479_v27, %v478_v16 }
 0x400   :  { %602 = vpush %v480_v2 }
 0x401   :  { %604 = vpush %v504_v29 }
 0x42d   :  { %s599_s4 = spop %598 }
 0x42e   :  { %507 = sst [smem:[#allocation2]] %s599_s4  ;;  %s601_s30 = spop %600 }
 0x42f   :  { %509 = sst [smem:[#allocation2 + $0x1]] %s601_s30 }
 0x431   :  { %s603_s6 = spop %602 }
 0x432   :  { %511 = sst [smem:[#allocation2 + $0x2]] %s603_s6  ;;  %s605_s7 = spop %604 }
 0x433   :  { %513 = sst [smem:[#allocation2 + $0x3]] %s605_s7 }
 0x434   :  { %654 = shalt.err (!%p651_p4)
}
 0x435   :  { %s659_s9 = smov [#allocation2]  }
 0x436   :  { %523 = dma.smem_to_vmem %s659_s9, 16, %s521_s29, [#allocation3]  }
 0x437   :  { %655 = dma.done.wait [#allocation3], 16  }
 0x438   :  { %656 = vsyncadd [#allocation3], 4294967280 }
 0x439   :  { %527 = sfence }
 0x43a   :  { %528 = vsyncpa [#allocation3], 1 }

// kernel: forward.5
= control target key start
LH: loop header
LB: loop body
LE: loop exit
PB: predicated region body
PF: predicated region fallthrough
CT: control target
= control target key end

     0   :  { %s3177_s13 = smov 0   ;;  %s4015_s0 = inlined_call_operand.vmem [shape: f32[2,16,128], index: 0, kind: input, shape index: {}]   ;;  %s4016_s1 = inlined_call_operand.vmem [shape: f32[2,16,16], index: 1, kind: input, shape index: {}]   ;;  %s4017_s2 = inlined_call_operand.vmem [shape: f32[16,32], index: 2, kind: input, shape index: {}]   ;;  %s4018_s3 = inlined_call_operand.vmem [shape: f32[16,32], index: 3, kind: input, shape index: {}]   ;;  %s4019_s4 = inlined_call_operand.vmem [shape: f32[1,128], index: 4, kind: input, shape index: {}]   ;;  %s4020_s5 = inlined_call_operand.vmem [shape: f32[128,384], index: 5, kind: input, shape index: {}]   ;;  %s4021_s6 = inlined_call_operand.vmem [shape: f32[128,128], index: 6, kind: input, shape index: {}]   ;;  %s4022_s7 = inlined_call_operand.vmem [shape: f32[1,128], index: 7, kind: input, shape index: {}]   ;;  %s4023_s8 = inlined_call_operand.vmem [shape: f32[128,512], index: 8, kind: input, shape index: {}]   ;;  %s4024_s9 = inlined_call_operand.vmem [shape: f32[256,128], index: 9, kind: input, shape index: {}]   ;;  %s4025_s10 = inlined_call_operand.vmem [shape: f32[2,16,128], index: 10, kind: output, shape index: {}]  }
   0x1 LB: > { %s2467_s14 = sadd.s32 4294967295, %s3112_s13   ;;  %p2471_p0 = scmp.ge.s32.totalorder %s3112_s13, 1  ;;  %s3112_s13 = sphi %s3177_s13, %s20_s13  }
   0x2   : > { %p322_p1 = scmp.lt.s32.totalorder %s3112_s13, 3 }
   0x4   : > { %p323_p2 = pnand %p2471_p0, %p322_p1 }
   0x5   : > { %p365_p3 = scmp.lt.s32.totalorder (!%p323_p2), %s2467_s14, 1  ;;  %v429_v0 = vld [vmem:[%s4020_s5 + $0x8] sm:$0xff] (!%p323_p2)  ;;  %v432_v1 = vld [vmem:[%s4020_s5 + $0x20] sm:$0xff] (!%p323_p2)  ;;  %v431_v4 = vld [vmem:[%s4020_s5 + $0x18] sm:$0xff] (!%p323_p2)  ;;  %v3114_v59 = vmov (!%p323_p2), 0.0   ;;  %s3115_s30 = smov (!%p323_p2), 80  }
   0x6   : > { %326 = sbr.rel (%p323_p2) target bundleno = 2905 (0xb59), region = 60  ;;  %v428_v2 = vld [vmem:[%s4020_s5] sm:$0xff] (!%p323_p2)  ;;  %v2764_v3 = vpack.c.bf16 (!%p323_p2), %v432_v1, %v429_v0  ;;  %v435_v5 = vld [vmem:[%s4020_s5 + $0x38] sm:$0xff] (!%p323_p2)  ;;  %v438_v6 = vld [vmem:[%s4020_s5 + $0x50] sm:$0xff] (!%p323_p2)  ;;  %540 = vmatprep.mubr.f32.mxu0 (!%p323_p2), %v3114_v59  ;;  %s3116_s11 = smov (!%p323_p2), 48   ;;  %vm646_vm0 = vcmask (!%p323_p2), 130048  }
   0x7   : > { %v2766_v7 = vpack.c.bf16 (!%p323_p2), %v431_v4, %v428_v2  ;;  %v2768_v8 = vpack.c.bf16 (!%p323_p2), %v438_v6, %v435_v5  ;;  %v434_v9 = vld [vmem:[%s4020_s5 + $0x30] sm:$0xff] (!%p323_p2)  ;;  %v437_v10 = vld [vmem:[%s4020_s5 + $0x48] sm:$0xff] (!%p323_p2)  ;;  %v444_v12 = vld [vmem:[%s4020_s5 + $0x80] sm:$0xff] (!%p323_p2)  ;;  %s3117_s16 = smov (!%p323_p2), 64   ;;  %s3118_s24 = smov (!%p323_p2), 112   ;;  %vm681_vm1 = vcmask (!%p323_p2), 261120  }
   0x8   : > { %v441_v11 = vld [vmem:[%s4020_s5 + $0x68] sm:$0xff] (!%p323_p2)  ;;  %2765 = vmatprep.subr.bf16.mxu0 (!%p323_p2), %v2764_v3  ;;  %v430_v13 = vld [vmem:[%s4020_s5 + $0x10] sm:$0xff] (!%p323_p2)  ;;  %v2770_v15 = vpack.c.bf16 (!%p323_p2), %v437_v10, %v434_v9  ;;  %v440_v17 = vld [vmem:[%s4020_s5 + $0x60] sm:$0xff] (!%p323_p2)  ;;  %s3119_s25 = smov (!%p323_p2), 16   ;;  %s3120_s26 = smov (!%p323_p2), 32  }
   0x9   : > { %v433_v14 = vld [vmem:[%s4020_s5 + $0x28] sm:$0xff] (!%p323_p2)  ;;  %2767 = vmatpush1.bf16.msra.mxu0 (!%p323_p2), %v2766_v7  ;;  %v443_v18 = vld [vmem:[%s4020_s5 + $0x78] sm:$0xff] (!%p323_p2)  ;;  %v2772_v19 = vpack.c.bf16 (!%p323_p2), %v444_v12, %v441_v11  ;;  %v436_v21 = vld [vmem:[%s4020_s5 + $0x40] sm:$0xff] (!%p323_p2)  ;;  %s3121_s27 = smov (!%p323_p2), 96  }
   0xa   : > { %v2796_v16 = vpack.c.bf16 (!%p323_p2), %v433_v14, %v430_v13  ;;  %2769 = vmatprep.subr.bf16.mxu0 (!%p323_p2), %v2768_v8  ;;  %v447_v20 = vld [vmem:[%s4020_s5 + $0x98] sm:$0xff] (!%p323_p2)  ;;  %v450_v25 = vld [vmem:[%s4020_s5 + $0xb0] sm:$0xff] (!%p323_p2)  ;;  %v2774_v28 = vpack.c.bf16 (!%p323_p2), %v443_v18, %v440_v17  ;;  %v449_v32 = vld [vmem:[%s4020_s5 + $0xa8] sm:$0xff] (!%p323_p2) }
   0xb   : > { %v439_v22 = vld [vmem:[%s4020_s5 + $0x58] sm:$0xff] (!%p323_p2)  ;;  %v2776_v30 = vpack.c.bf16 (!%p323_p2), %v450_v25, %v447_v20  ;;  %v446_v31 = vld [vmem:[%s4020_s5 + $0x90] sm:$0xff] (!%p323_p2)  ;;  %v453_v34 = vld [vmem:[%s4020_s5 + $0xc8] sm:$0xff] (!%p323_p2) }
   0xc   : > { %2797 = vmatprep.subr.bf16.mxu1 (!%p323_p2), %v2796_v16  ;;  %v2800_v26 = vpack.c.bf16 (!%p323_p2), %v439_v22, %v436_v21  ;;  %v2778_v33 = vpack.c.bf16 (!%p323_p2), %v449_v32, %v446_v31  ;;  %v456_v35 = vld [vmem:[%s4020_s5 + $0xe0] sm:$0xff] (!%p323_p2)  ;;  %v442_v36 = vld [vmem:[%s4020_s5 + $0x70] sm:$0xff] (!%p323_p2)  ;;  %v445_v38 = vld [vmem:[%s4020_s5 + $0x88] sm:$0xff] (!%p323_p2) }
   0xd   : > { %s4029_s14 = smov (!%p365_p3, %s2467_s14), 1  ;;  %2799 = vmatpush3.bf16.msra.mxu1 %v2796_v16  ;;  %2771 = vmatpush1.bf16.msra.mxu0 %v2770_v15  ;;  %v2780_v37 = vpack.c.bf16 %v456_v35, %v453_v34  ;;  %v452_v39 = vld [vmem:[%s4020_s5 + $0xc0] sm:$0xff]  ;;  %v455_v40 = vld [vmem:[%s4020_s5 + $0xd8] sm:$0xff]  ;;  %v2804_v41 = vpack.c.bf16 %v445_v38, %v442_v36  ;;  %v462_v44 = vld [vmem:[%s4020_s5 + $0x110] sm:$0xff] }
   0xe   : > { %s3221_s21 = sshll.u32 %s4029_s14, 4  ;;  %2801 = vmatprep.subr.bf16.mxu1 %v2800_v26  ;;  %2773 = vmatprep.subr.bf16.mxu0 %v2772_v19  ;;  %v2782_v42 = vpack.c.bf16 %v455_v40, %v452_v39  ;;  %v459_v43 = vld [vmem:[%s4020_s5 + $0xf8] sm:$0xff]  ;;  %v448_v45 = vld [vmem:[%s4020_s5 + $0xa0] sm:$0xff]  ;;  %v458_v48 = vld [vmem:[%s4020_s5 + $0xf0] sm:$0xff] }
   0xf   : > { %s3233_s28 = scalar_lea.vmem %s4015_s0, %s3221_s21  ;;  %v2784_v46 = vpack.c.bf16 %v462_v44, %v459_v43  ;;  %v451_v47 = vld [vmem:[%s4020_s5 + $0xb8] sm:$0xff]  ;;  %v461_v49 = vld [vmem:[%s4020_s5 + $0x108] sm:$0xff]  ;;  %v468_v53 = vld [vmem:[%s4020_s5 + $0x140] sm:$0xff] }
  0x10   : > { %v3245_v23 = vld [vmem:[%s3233_s28] sm:$0xff]  ;;  %v3248_v24 = vld [vmem:[%s3233_s28 + $0x8] sm:$0xff]  ;;  %v2808_v50 = vpack.c.bf16 %v451_v47, %v448_v45  ;;  %v2786_v51 = vpack.c.bf16 %v461_v49, %v458_v48  ;;  %v454_v54 = vld [vmem:[%s4020_s5 + $0xd0] sm:$0xff] }
  0x11   : > { %v405_v27 = vmul.f32 %v3245_v23, %v3245_v23  ;;  %v406_v29 = vmul.f32 %v3248_v24, %v3248_v24  ;;  %2803 = vmatpush3.bf16.msra.mxu1 %v2800_v26  ;;  %2775 = vmatpush1.bf16.msra.mxu0 %v2774_v28  ;;  %v465_v52 = vld [vmem:[%s4020_s5 + $0x128] sm:$0xff]  ;;  %v464_v57 = vld [vmem:[%s4020_s5 + $0x120] sm:$0xff]  ;;  %v467_v58 = vld [vmem:[%s4020_s5 + $0x138] sm:$0xff] }
  0x12   : > { %2777 = vmatprep.subr.bf16.mxu0 %v2776_v30  ;;  %2805 = vmatprep.subr.bf16.mxu1 %v2804_v41  ;;  %v2788_v55 = vpack.c.bf16 %v468_v53, %v465_v52  ;;  %v457_v56 = vld [vmem:[%s4020_s5 + $0xe8] sm:$0xff]  ;;  %v2790_v61 = vpack.c.bf16 %v467_v58, %v464_v57  ;;  %v471_v62 = vld [vmem:[%s4020_s5 + $0x158] sm:$0xff]  ;;  %v474_v63 = vld [vmem:[%s4020_s5 + $0x170] sm:$0xff] }
  0x13   : > { %407 = vadd.xlane.f32.xlu0 %v405_v27  ;;  %v2812_v60 = vpack.c.bf16 %v457_v56, %v454_v54  ;;  %v460_v0 = vld [vmem:[%s4020_s5 + $0x100] sm:$0xff]  ;;  %v2792_v1 = vpack.c.bf16 %v474_v63, %v471_v62  ;;  %v463_v2 = vld [vmem:[%s4020_s5 + $0x118] sm:$0xff]  ;;  %v470_v3 = vld [vmem:[%s4020_s5 + $0x150] sm:$0xff] }
  0x14   : > { %v473_v4 = vld [vmem:[%s4020_s5 + $0x168] sm:$0xff]  ;;  %v2816_v5 = vpack.c.bf16 %v463_v2, %v460_v0  ;;  %v466_v7 = vld [vmem:[%s4020_s5 + $0x130] sm:$0xff]  ;;  %v472_v10 = vld [vmem:[%s4020_s5 + $0x160] sm:$0xff] }
  0x15   : > { %2779 = vmatpush1.bf16.msra.mxu0 %v2778_v33  ;;  %2807 = vmatpush3.bf16.msra.mxu1 %v2804_v41  ;;  %v2794_v6 = vpack.c.bf16 %v473_v4, %v470_v3  ;;  %v469_v8 = vld [vmem:[%s4020_s5 + $0x148] sm:$0xff]  ;;  %v475_v11 = vld [vmem:[%s4020_s5 + $0x178] sm:$0xff]  ;;  %v2478_v20 = vld [vmem:[%s4019_s4] ss:$0 sm:$0xff] }
  0x16   : > { %2781 = vmatprep.subr.bf16.mxu0 %v2780_v37  ;;  %2809 = vmatprep.subr.bf16.mxu1 %v2808_v50  ;;  %v2820_v9 = vpack.c.bf16 %v469_v8, %v466_v7  ;;  %v2824_v12 = vpack.c.bf16 %v475_v11, %v472_v10  ;;  %v3404_v39 = vld [vmem:[%s4017_s2] sm:$0xff]  ;;  %v3419_v47 = vld [vmem:[%s4018_s3 + $0x8] sm:$0xff]  ;;  %vm3476_vm2 = vmpackc.low %vm681_vm1, %vm681_vm1 }
  0x17   : > { %409 = vadd.xlane.f32.xlu0 %v406_v29  ;;  %v3411_v41 = vld [vmem:[%s4018_s3] sm:$0xff] }
  0x19   : > { %2783 = vmatpush1.bf16.msra.mxu0 %v2782_v42  ;;  %2811 = vmatpush3.bf16.msra.mxu1 %v2808_v50 }
  0x1a   : > { %2785 = vmatprep.subr.bf16.mxu0 %v2784_v46  ;;  %2813 = vmatprep.subr.bf16.mxu1 %v2812_v60 }
  0x1d   : > { %2787 = vmatpush1.bf16.msra.mxu0 %v2786_v51  ;;  %2815 = vmatpush3.bf16.msra.mxu1 %v2812_v60 }
  0x1e   : > { %2789 = vmatprep.subr.bf16.mxu0 %v2788_v55  ;;  %2817 = vmatprep.subr.bf16.mxu1 %v2816_v5 }
  0x21   : > { %2791 = vmatpush1.bf16.msra.mxu0 %v2790_v61  ;;  %2819 = vmatpush3.bf16.msra.mxu1 %v2816_v5 }
  0x22   : > { %2793 = vmatprep.subr.bf16.mxu0 %v2792_v1  ;;  %2821 = vmatprep.subr.bf16.mxu1 %v2820_v9 }
  0x25   : > { %2795 = vmatpush1.bf16.msra.mxu0 %v2794_v6  ;;  %2823 = vmatpush3.bf16.msra.mxu1 %v2820_v9 }
  0x26   : > { %2825 = vmatprep.subr.bf16.mxu1 %v2824_v12 }
  0x29   : > { %2827 = vmatpush3.bf16.msra.mxu1 %v2824_v12 }
  0xa0   : > { %v408_v13 = vpop.xlane.xlu0 %407 }
  0xa1   : > { %v412_v14 = vmul.f32 0.0078125, %v408_v13 }
  0xa3   : > { %v414_v15 = vadd.f32 1e-06, %v412_v14 }
  0xa4   : > { %v410_v16 = vpop.xlane.xlu0 %409 }
  0xa5   : > { %3048 = vrsqrt.f32 %v414_v15  ;;  %v413_v17 = vmul.f32 0.0078125, %v410_v16 }
  0xa7   : > { %v415_v18 = vadd.f32 1e-06, %v413_v17 }
  0xa9   : > { %3050 = vrsqrt.f32 %v415_v18 }
  0xaf   : > { %v3049_v19 = vpop.eup %3048 }
  0xb0   : > { %v418_v21 = vmul.f32 %v3049_v19, %v3245_v23  ;;  %v3368_v23 = vld [vmem:[%s4017_s2 + $0x8] sm:$0xff] }
  0xb2   : > { %v426_v22 = vmul.f32 %v2478_v20, %v418_v21 }
  0xb3   : > { %v3051_v25 = vpop.eup %3050 }
  0xb4   : > { %541 = vmatmul.mubr.f32.vlgmr.msra.gmra.mrb[0].mxu0 %v426_v22  ;;  %2661 = vmatprep.mubr.f32.mxu1 %v426_v22  ;;  %v419_v26 = vmul.f32 %v3051_v25, %v3248_v24 }
  0xb5   : > { %546 = vmatprep.mubr.f32.mxu0 %v3114_v59 }
  0xb6   : > { %v427_v27 = vmul.f32 %v2478_v20, %v419_v26 }
  0xb8   : > { %547 = vmatmul.mubr.f32.gmra.mrb[2].mxu0 %v427_v27  ;;  %2662 = vmatmul.mubr.f32.vlgmr.msra.gmra.mrb[0].mxu1 %v427_v27 }
 0x187   : > { %v3354_v28 = vpop.f32.mrb[0].mxu0 }
 0x188   : > { %v3356_v29 = vpop.f32.mrb[1].mxu0  ;;  %v3359_v30 = vsub.f32 0.0, %v3354_v28 }
 0x189   : > { %1352 = vrot.lane.b32.xlu0 %v3356_v29, %s3115_s30  ;;  %v3373_v32 = vsub.f32 0.0, %v3356_v29  ;;  %v675_v17 = vmul.f32 %v3356_v29, %v3404_v39 }
 0x18a   : > { %1312 = vrot.lane.b32.xlu1 %v3359_v30, %s3116_s11 }
 0x18b   : > { %v3370_v24 = vpop.f32.mrb[2].mxu0  ;;  %v2663_v31 = vpop.f32.mrb[0].mxu1 }
 0x18c   : > { %v3375_v33 = vpop.f32.mrb[3].mxu0  ;;  %v619_v34 = vpop.f32.mrb[1].mxu1  ;;  %v3395_v38 = vsub.f32 0.0, %v3370_v24 }
 0x18d   : > { %1328 = vrot.lane.b32.xlu0 %v3368_v23, %s3117_s16  ;;  %v3379_v35 = vpack.c.bf16 %v2663_v31, %v619_v34  ;;  %v3381_v36 = vpack.i.bf16 %v2663_v31, %v619_v34  ;;  %v3388_v37 = vsub.f32 0.0, %v3375_v33  ;;  %v676_v19 = vmul.f32 %v3375_v33, %v3368_v23 }
 0x18e   : > { %1346 = vrot.lane.b32.xlu1 %v3373_v32, %s3116_s11  ;;  %v649_v34 = vmul.f32 %v3354_v28, %v3404_v39 }
 0x192   : > { %1354 = vrot.lane.b32.xlu1 %v3375_v33, %s3115_s30 }
 0x196   : > { %1348 = vrot.lane.b32.xlu1 %v3388_v37, %s3116_s11 }
 0x19a   : > { %1318 = vrot.lane.b32.xlu1 %v3354_v28, %s3115_s30 }
 0x19e   : > { %1314 = vrot.lane.b32.xlu1 %v3395_v38, %s3116_s11 }
 0x1a2   : > { %1320 = vrot.lane.b32.xlu1 %v3370_v24, %s3115_s30 }
 0x1a6   : > { %1326 = vrot.lane.b32.xlu1 %v3404_v39, %s3117_s16 }
 0x1fb   : > { %v1353_v42 = vpop.permute.xlu0 %1352 }
 0x1fc   : > { %v1313_v40 = vpop.permute.xlu1 %1312 }
 0x1ff   : > { %v1329_v60 = vpop.permute.xlu0 %1328 }
 0x200   : > { %v1347_v43 = vpop.permute.xlu1 %1346  ;;  %v1361_v62 = vmul.f32 %v1329_v60, %v3375_v33  ;;  %v1333_v8 = vmul.f32 %v1329_v60, %v3370_v24 }
 0x201   : > { %v1358_v44 = vsel %vm646_vm0, %v1347_v43, %v1353_v42 }
 0x202   : > { %v1362_v45 = vmul.f32 %v1358_v44, %v3411_v41 }
 0x204   : > { %v1355_v46 = vpop.permute.xlu1 %1354  ;;  %1366 = vrot.lane.b32.xlu1 %v1362_v45, %s3117_s16 }
 0x208   : > { %v1349_v48 = vpop.permute.xlu1 %1348 }
 0x209   : > { %v1359_v49 = vsel %vm646_vm0, %v1349_v48, %v1355_v46 }
 0x20a   : > { %v1363_v50 = vmul.f32 %v1359_v49, %v3419_v47 }
 0x20c   : > { %1368 = vrot.lane.b32.xlu0 %v1363_v50, %s3117_s16  ;;  %v1319_v51 = vpop.permute.xlu1 %1318 }
 0x20d   : > { %v1324_v52 = vsel %vm646_vm0, %v1313_v40, %v1319_v51 }
 0x20e   : > { %v1334_v53 = vmul.f32 %v1324_v52, %v3411_v41 }
 0x210   : > { %v1315_v54 = vpop.permute.xlu1 %1314  ;;  %1338 = vrot.lane.b32.xlu1 %v1334_v53, %s3117_s16 }
 0x214   : > { %v1321_v55 = vpop.permute.xlu1 %1320  ;;  %659 = vrot.lane.b32.xlu1 %v3373_v32, %s3118_s24 }
 0x215   : > { %v1325_v56 = vsel %vm646_vm0, %v1315_v54, %v1321_v55 }
 0x216   : > { %v1335_v57 = vmul.f32 %v1325_v56, %v3419_v47 }
 0x218   : > { %1340 = vrot.lane.b32.xlu0 %v1335_v57, %s3117_s16  ;;  %667 = vrot.lane.b32.xlu1 %v3356_v29, %s3119_s25  ;;  %v1327_v58 = vpop.permute.xlu1 %1326 }
 0x219   : > { %v1360_v63 = vmul.f32 %v1327_v58, %v3356_v29  ;;  %v1332_v3 = vmul.f32 %v1327_v58, %v3354_v28 }
 0x21c   : > { %661 = vrot.lane.b32.xlu0 %v3388_v37, %s3118_s24  ;;  %632 = vrot.lane.b32.xlu1 %v3359_v30, %s3118_s24 }
 0x220   : > { %669 = vrot.lane.b32.xlu0 %v3375_v33, %s3119_s25  ;;  %634 = vrot.lane.b32.xlu1 %v3395_v38, %s3118_s24 }
 0x224   : > { %640 = vrot.lane.b32.xlu0 %v3354_v28, %s3119_s25 }
 0x228   : > { %642 = vrot.lane.b32.xlu0 %v3370_v24, %s3119_s25 }
 0x276   : > { %v1367_v61 = vpop.permute.xlu1 %1366 }
 0x277   : > { %v1372_v1 = vadd.f32 %v1367_v61, %v1360_v63 }
 0x27e   : > { %v1369_v0 = vpop.permute.xlu0 %1368 }
 0x27f   : > { %v1373_v2 = vadd.f32 %v1369_v0, %v1361_v62 }
 0x281   : > { %v3018_v4 = vpack.i.bf16 %v1373_v2, %v1372_v1 }
 0x282   : > { %v1339_v5 = vpop.permute.xlu1 %1338 }
 0x283   : > { %v1344_v6 = vadd.f32 %v1339_v5, %v1332_v3  ;;  %3019 = vrot.lane.b32.xlu1 %v3018_v4, %s3117_s16 }
 0x285   : > { %1376 = vrot.lane.b32.xlu0 %v1344_v6, %s3117_s16 }
 0x286   : > { %v660_v7 = vpop.permute.xlu1 %659 }
 0x289   : > { %912 = vrot.lane.b32.xlu0 %v3373_v32, %s3115_s30 }
 0x28a   : > { %v1341_v9 = vpop.permute.xlu0 %1340  ;;  %v668_v11 = vpop.permute.xlu1 %667 }
 0x28b   : > { %v1345_v10 = vadd.f32 %v1341_v9, %v1333_v8  ;;  %v673_v13 = vsel %vm646_vm0, %v660_v7, %v668_v11 }
 0x28c   : > { %v677_v14 = vmul.f32 %v673_v13, %v3411_v41 }
 0x28d   : > { %918 = vrot.lane.b32.xlu0 %v3356_v29, %s3118_s24  ;;  %1378 = vrot.lane.b32.xlu1 %v1345_v10, %s3117_s16 }
 0x28e   : > { %v662_v12 = vpop.permute.xlu0 %661  ;;  %v633_v18 = vpop.permute.xlu1 %632  ;;  %v679_v21 = vadd.f32 %v677_v14, %v675_v17 }
 0x291   : > { %876 = vrot.lane.b32.xlu0 %v3359_v30, %s3115_s30  ;;  %914 = vrot.lane.b32.xlu1 %v3388_v37, %s3115_s30 }
 0x292   : > { %v670_v15 = vpop.permute.xlu0 %669  ;;  %v635_v42 = vpop.permute.xlu1 %634 }
 0x293   : > { %v674_v16 = vsel %vm646_vm0, %v662_v12, %v670_v15 }
 0x294   : > { %v678_v20 = vmul.f32 %v674_v16, %v3419_v47 }
 0x295   : > { %878 = vrot.lane.b32.xlu0 %v3395_v38, %s3115_s30  ;;  %920 = vrot.lane.b32.xlu1 %v3375_v33, %s3118_s24  ;;  %s374_s30 = scalar_lea.vmem %s4016_s1, %s3221_s21 }
 0x296   : > { %v680_v22 = vadd.f32 %v678_v20, %v676_v19  ;;  %v641_v25 = vpop.permute.xlu0 %640  ;;  %v3551_v16 = vld [vmem:[%s374_s30 + $0x8] sm:$0xff] }
 0x297   : > { %v647_v26 = vsel %vm646_vm0, %v633_v18, %v641_v25  ;;  %v3553_v18 = vld [vmem:[%s374_s30] sm:$0xff]  ;;  %s379_s30 = scalar_lea.vmem %s4025_s10, %s3221_s21 }
 0x298   : > { %v2828_v31 = vpack.c.bf16 %v680_v22, %v679_v21  ;;  %v651_v40 = vmul.f32 %v647_v26, %v3411_v41 }
 0x299   : > { %1699 = vrot.lane.b32.xlu0 %v3373_v32, %s3119_s25  ;;  %882 = vrot.lane.b32.xlu1 %v3354_v28, %s3118_s24  ;;  %v650_v32 = vmul.f32 %v3370_v24, %v3368_v23 }
 0x29a   : > { %v653_v43 = vadd.f32 %v651_v40, %v649_v34  ;;  %2830 = vmatprep.subr.msk.bf16.mxu0 %vm3476_vm2, %v2828_v31  ;;  %v643_v44 = vpop.permute.xlu0 %642 }
 0x29b   : > { %v648_v45 = vsel %vm646_vm0, %v635_v42, %v643_v44  ;;  %2833 = vmatpush3.bf16.xpose.msk.msra.mxu0 %vm3476_vm2, %v2828_v31 }
 0x29c   : > { %v652_v46 = vmul.f32 %v648_v45, %v3419_v47  ;;  %2668 = vmatprep.mubr.msk.f32.mxu0 %vm681_vm1, %v653_v43  ;;  %2835 = vmatprep.subr.bf16.mxu0 %v3379_v35 }
 0x29d   : > { %1705 = vrot.lane.b32.xlu0 %v3356_v29, %s3116_s11  ;;  %884 = vrot.lane.b32.xlu1 %v3370_v24, %s3118_s24 }
 0x29e   : > { %v654_v48 = vadd.f32 %v652_v46, %v650_v32 }
 0x2a1   : > { %1665 = vrot.lane.b32.xlu0 %v3359_v30, %s3119_s25  ;;  %1701 = vrot.lane.b32.xlu1 %v3388_v37, %s3119_s25 }
 0x2a2   : > { %2669 = vmatmul.mubr.msk.f32.vlgmr.msra.gmra.mrb[4].mxu0 %vm681_vm1, %v654_v48 }
 0x2a3   : > { %2837 = vmatpush3.bf16.msra.mxu0 %v3379_v35 }
 0x2a5   : > { %1667 = vrot.lane.b32.xlu0 %v3395_v38, %s3119_s25  ;;  %1707 = vrot.lane.b32.xlu1 %v3375_v33, %s3116_s11 }
 0x2a9   : > { %892 = vrot.lane.b32.xlu0 %v3404_v39, %s3120_s26  ;;  %1671 = vrot.lane.b32.xlu1 %v3354_v28, %s3116_s11 }
 0x2ad   : > { %1673 = vrot.lane.b32.xlu1 %v3370_v24, %s3116_s11 }
 0x2b1   : > { %894 = vrot.lane.b32.xlu1 %v3368_v23, %s3120_s26 }
 0x2f5   : > { %v3020_v30 = vpop.permute.xlu1 %3019 }
 0x2f6   : > { %v3022_v35 = vunpack.i.h.bf16 %v3020_v30  ;;  %v3021_v37 = vunpack.i.l.bf16 %v3020_v30 }
 0x2f7   : > { %v1377_v38 = vpop.permute.xlu0 %1376 }
 0x2f8   : > { %v2864_v49 = vpack.c.bf16 %v3022_v35, %v3021_v37  ;;  %2718 = vmatprep.mubr.msk.f32.mxu1 %vm681_vm1, %v1377_v38 }
 0x2fa   : > { %2866 = vmatprep.subr.msk.bf16.mxu1 %vm3476_vm2, %v2864_v49 }
 0x2fb   : > { %2869 = vmatpush3.bf16.xpose.msk.msra.mxu1 %vm3476_vm2, %v2864_v49  ;;  %v913_v50 = vpop.permute.xlu0 %912 }
 0x2ff   : > { %v1379_v51 = vpop.permute.xlu1 %1378  ;;  %v919_v52 = vpop.permute.xlu0 %918 }
 0x300   : > { %v924_v53 = vsel %vm646_vm0, %v913_v50, %v919_v52 }
 0x301   : > { %v928_v54 = vmul.f32 %v924_v53, %v3411_v41 }
 0x302   : > { %2719 = vmatmul.mubr.msk.f32.vlgmr.msra.gmra.mrb[2].mxu1 %vm681_vm1, %v1379_v51 }
 0x303   : > { %v915_v55 = vpop.permute.xlu1 %914  ;;  %932 = vrot.lane.b32.xlu0 %v928_v54, %s3120_s26  ;;  %v877_v56 = vpop.permute.xlu0 %876 }
 0x307   : > { %v921_v57 = vpop.permute.xlu1 %920  ;;  %v879_v58 = vpop.permute.xlu0 %878 }
 0x308   : > { %v925_v60 = vsel %vm646_vm0, %v915_v55, %v921_v57 }
 0x309   : > { %v929_v61 = vmul.f32 %v925_v60, %v3419_v47 }
 0x30b   : > { %934 = vrot.lane.b32.xlu1 %v929_v61, %s3120_s26  ;;  %v883_v62 = vpop.permute.xlu1 %882  ;;  %v1700_v63 = vpop.permute.xlu0 %1699 }
 0x30c   : > { %v888_v0 = vsel %vm646_vm0, %v877_v56, %v883_v62 }
 0x30d   : > { %v900_v1 = vmul.f32 %v888_v0, %v3411_v41 }
 0x30f   : > { %v885_v2 = vpop.permute.xlu1 %884  ;;  %904 = vrot.lane.b32.xlu0 %v900_v1, %s3120_s26  ;;  %v1706_v3 = vpop.permute.xlu0 %1705 }
 0x310   : > { %v889_v4 = vsel %vm646_vm0, %v879_v58, %v885_v2  ;;  %v1711_v6 = vsel %vm646_vm0, %v1700_v63, %v1706_v3 }
 0x311   : > { %v901_v5 = vmul.f32 %v889_v4, %v3419_v47  ;;  %v1715_v8 = vmul.f32 %v1711_v6, %v3411_v41 }
 0x313   : > { %v1702_v7 = vpop.permute.xlu1 %1701  ;;  %1679 = vrot.lane.b32.xlu0 %v3404_v39, %s3121_s27  ;;  %906 = vrot.lane.b32.xlu1 %v901_v5, %s3120_s26  ;;  %v1666_v12 = vpop.permute.xlu0 %1665 }
 0x317   : > { %v1708_v9 = vpop.permute.xlu1 %1707  ;;  %1681 = vrot.lane.b32.xlu1 %v3368_v23, %s3121_s27  ;;  %1719 = vrot.lane.b32.xlu0 %v1715_v8, %s3121_s27  ;;  %v1668_v14 = vpop.permute.xlu0 %1667 }
 0x318   : > { %v1712_v10 = vsel %vm646_vm0, %v1702_v7, %v1708_v9 }
 0x319   : > { %v1716_v11 = vmul.f32 %v1712_v10, %v3419_v47 }
 0x31b   : > { %1721 = vrot.lane.b32.xlu1 %v1716_v11, %s3121_s27  ;;  %v1672_v13 = vpop.permute.xlu1 %1671  ;;  %v893_v19 = vpop.permute.xlu0 %892 }
 0x31c   : > { %v926_v40 = vmul.f32 %v893_v19, %v3356_v29  ;;  %v1677_v1 = vsel %vm646_vm0, %v1666_v12, %v1672_v13 }
 0x31d   : > { %v1687_v2 = vmul.f32 %v1677_v1, %v3411_v41  ;;  %v898_v41 = vmul.f32 %v893_v19, %v3354_v28 }
 0x31f   : > { %v1674_v39 = vpop.permute.xlu1 %1673 }
 0x323   : > { %v895_v22 = vpop.permute.xlu1 %894 }
 0x324   : > { %v927_v42 = vmul.f32 %v895_v22, %v3375_v33  ;;  %v899_v13 = vmul.f32 %v895_v22, %v3370_v24 }
 0x375   : > { %v2670_v15 = vpop.f32.mrb[4].mxu0  ;;  %v933_v31 = vpop.permute.xlu0 %932 }
 0x376   : > { %v770_v23 = vmul.f32 0.17677669, %v2670_v15  ;;  %v760_v17 = vpop.f32.mrb[5].mxu0  ;;  %v938_v44 = vadd.f32 %v933_v31, %v926_v40 }
 0x377   : > { %v769_v20 = vmul.f32 0.17677669, %v760_v17 }
 0x378   : > { %v772_v21 = vadd.f32 %v770_v23, %v3551_v16 }
 0x379   : > { %v771_v25 = vadd.f32 %v769_v20, %v3553_v18 }
 0x37a   : > { %v776_v26 = vsel %vm646_vm0, %v772_v21, -inf }
 0x37b   : > { %777 = vmax.xlane.f32.xlu1 %v776_v26  ;;  %v773_v34 = vsel %vm646_vm0, %v771_v25, -inf }
 0x37c   : > { %774 = vmax.xlane.f32.xlu0 %v773_v34 }
 0x37d   : > { %v935_v43 = vpop.permute.xlu1 %934 }
 0x37e   : > { %v939_v45 = vadd.f32 %v935_v43, %v927_v42 }
 0x380   : > { %v3023_v46 = vpack.i.bf16 %v939_v45, %v938_v44 }
 0x381   : > { %v905_v32 = vpop.permute.xlu0 %904 }
 0x382   : > { %v910_v12 = vadd.f32 %v905_v32, %v898_v41 }
 0x385   : > { %v907_v48 = vpop.permute.xlu1 %906  ;;  %v1680_v30 = vpop.permute.xlu0 %1679 }
 0x386   : > { %v3562_v35 = vmul.f32 %v1680_v30, %v3354_v28  ;;  %v1713_v37 = vmul.f32 %v1680_v30, %v3356_v29 }
 0x389   : > { %v1682_v38 = vpop.permute.xlu1 %1681  ;;  %v1720_v51 = vpop.permute.xlu0 %1719 }
 0x38a   : > { %v3566_v49 = vmul.f32 %v1682_v38, %v3370_v24  ;;  %v1714_v50 = vmul.f32 %v1682_v38, %v3375_v33  ;;  %v1725_v53 = vadd.f32 %v1720_v51, %v1713_v37  ;;  %v1678_v33 = vsel %vm646_vm0, %v1668_v14, %v1674_v39 }
 0x38b   : > { %v1688_v0 = vmul.f32 %v1678_v33, %v3419_v47  ;;  %v911_v14 = vadd.f32 %v907_v48, %v899_v13 }
 0x38d   : > { %v1722_v52 = vpop.permute.xlu1 %1721 }
 0x38e   : > { %v1726_v54 = vadd.f32 %v1722_v52, %v1714_v50 }
 0x390   : > { %v3033_v55 = vpack.i.bf16 %v1726_v54, %v1725_v53 }
 0x3d5   : > { %v2720_v56 = vpop.f32.mrb[2].mxu1 }
 0x3d6   : > { %v1470_v57 = vmul.f32 0.17677669, %v2720_v56  ;;  %v1460_v58 = vpop.f32.mrb[3].mxu1 }
 0x3d7   : > { %v1469_v60 = vmul.f32 0.17677669, %v1460_v58 }
 0x3d8   : > { %v1472_v61 = vadd.f32 %v1470_v57, %v3551_v16 }
 0x3d9   : > { %v1471_v62 = vadd.f32 %v1469_v60, %v3553_v18 }
 0x3da   : > { %v1476_v29 = vsel %vm646_vm0, %v1472_v61, -inf }
 0x3db   : > { %1477 = vmax.xlane.f32.xlu1 %v1476_v29  ;;  %v1473_v63 = vsel %vm646_vm0, %v1471_v62, -inf }
 0x3dc   : > { %1474 = vmax.xlane.f32.xlu0 %v1473_v63 }
 0x3ec   : > { %1693 = vrot.lane.b32.xlu1 %v1688_v0, %s3121_s27 }
 0x3f2   : > { %1691 = vrot.lane.b32.xlu0 %v1687_v2, %s3121_s27 }
 0x408   : > { %v778_v3 = vpop.xlane.xlu1 %777 }
 0x409   : > { %v780_v4 = vsub.f32 %v772_v21, %v778_v3  ;;  %v775_v5 = vpop.xlane.xlu0 %774 }
 0x40a   : > { %v779_v6 = vsub.f32 %v771_v25, %v775_v5 }
 0x40b   : > { %v783_v7 = vmul.f32 1.442695, %v780_v4 }
 0x40c   : > { %v781_v8 = vmul.f32 1.442695, %v779_v6 }
 0x40d   : > { %3052 = vpow2.f32 %v783_v7 }
 0x40e   : > { %3054 = vpow2.f32 %v781_v8 }
 0x417   : > { %v3053_v9 = vpop.eup %3052 }
 0x418   : > { %v3055_v10 = vpop.eup %3054  ;;  %v788_v47 = vsel %vm646_vm0, %v3053_v9, 0.0 }
 0x419   : > { %789 = vadd.xlane.f32.xlu1 %v788_v47  ;;  %v785_v11 = vsel %vm646_vm0, %v3055_v10, 0.0 }
 0x41a   : > { %786 = vadd.xlane.f32.xlu0 %v785_v11 }
 0x42a   : > { %942 = vrot.lane.b32.xlu1 %v910_v12, %s3121_s27 }
 0x42e   : > { %3029 = vrot.lane.b32.xlu1 %v3381_v36, %s3117_s16 }
 0x430   : > { %3024 = vrot.lane.b32.xlu0 %v3023_v46, %s3121_s27 }
 0x434   : > { %944 = vrot.lane.b32.xlu0 %v911_v14, %s3121_s27 }
 0x468   : > { %v1478_v39 = vpop.xlane.xlu1 %1477 }
 0x469   : > { %v1480_v15 = vsub.f32 %v1472_v61, %v1478_v39  ;;  %v1475_v23 = vpop.xlane.xlu0 %1474 }
 0x46a   : > { %v1479_v17 = vsub.f32 %v1471_v62, %v1475_v23 }
 0x46b   : > { %v1483_v20 = vmul.f32 1.442695, %v1480_v15 }
 0x46c   : > { %v1481_v21 = vmul.f32 1.442695, %v1479_v17  ;;  %v1694_v31 = vpop.permute.xlu1 %1693 }
 0x46d   : > { %3056 = vpow2.f32 %v1483_v20  ;;  %v1692_v22 = vpop.permute.xlu0 %1691  ;;  %v1698_v34 = vadd.f32 %v1694_v31, %v3566_v49 }
 0x46e   : > { %3058 = vpow2.f32 %v1481_v21  ;;  %v1697_v26 = vadd.f32 %v1692_v22, %v3562_v35 }
 0x477   : > { %v3057_v28 = vpop.eup %3056 }
 0x478   : > { %v3059_v19 = vpop.eup %3058  ;;  %v1488_v25 = vsel %vm646_vm0, %v3057_v28, 0.0 }
 0x479   : > { %1489 = vadd.xlane.f32.xlu1 %v1488_v25  ;;  %v1485_v24 = vsel %vm646_vm0, %v3059_v19, 0.0 }
 0x47a   : > { %1486 = vadd.xlane.f32.xlu0 %v1485_v24 }
 0x48a   : > { %1729 = vrot.lane.b32.xlu1 %v1697_v26, %s3120_s26 }
 0x490   : > { %3034 = vrot.lane.b32.xlu0 %v3033_v55, %s3120_s26 }
 0x494   : > { %1731 = vrot.lane.b32.xlu0 %v1698_v34, %s3120_s26 }
 0x4a6   : > { %v790_v40 = vpop.xlane.xlu1 %789 }
 0x4a7   : > { %3060 = vrcp.f32 %v790_v40  ;;  %v787_v42 = vpop.xlane.xlu0 %786 }
 0x4a8   : > { %3062 = vrcp.f32 %v787_v42 }
 0x4aa   : > { %v943_v43 = vpop.permute.xlu1 %942 }
 0x4ab   : > { %v3025_v44 = vpop.permute.xlu0 %3024 }
 0x4ac   : > { %v3027_v45 = vunpack.i.h.bf16 %v3025_v44  ;;  %v3026_v46 = vunpack.i.l.bf16 %v3025_v44 }
 0x4ae   : > { %v2838_v32 = vpack.c.bf16 %v3027_v45, %v3026_v46  ;;  %v3030_v48 = vpop.permute.xlu1 %3029 }
 0x4af   : > { %v3032_v30 = vunpack.i.h.bf16 %v3030_v48  ;;  %v3031_v35 = vunpack.i.l.bf16 %v3030_v48  ;;  %v945_v52 = vpop.permute.xlu0 %944 }
 0x4b0   : > { %2840 = vmatprep.subr.msk.bf16.mxu0 %vm3476_vm2, %v2838_v32 }
 0x4b1   : > { %v3061_v37 = vpop.eup %3060  ;;  %v2870_v38 = vpack.c.bf16 %v3032_v30, %v3031_v35  ;;  %v392_v35 = vld [vmem:[%s4021_s6 + $0x20] sm:$0xff] }
 0x4b2   : > { %v3063_v49 = vpop.eup %3062  ;;  %v794_v51 = vmul.f32 %v3061_v37, %v3053_v9  ;;  %v393_v37 = vld [vmem:[%s4021_s6 + $0x28] sm:$0xff] }
 0x4b3   : > { %2871 = vmatprep.subr.bf16.mxu1 %v2870_v38  ;;  %v793_v50 = vmul.f32 %v3063_v49, %v3055_v10 }
 0x4b4   : > { %2873 = vmatpush3.bf16.msra.mxu1 %v2870_v38 }
 0x4b5   : > { %2675 = vmatprep.mubr.msk.f32.mxu0 %vm646_vm0, %v793_v50 }
 0x4b6   : > { %2676 = vmatmul.mubr.msk.f32.vlgmr.msra.gmra.mrb[6].mxu0 %vm646_vm0, %v794_v51  ;;  %v2848_v51 = vpack.c.bf16 %v393_v37, %v392_v35  ;;  %v2051_v35 = vld [vmem:[%s4023_s8 + $0x40] sm:$0xff] }
 0x4b7   : > { %2843 = vmatpush3.bf16.xpose.msk.msra.mxu0 %vm3476_vm2, %v2838_v32  ;;  %2682 = vmatprep.mubr.msk.f32.mxu0 %vm681_vm1, %v943_v43  ;;  %v2055_v37 = vld [vmem:[%s4023_s8 + $0x60] sm:$0xff] }
 0x4be   : > { %2683 = vmatmul.mubr.msk.f32.vlgmr.msra.gmra.mrb[8].mxu0 %vm681_vm1, %v945_v52 }
 0x506   : > { %v1490_v53 = vpop.xlane.xlu1 %1489 }
 0x507   : > { %3064 = vrcp.f32 %v1490_v53  ;;  %v1487_v54 = vpop.xlane.xlu0 %1486  ;;  %v395_v53 = vld [vmem:[%s4021_s6 + $0x38] sm:$0xff] }
 0x508   : > { %3066 = vrcp.f32 %v1487_v54 }
 0x50a   : > { %v1730_v63 = vpop.permute.xlu1 %1729 }
 0x50b   : > { %v3035_v55 = vpop.permute.xlu0 %3034 }
 0x50c   : > { %v3037_v56 = vunpack.i.h.bf16 %v3035_v55  ;;  %v3036_v57 = vunpack.i.l.bf16 %v3035_v55 }
 0x50e   : > { %v2882_v58 = vpack.c.bf16 %v3037_v56, %v3036_v57 }
 0x50f   : > { %v1732_v33 = vpop.permute.xlu0 %1731 }
 0x510   : > { %2884 = vmatprep.subr.msk.bf16.mxu1 %vm3476_vm2, %v2882_v58 }
 0x511   : > { %v3065_v60 = vpop.eup %3064 }
 0x512   : > { %v3067_v61 = vpop.eup %3066  ;;  %v1494_v29 = vmul.f32 %v3065_v60, %v3057_v28  ;;  %v388_v60 = vld [vmem:[%s4021_s6] sm:$0xff] }
 0x513   : > { %v1493_v62 = vmul.f32 %v3067_v61, %v3059_v19  ;;  %v389_v61 = vld [vmem:[%s4021_s6 + $0x8] sm:$0xff] }
 0x515   : > { %2725 = vmatprep.mubr.msk.f32.mxu1 %vm646_vm0, %v1493_v62 }
 0x516   : > { %2726 = vmatmul.mubr.msk.f32.vlgmr.msra.gmra.mrb[4].mxu1 %vm646_vm0, %v1494_v29  ;;  %v2856_v29 = vpack.c.bf16 %v389_v61, %v388_v60  ;;  %v2061_v60 = vld [vmem:[%s4023_s8 + $0x90] sm:$0xff] }
 0x517   : > { %2887 = vmatpush3.bf16.xpose.msk.msra.mxu1 %vm3476_vm2, %v2882_v58  ;;  %2743 = vmatprep.mubr.msk.f32.mxu1 %vm681_vm1, %v1730_v63  ;;  %v2065_v61 = vld [vmem:[%s4023_s8 + $0xb0] sm:$0xff] }
 0x51e   : > { %2744 = vmatmul.mubr.msk.f32.vlgmr.msra.gmra.mrb[6].mxu1 %vm681_vm1, %v1732_v33 }
 0x589   : > { %v3611_v0 = vpop.f32.mrb[6].mxu0 }
 0x58a   : > { %v3613_v1 = vpop.f32.mrb[7].mxu0 }
 0x591   : > { %v2684_v2 = vpop.f32.mrb[8].mxu0 }
 0x592   : > { %v1036_v3 = vmul.f32 0.17677669, %v2684_v2  ;;  %v1026_v4 = vpop.f32.mrb[9].mxu0 }
 0x593   : > { %v1035_v5 = vmul.f32 0.17677669, %v1026_v4 }
 0x594   : > { %v1038_v6 = vadd.f32 %v1036_v3, %v3551_v16 }
 0x595   : > { %v1037_v7 = vadd.f32 %v1035_v5, %v3553_v18 }
 0x596   : > { %v1042_v27 = vsel %vm646_vm0, %v1038_v6, -inf }
 0x597   : > { %1043 = vmax.xlane.f32.xlu0 %v1042_v27  ;;  %v1039_v8 = vsel %vm646_vm0, %v1037_v7, -inf  ;;  %v390_v27 = vld [vmem:[%s4021_s6 + $0x10] sm:$0xff] }
 0x598   : > { %1040 = vmax.xlane.f32.xlu1 %v1039_v8  ;;  %v391_v8 = vld [vmem:[%s4021_s6 + $0x18] sm:$0xff] }
 0x5e9   : > { %v3619_v9 = vpop.f32.mrb[4].mxu1 }
 0x5ea   : > { %v3621_v10 = vpop.f32.mrb[5].mxu1 }
 0x5f1   : > { %v2745_v47 = vpop.f32.mrb[6].mxu1 }
 0x5f2   : > { %v1823_v11 = vmul.f32 0.17677669, %v2745_v47  ;;  %v1813_v41 = vpop.f32.mrb[7].mxu1 }
 0x5f3   : > { %v1822_v12 = vmul.f32 0.17677669, %v1813_v41  ;;  %v2860_v41 = vpack.c.bf16 %v391_v8, %v390_v27  ;;  %v2068_v27 = vld [vmem:[%s4023_s8 + $0xc8] sm:$0xff] }
 0x5f4   : > { %v1825_v13 = vadd.f32 %v1823_v11, %v3551_v16  ;;  %v2072_v8 = vld [vmem:[%s4023_s8 + $0xe8] sm:$0xff] }
 0x5f5   : > { %v1824_v14 = vadd.f32 %v1822_v12, %v3553_v18  ;;  %v396_v12 = vld [vmem:[%s4021_s6 + $0x40] sm:$0xff] }
 0x5f6   : > { %v1829_v39 = vsel %vm646_vm0, %v1825_v13, -inf }
 0x5f7   : > { %1830 = vmax.xlane.f32.xlu1 %v1829_v39  ;;  %v1826_v15 = vsel %vm646_vm0, %v1824_v14, -inf  ;;  %v398_v39 = vld [vmem:[%s4021_s6 + $0x50] sm:$0xff] }
 0x5f8   : > { %1827 = vmax.xlane.f32.xlu0 %v1826_v15  ;;  %v399_v15 = vld [vmem:[%s4021_s6 + $0x58] sm:$0xff] }
 0x624   : > { %v1044_v23 = vpop.xlane.xlu0 %1043 }
 0x625   : > { %v1046_v17 = vsub.f32 %v1038_v6, %v1044_v23  ;;  %v1041_v20 = vpop.xlane.xlu1 %1040  ;;  %v2878_v23 = vpack.c.bf16 %v399_v15, %v398_v39  ;;  %v2069_v15 = vld [vmem:[%s4023_s8 + $0xd0] sm:$0xff] }
 0x626   : > { %v1045_v21 = vsub.f32 %v1037_v7, %v1041_v20 }
 0x627   : > { %v1049_v28 = vmul.f32 1.442695, %v1046_v17  ;;  %v400_v17 = vld [vmem:[%s4021_s6 + $0x60] sm:$0xff] }
 0x628   : > { %v1047_v19 = vmul.f32 1.442695, %v1045_v21  ;;  %v402_v21 = vld [vmem:[%s4021_s6 + $0x70] sm:$0xff] }
 0x629   : > { %3068 = vpow2.f32 %v1049_v28  ;;  %v403_v28 = vld [vmem:[%s4021_s6 + $0x78] sm:$0xff] }
 0x62a   : > { %3070 = vpow2.f32 %v1047_v19  ;;  %v2896_v19 = vpack.c.bf16 %v403_v28, %v402_v21  ;;  %v2078_v21 = vld [vmem:[%s4023_s8 + $0x118] sm:$0xff] }
 0x633   : > { %v3069_v25 = vpop.eup %3068 }
 0x634   : > { %v3071_v24 = vpop.eup %3070  ;;  %v1054_v16 = vsel %vm646_vm0, %v3069_v25, 0.0 }
 0x635   : > { %1055 = vadd.xlane.f32.xlu1 %v1054_v16  ;;  %v1051_v18 = vsel %vm646_vm0, %v3071_v24, 0.0 }
 0x636   : > { %1052 = vadd.xlane.f32.xlu0 %v1051_v18  ;;  %v2050_v18 = vld [vmem:[%s4023_s8 + $0x38] sm:$0xff] }
 0x64c   : > { %3039 = vrot.lane.b32.xlu0 %v3381_v36, %s3121_s27 }
 0x684   : > { %v1831_v22 = vpop.xlane.xlu1 %1830 }
 0x685   : > { %v1833_v26 = vsub.f32 %v1825_v13, %v1831_v22  ;;  %v1828_v31 = vpop.xlane.xlu0 %1827  ;;  %v397_v13 = vld [vmem:[%s4021_s6 + $0x48] sm:$0xff]  ;;  %v2043_v22 = vld [vmem:[%s4023_s8] sm:$0xff] }
 0x686   : > { %v1832_v34 = vsub.f32 %v1824_v14, %v1828_v31  ;;  %v2874_v14 = vpack.c.bf16 %v397_v13, %v396_v12  ;;  %v2067_v12 = vld [vmem:[%s4023_s8 + $0xc0] sm:$0xff] }
 0x687   : > { %v1836_v40 = vmul.f32 1.442695, %v1833_v26  ;;  %v2047_v26 = vld [vmem:[%s4023_s8 + $0x20] sm:$0xff] }
 0x688   : > { %v1834_v42 = vmul.f32 1.442695, %v1832_v34  ;;  %v2902_v34 = vpack.c.bf16 %v2047_v26, %v2043_v22  ;;  %v2071_v13 = vld [vmem:[%s4023_s8 + $0xe0] sm:$0xff]  ;;  %v2084_v22 = vld [vmem:[%s4023_s8 + $0x148] sm:$0xff] }
 0x689   : > { %3072 = vpow2.f32 %v1836_v40  ;;  %v2045_v40 = vld [vmem:[%s4023_s8 + $0x10] sm:$0xff]  ;;  %v2914_v39 = vpack.c.bf16 %v2071_v13, %v2067_v12  ;;  %v2088_v26 = vld [vmem:[%s4023_s8 + $0x168] sm:$0xff] }
 0x68a   : > { %3074 = vpow2.f32 %v1834_v42  ;;  %v2049_v42 = vld [vmem:[%s4023_s8 + $0x30] sm:$0xff] }
 0x693   : > { %v3073_v43 = vpop.eup %3072 }
 0x694   : > { %v1841_v44 = vsel %vm646_vm0, %v3073_v43, 0.0  ;;  %v3075_v45 = vpop.eup %3074 }
 0x695   : > { %1842 = vadd.xlane.f32.xlu1 %v1841_v44  ;;  %v1838_v46 = vsel %vm646_vm0, %v3075_v45, 0.0  ;;  %v2934_v44 = vpack.c.bf16 %v2049_v42, %v2045_v40  ;;  %v2090_v40 = vld [vmem:[%s4023_s8 + $0x178] sm:$0xff]  ;;  %v2083_v42 = vld [vmem:[%s4023_s8 + $0x140] sm:$0xff] }
 0x699   : > { %1839 = vadd.xlane.f32.xlu1 %v1838_v46  ;;  %v2054_v46 = vld [vmem:[%s4023_s8 + $0x58] sm:$0xff] }
 0x6aa   : > { %3044 = vrot.lane.b32.xlu1 %v3381_v36, %s3120_s26  ;;  %v394_v36 = vld [vmem:[%s4021_s6 + $0x30] sm:$0xff] }
 0x6ab   : > { %v2852_v57 = vpack.c.bf16 %v395_v53, %v394_v36 }
 0x6c2   : > { %v1056_v32 = vpop.xlane.xlu1 %1055 }
 0x6c3   : > { %3076 = vrcp.f32 %v1056_v32  ;;  %v1053_v48 = vpop.xlane.xlu0 %1052  ;;  %v2058_v32 = vld [vmem:[%s4023_s8 + $0x78] sm:$0xff] }
 0x6c4   : > { %3078 = vrcp.f32 %v1053_v48 }
 0x6c7   : > { %v3040_v30 = vpop.permute.xlu0 %3039 }
 0x6c8   : > { %v3042_v38 = vunpack.i.h.bf16 %v3040_v30  ;;  %v3041_v49 = vunpack.i.l.bf16 %v3040_v30  ;;  %v2936_v30 = vpack.c.bf16 %v2058_v32, %v2054_v46  ;;  %v2085_v46 = vld [vmem:[%s4023_s8 + $0x150] sm:$0xff] }
 0x6c9   : > { %v2089_v32 = vld [vmem:[%s4023_s8 + $0x170] sm:$0xff] }
 0x6ca   : > { %v2844_v50 = vpack.c.bf16 %v3042_v38, %v3041_v49  ;;  %v2053_v38 = vld [vmem:[%s4023_s8 + $0x50] sm:$0xff]  ;;  %v2906_v49 = vpack.c.bf16 %v2055_v37, %v2051_v35  ;;  %v2096_v35 = vld [vmem:[%s4023_s8 + $0x1a8] sm:$0xff]  ;;  %v2094_v37 = vld [vmem:[%s4023_s8 + $0x198] sm:$0xff] }
 0x6cc   : > { %2845 = vmatprep.subr.bf16.mxu0 %v2844_v50 }
 0x6cd   : > { %v3077_v52 = vpop.eup %3076  ;;  %2847 = vmatpush3.bf16.msra.mxu0 %v2844_v50  ;;  %v2057_v50 = vld [vmem:[%s4023_s8 + $0x70] sm:$0xff] }
 0x6ce   : > { %v3079_v54 = vpop.eup %3078  ;;  %2849 = vmatprep.subr.bf16.mxu0 %v2848_v51  ;;  %v1060_v56 = vmul.f32 %v3077_v52, %v3069_v25  ;;  %v2044_v25 = vld [vmem:[%s4023_s8 + $0x8] sm:$0xff]  ;;  %v2938_v36 = vpack.c.bf16 %v2057_v50, %v2053_v38  ;;  %v2098_v38 = vld [vmem:[%s4023_s8 + $0x1b8] sm:$0xff] }
 0x6cf   : > { %v1059_v55 = vmul.f32 %v3079_v54, %v3071_v24  ;;  %v2048_v24 = vld [vmem:[%s4023_s8 + $0x28] sm:$0xff]  ;;  %v2062_v54 = vld [vmem:[%s4023_s8 + $0x98] sm:$0xff]  ;;  %v2956_v50 = vpack.c.bf16 %v2098_v38, %v2094_v37  ;;  %v2297_v37 = vld [vmem:[%s4024_s9 + $0x40] sm:$0xff] }
 0x6d0   : > { %v2900_v16 = vpack.c.bf16 %v2048_v24, %v2044_v25  ;;  %v2064_v52 = vld [vmem:[%s4023_s8 + $0xa8] sm:$0xff] }
 0x6d1   : > { %2689 = vmatprep.mubr.msk.f32.mxu0 %vm646_vm0, %v1059_v55  ;;  %v2066_v55 = vld [vmem:[%s4023_s8 + $0xb8] sm:$0xff]  ;;  %v2298_v38 = vld [vmem:[%s4024_s9 + $0x48] sm:$0xff] }
 0x6d2   : > { %2690 = vmatmul.mubr.msk.f32.vlgmr.msra.gmra.mrb[10].mxu0 %vm646_vm0, %v1060_v56  ;;  %v2059_v56 = vld [vmem:[%s4023_s8 + $0x80] sm:$0xff] }
 0x6d3   : > { %2851 = vmatpush3.bf16.msra.mxu0 %v2848_v51  ;;  %v2060_v51 = vld [vmem:[%s4023_s8 + $0x88] sm:$0xff] }
 0x6d4   : > { %2853 = vmatprep.subr.bf16.mxu0 %v2852_v57  ;;  %v2908_v53 = vpack.c.bf16 %v2064_v52, %v2060_v51  ;;  %v2091_v51 = vld [vmem:[%s4023_s8 + $0x180] sm:$0xff] }
 0x6d5   : > { %v2095_v52 = vld [vmem:[%s4023_s8 + $0x1a0] sm:$0xff] }
 0x6d7   : > { %2855 = vmatpush3.bf16.msra.mxu0 %v2852_v57  ;;  %v2940_v57 = vpack.c.bf16 %v2066_v55, %v2062_v54  ;;  %v2097_v54 = vld [vmem:[%s4023_s8 + $0x1b0] sm:$0xff]  ;;  %v2100_v55 = vld [vmem:[%s4023_s8 + $0x1c8] sm:$0xff] }
 0x6d8   : > { %2857 = vmatprep.subr.bf16.mxu0 %v2856_v29 }
 0x722   : > { %v1843_v58 = vpop.xlane.xlu1 %1842 }
 0x723   : > { %3080 = vrcp.f32 %v1843_v58  ;;  %v2063_v58 = vld [vmem:[%s4023_s8 + $0xa0] sm:$0xff] }
 0x726   : > { %v1840_v62 = vpop.xlane.xlu1 %1839 }
 0x727   : > { %3082 = vrcp.f32 %v1840_v62  ;;  %v2910_v62 = vpack.c.bf16 %v2063_v58, %v2059_v56  ;;  %v2104_v56 = vld [vmem:[%s4023_s8 + $0x1e8] sm:$0xff] }
 0x728   : > { %v2928_v58 = vpack.c.bf16 %v2104_v56, %v2100_v55  ;;  %v2317_v55 = vld [vmem:[%s4024_s9 + $0xe0] sm:$0xff]  ;;  %v2318_v56 = vld [vmem:[%s4024_s9 + $0xe8] sm:$0xff] }
 0x72a   : > { %v3045_v63 = vpop.permute.xlu1 %3044 }
 0x72b   : > { %v3047_v33 = vunpack.i.h.bf16 %v3045_v63  ;;  %v3046_v2 = vunpack.i.l.bf16 %v3045_v63 }
 0x72d   : > { %v2888_v3 = vpack.c.bf16 %v3047_v33, %v3046_v2  ;;  %v3081_v4 = vpop.eup %3080  ;;  %v3104_v33 = vld [vmem:[%s3233_s28 + $0x8] sm:$0xff] }
 0x72e   : > { %v1847_v7 = vmul.f32 %v3081_v4, %v3073_v43  ;;  %v2052_v43 = vld [vmem:[%s4023_s8 + $0x48] sm:$0xff]  ;;  %v3105_v4 = vld [vmem:[%s3233_s28] sm:$0xff] }
 0x72f   : > { %2889 = vmatprep.subr.bf16.mxu1 %v2888_v3 }
 0x730   : > { %2891 = vmatpush3.bf16.msra.mxu1 %v2888_v3 }
 0x731   : > { %v3083_v5 = vpop.eup %3082  ;;  %2901 = vmatprep.subr.bf16.mxu1 %v2900_v16  ;;  %v2081_v16 = vld [vmem:[%s4023_s8 + $0x130] sm:$0xff] }
 0x732   : > { %v1846_v6 = vmul.f32 %v3083_v5, %v3075_v45  ;;  %v2056_v45 = vld [vmem:[%s4023_s8 + $0x68] sm:$0xff] }
 0x733   : > { %v2904_v48 = vpack.c.bf16 %v2056_v45, %v2052_v43  ;;  %v2087_v43 = vld [vmem:[%s4023_s8 + $0x160] sm:$0xff] }
 0x734   : > { %2750 = vmatprep.mubr.msk.f32.mxu1 %vm646_vm0, %v1846_v6  ;;  %v2922_v45 = vpack.c.bf16 %v2087_v43, %v2083_v42  ;;  %v2311_v42 = vld [vmem:[%s4024_s9 + $0xb0] sm:$0xff]  ;;  %v2312_v43 = vld [vmem:[%s4024_s9 + $0xb8] sm:$0xff] }
 0x735   : > { %2751 = vmatmul.mubr.msk.f32.vlgmr.msra.gmra.mrb[8].mxu1 %vm646_vm0, %v1847_v7 }
 0x736   : > { %2171 = vmatprep.mubr.f32.mxu1 %v3114_v59  ;;  %2903 = vmatpush1.bf16.msra.mxu1 %v2902_v34  ;;  %v2920_v34 = vpack.c.bf16 %v2088_v26, %v2084_v22  ;;  %v2310_v22 = vld [vmem:[%s4024_s9 + $0xa8] sm:$0xff] }
 0x737   : > { %2905 = vmatprep.subr.bf16.mxu1 %v2904_v48  ;;  %v2092_v48 = vld [vmem:[%s4023_s8 + $0x188] sm:$0xff] }
 0x73a   : > { %2907 = vmatpush1.bf16.msra.mxu1 %v2906_v49  ;;  %v2924_v49 = vpack.c.bf16 %v2096_v35, %v2092_v48  ;;  %v2313_v48 = vld [vmem:[%s4024_s9 + $0xc0] sm:$0xff] }
 0x73b   : > { %2909 = vmatprep.subr.bf16.mxu1 %v2908_v53  ;;  %v2926_v53 = vpack.c.bf16 %v2095_v52, %v2091_v51  ;;  %v2316_v51 = vld [vmem:[%s4024_s9 + $0xd8] sm:$0xff] }
 0x73e   : > { %2911 = vmatpush1.bf16.msra.mxu1 %v2910_v62  ;;  %v2099_v62 = vld [vmem:[%s4023_s8 + $0x1c0] sm:$0xff] }
 0x7a5   : > { %v2691_v47 = vpop.f32.mrb[10].mxu0 }
 0x7a6   : > { %v1141_v11 = vpop.f32.mrb[11].mxu0 }
 0x7a7   : > { %2700 = vmatprep.mubr.msk.f32.mxu0 %vm681_vm1, %v1141_v11  ;;  %v2912_v11 = vpack.c.bf16 %v2072_v8, %v2068_v27 }
 0x7a8   : > { %2701 = vmatmul.mubr.msk.f32.vlgmr.msra.gmra.mrb[12].mxu0 %vm681_vm1, %v2691_v47  ;;  %v2070_v47 = vld [vmem:[%s4023_s8 + $0xd8] sm:$0xff] }
 0x7a9   : > { %2859 = vmatpush3.bf16.msra.mxu0 %v2856_v29  ;;  %2711 = vmatprep.mubr.msk.f32.mxu0 %vm681_vm1, %v3613_v1  ;;  %v401_v1 = vld [vmem:[%s4021_s6 + $0x68] sm:$0xff]  ;;  %v2942_v29 = vpack.c.bf16 %v2065_v61, %v2061_v60  ;;  %v2102_v60 = vld [vmem:[%s4023_s8 + $0x1d8] sm:$0xff] }
 0x7aa   : > { %2861 = vmatprep.subr.bf16.mxu0 %v2860_v41  ;;  %v2892_v20 = vpack.c.bf16 %v401_v1, %v400_v17  ;;  %2913 = vmatprep.subr.bf16.mxu1 %v2912_v11  ;;  %v2076_v1 = vld [vmem:[%s4023_s8 + $0x108] sm:$0xff]  ;;  %v2106_v61 = vld [vmem:[%s4023_s8 + $0x1f8] sm:$0xff] }
 0x7ab   : > { %2915 = vmatpush1.bf16.msra.mxu1 %v2914_v39 }
 0x7ad   : > { %2863 = vmatpush3.bf16.msra.mxu0 %v2860_v41  ;;  %v2074_v41 = vld [vmem:[%s4023_s8 + $0xf8] sm:$0xff] }
 0x7ae   : > { %2875 = vmatprep.subr.bf16.mxu0 %v2874_v14 }
 0x7b0   : > { %2712 = vmatmul.mubr.msk.f32.vlgmr.msra.gmra.mrb[12].mxu0 %vm681_vm1, %v3611_v0 }
 0x7b1   : > { %2877 = vmatpush3.bf16.msra.mxu0 %v2874_v14  ;;  %2736 = vmatprep.mubr.msk.f32.mxu0 %vm681_vm1, %v3621_v10  ;;  %v2944_v14 = vpack.c.bf16 %v2074_v41, %v2070_v47 }
 0x7b2   : > { %2879 = vmatprep.subr.bf16.mxu0 %v2878_v23 }
 0x7b5   : > { %2881 = vmatpush3.bf16.msra.mxu0 %v2878_v23  ;;  %v2073_v23 = vld [vmem:[%s4023_s8 + $0xf0] sm:$0xff] }
 0x7b6   : > { %2893 = vmatprep.subr.bf16.mxu0 %v2892_v20  ;;  %v2946_v17 = vpack.c.bf16 %v2073_v23, %v2069_v15 }
 0x7b8   : > { %2737 = vmatmul.mubr.msk.f32.vlgmr.msra.gmra.mrb[12].mxu0 %vm681_vm1, %v3619_v9  ;;  %v2046_v9 = vld [vmem:[%s4023_s8 + $0x18] sm:$0xff] }
 0x7b9   : > { %2895 = vmatpush3.bf16.msra.mxu0 %v2892_v20  ;;  %v2932_v31 = vpack.c.bf16 %v2050_v18, %v2046_v9  ;;  %v2080_v20 = vld [vmem:[%s4023_s8 + $0x128] sm:$0xff]  ;;  %v2077_v9 = vld [vmem:[%s4023_s8 + $0x110] sm:$0xff] }
 0x7ba   : > { %2897 = vmatprep.subr.bf16.mxu0 %v2896_v19  ;;  %v2916_v28 = vpack.c.bf16 %v2080_v20, %v2076_v1  ;;  %v2950_v18 = vpack.c.bf16 %v2081_v16, %v2077_v9  ;;  %v2305_v1 = vld [vmem:[%s4024_s9 + $0x80] sm:$0xff]  ;;  %v2306_v20 = vld [vmem:[%s4024_s9 + $0x88] sm:$0xff]  ;;  %v2292_v9 = vld [vmem:[%s4024_s9 + $0x18] sm:$0xff] }
 0x7bc   : > { %2917 = vmatprep.subr.bf16.mxu1 %v2916_v28  ;;  %v2289_v28 = vld [vmem:[%s4024_s9] sm:$0xff] }
 0x7bd   : > { %2899 = vmatpush3.bf16.msra.mxu0 %v2896_v19  ;;  %v2082_v19 = vld [vmem:[%s4023_s8 + $0x138] sm:$0xff] }
 0x7be   : > { %2933 = vmatprep.subr.bf16.mxu0 %v2932_v31  ;;  %v2948_v25 = vpack.c.bf16 %v2082_v19, %v2078_v21  ;;  %v2086_v31 = vld [vmem:[%s4023_s8 + $0x158] sm:$0xff]  ;;  %v2964_v21 = vpack.c.bf16 %v2306_v20, %v2305_v1 }
 0x808   : > { %v2752_v0 = vpop.f32.mrb[8].mxu1 }
 0x809   : > { %v1926_v10 = vpop.f32.mrb[9].mxu1 }
 0x80a   : > { %2761 = vmatprep.mubr.msk.f32.mxu0 %vm681_vm1, %v1926_v10  ;;  %v2079_v10 = vld [vmem:[%s4023_s8 + $0x120] sm:$0xff] }
 0x80b   : > { %2762 = vmatmul.mubr.msk.f32.vlgmr.msra.gmra.mrb[12].mxu0 %vm681_vm1, %v2752_v0  ;;  %v2075_v0 = vld [vmem:[%s4023_s8 + $0x100] sm:$0xff] }
 0x80c   : > { %2248 = vmatprep.mubr.f32.mxu0 %v3114_v59  ;;  %2935 = vmatpush1.bf16.msra.mxu0 %v2934_v44  ;;  %v2918_v24 = vpack.c.bf16 %v2079_v10, %v2075_v0  ;;  %v2952_v44 = vpack.c.bf16 %v2090_v40, %v2086_v31  ;;  %v2307_v0 = vld [vmem:[%s4024_s9 + $0x90] sm:$0xff]  ;;  %v2308_v10 = vld [vmem:[%s4024_s9 + $0x98] sm:$0xff]  ;;  %v2293_v31 = vld [vmem:[%s4024_s9 + $0x20] sm:$0xff] }
 0x80d   : > { %2937 = vmatprep.subr.bf16.mxu0 %v2936_v30  ;;  %v2954_v30 = vpack.c.bf16 %v2089_v32, %v2085_v46  ;;  %v2296_v46 = vld [vmem:[%s4024_s9 + $0x38] sm:$0xff] }
 0x80e   : > { %2919 = vmatpush1.bf16.msra.mxu1 %v2918_v24  ;;  %v2291_v24 = vld [vmem:[%s4024_s9 + $0x10] sm:$0xff] }
 0x80f   : > { %2921 = vmatprep.subr.bf16.mxu1 %v2920_v34  ;;  %v2970_v16 = vpack.c.bf16 %v2292_v9, %v2291_v24  ;;  %v2294_v34 = vld [vmem:[%s4024_s9 + $0x28] sm:$0xff] }
 0x810   : > { %2939 = vmatpush1.bf16.msra.mxu0 %v2938_v36  ;;  %v2093_v36 = vld [vmem:[%s4023_s8 + $0x190] sm:$0xff]  ;;  %v2974_v40 = vpack.c.bf16 %v2294_v34, %v2293_v31 }
 0x811   : > { %2941 = vmatprep.subr.bf16.mxu0 %v2940_v57  ;;  %v2958_v57 = vpack.c.bf16 %v2097_v54, %v2093_v36  ;;  %v2299_v36 = vld [vmem:[%s4024_s9 + $0x50] sm:$0xff] }
 0x812   : > { %2923 = vmatpush1.bf16.msra.mxu1 %v2922_v45  ;;  %v2295_v45 = vld [vmem:[%s4024_s9 + $0x30] sm:$0xff] }
 0x813   : > { %2925 = vmatprep.subr.bf16.mxu1 %v2924_v49  ;;  %v2978_v32 = vpack.c.bf16 %v2296_v46, %v2295_v45  ;;  %v2982_v49 = vpack.c.bf16 %v2298_v38, %v2297_v37 }
 0x814   : > { %2943 = vmatpush1.bf16.msra.mxu0 %v2942_v29  ;;  %v2960_v29 = vpack.c.bf16 %v2106_v61, %v2102_v60  ;;  %v2302_v60 = vld [vmem:[%s4024_s9 + $0x68] sm:$0xff] }
 0x815   : > { %2945 = vmatprep.subr.bf16.mxu0 %v2944_v14  ;;  %v2511_v14 = vld [vmem:[%s4022_s7] ss:$0 sm:$0xff] }
 0x816   : > { %2927 = vmatpush1.bf16.msra.mxu1 %v2926_v53  ;;  %v2300_v53 = vld [vmem:[%s4024_s9 + $0x58] sm:$0xff] }
 0x817   : > { %2929 = vmatprep.subr.bf16.mxu1 %v2928_v58  ;;  %v2986_v54 = vpack.c.bf16 %v2300_v53, %v2299_v36  ;;  %v2301_v58 = vld [vmem:[%s4024_s9 + $0x60] sm:$0xff] }
 0x818   : > { %2947 = vmatpush1.bf16.msra.mxu0 %v2946_v17  ;;  %v2990_v61 = vpack.c.bf16 %v2302_v60, %v2301_v58 }
 0x819   : > { %2949 = vmatprep.subr.bf16.mxu0 %v2948_v25  ;;  %v2968_v25 = vpack.c.bf16 %v2308_v10, %v2307_v0 }
 0x81c   : > { %2951 = vmatpush1.bf16.msra.mxu0 %v2950_v18  ;;  %v2309_v18 = vld [vmem:[%s4024_s9 + $0xa0] sm:$0xff] }
 0x81d   : > { %2953 = vmatprep.subr.bf16.mxu0 %v2952_v44  ;;  %v2972_v26 = vpack.c.bf16 %v2310_v22, %v2309_v18  ;;  %v2976_v44 = vpack.c.bf16 %v2312_v43, %v2311_v42 }
 0x820   : > { %2955 = vmatpush1.bf16.msra.mxu0 %v2954_v30  ;;  %v2314_v30 = vld [vmem:[%s4024_s9 + $0xc8] sm:$0xff] }
 0x821   : > { %2957 = vmatprep.subr.bf16.mxu0 %v2956_v50  ;;  %v2980_v35 = vpack.c.bf16 %v2314_v30, %v2313_v48  ;;  %v2315_v50 = vld [vmem:[%s4024_s9 + $0xd0] sm:$0xff] }
 0x822   : > { %v2984_v52 = vpack.c.bf16 %v2316_v51, %v2315_v50 }
 0x824   : > { %2959 = vmatpush1.bf16.msra.mxu0 %v2958_v57  ;;  %v2988_v57 = vpack.c.bf16 %v2318_v56, %v2317_v55 }
 0x825   : > { %2961 = vmatprep.subr.bf16.mxu0 %v2960_v29  ;;  %v2320_v29 = vld [vmem:[%s4024_s9 + $0xf8] sm:$0xff] }
 0x8de   : > { %v2763_v63 = vpop.f32.mrb[12].mxu0 }
 0x8df   : > { %v3774_v2 = vadd.f32 %v3104_v33, %v2763_v63  ;;  %v2007_v3 = vpop.f32.mrb[13].mxu0  ;;  %v2103_v63 = vld [vmem:[%s4023_s8 + $0x1e0] sm:$0xff]  ;;  %v2101_v33 = vld [vmem:[%s4023_s8 + $0x1d0] sm:$0xff] }
 0x8e0   : > { %v3777_v5 = vadd.f32 %v3105_v4, %v2007_v3  ;;  %v2105_v3 = vld [vmem:[%s4023_s8 + $0x1f0] sm:$0xff]  ;;  %v2930_v4 = vpack.c.bf16 %v2103_v63, %v2099_v62 }
 0x8e1   : > { %v2022_v6 = vmul.f32 %v3774_v2, %v3774_v2  ;;  %v2319_v62 = vld [vmem:[%s4024_s9 + $0xf0] sm:$0xff] }
 0x8e2   : > { %v2021_v7 = vmul.f32 %v3777_v5, %v3777_v5  ;;  %2931 = vmatpush1.bf16.msra.mxu1 %v2930_v4  ;;  %v2992_v63 = vpack.c.bf16 %v2320_v29, %v2319_v62 }
 0x8e3   : > { %2025 = vadd.xlane.f32.xlu1 %v2022_v6  ;;  %v2962_v6 = vpack.c.bf16 %v2105_v3, %v2101_v33  ;;  %2965 = vmatprep.subr.bf16.mxu1 %v2964_v21  ;;  %v2303_v33 = vld [vmem:[%s4024_s9 + $0x70] sm:$0xff]  ;;  %v2304_v3 = vld [vmem:[%s4024_s9 + $0x78] sm:$0xff] }
 0x8e4   : > { %2023 = vadd.xlane.f32.xlu0 %v2021_v7  ;;  %v2994_v4 = vpack.c.bf16 %v2304_v3, %v2303_v33 }
 0x8e5   : > { %2963 = vmatpush1.bf16.msra.mxu0 %v2962_v6 }
 0x970   : > { %v2026_v7 = vpop.xlane.xlu1 %2025 }
 0x971   : > { %v2028_v27 = vmul.f32 0.0078125, %v2026_v7  ;;  %v2024_v8 = vpop.xlane.xlu0 %2023 }
 0x972   : > { %v2027_v47 = vmul.f32 0.0078125, %v2024_v8 }
 0x973   : > { %v2030_v11 = vadd.f32 1e-06, %v2028_v27 }
 0x974   : > { %v2029_v41 = vadd.f32 1e-06, %v2027_v47 }
 0x975   : > { %3084 = vrsqrt.f32 %v2030_v11 }
 0x976   : > { %3086 = vrsqrt.f32 %v2029_v41 }
 0x97f   : > { %v3085_v12 = vpop.eup %3084 }
 0x980   : > { %v3087_v13 = vpop.eup %3086  ;;  %v2034_v23 = vmul.f32 %v3085_v12, %v3774_v2 }
 0x981   : > { %v2033_v39 = vmul.f32 %v3087_v13, %v3777_v5 }
 0x982   : > { %v2042_v17 = vmul.f32 %v2511_v14, %v2034_v23 }
 0x983   : > { %v2041_v15 = vmul.f32 %v2511_v14, %v2033_v39 }
 0x985   : > { %2172 = vmatmul.mubr.f32.vlgmr.msra.gmra.mrb[10].mxu1 %v2041_v15  ;;  %2249 = vmatmul.mubr.f32.vlgmr.msra.gmra.mrb[14].mxu0 %v2041_v15 }
 0x986   : > { %2177 = vmatprep.mubr.f32.mxu1 %v3114_v59  ;;  %2254 = vmatprep.mubr.f32.mxu0 %v3114_v59  ;;  %v2290_v59 = vld [vmem:[%s4024_s9 + $0x8] sm:$0xff] }
 0x987   : > { %v2966_v19 = vpack.c.bf16 %v2290_v59, %v2289_v28 }
 0x989   : > { %2178 = vmatmul.mubr.f32.gmra.mrb[12].mxu1 %v2042_v17  ;;  %2255 = vmatmul.mubr.f32.gmra.mrb[16].mxu0 %v2042_v17 }
 0x98a   : > { %2967 = vmatpush3.bf16.msra.mxu1 %v2966_v19 }
 0x98b   : > { %2969 = vmatprep.subr.bf16.mxu1 %v2968_v25 }
 0x98e   : > { %2971 = vmatpush3.bf16.msra.mxu1 %v2970_v16 }
 0x98f   : > { %2973 = vmatprep.subr.bf16.mxu1 %v2972_v26 }
 0x992   : > { %2975 = vmatpush3.bf16.msra.mxu1 %v2974_v40 }
 0x993   : > { %2977 = vmatprep.subr.bf16.mxu1 %v2976_v44 }
 0x996   : > { %2979 = vmatpush3.bf16.msra.mxu1 %v2978_v32 }
 0x997   : > { %2981 = vmatprep.subr.bf16.mxu1 %v2980_v35 }
 0x99a   : > { %2983 = vmatpush3.bf16.msra.mxu1 %v2982_v49 }
 0x99b   : > { %2985 = vmatprep.subr.bf16.mxu1 %v2984_v52 }
 0x99e   : > { %2987 = vmatpush3.bf16.msra.mxu1 %v2986_v54 }
 0x99f   : > { %2989 = vmatprep.subr.bf16.mxu1 %v2988_v57 }
 0x9a2   : > { %2991 = vmatpush3.bf16.msra.mxu1 %v2990_v61 }
 0x9a3   : > { %2993 = vmatprep.subr.bf16.mxu1 %v2992_v63 }
 0x9a6   : > { %2995 = vmatpush3.bf16.msra.mxu1 %v2994_v4 }
 0xa58   : > { %v2173_v6 = vpop.f32.mrb[10].mxu1  ;;  %v2250_v7 = vpop.f32.mrb[14].mxu0 }
 0xa59   : > { %v2261_v27 = vsub.f32 0.0, %v2173_v6  ;;  %v2175_v8 = vpop.f32.mrb[11].mxu1  ;;  %v2252_v47 = vpop.f32.mrb[15].mxu0 }
 0xa5a   : > { %v2262_v11 = vsub.f32 0.0, %v2175_v8 }
 0xa5b   : > { %v2265_v41 = vmul.f32 1.442695, %v2261_v27 }
 0xa5c   : > { %v2267_v12 = vmul.f32 1.442695, %v2262_v11  ;;  %v2179_v13 = vpop.f32.mrb[12].mxu1  ;;  %v2256_v14 = vpop.f32.mrb[16].mxu0 }
 0xa5d   : > { %3088 = vpow2.f32 %v2265_v41  ;;  %v2263_v39 = vsub.f32 0.0, %v2179_v13  ;;  %v2181_v15 = vpop.f32.mrb[13].mxu1  ;;  %v2258_v23 = vpop.f32.mrb[17].mxu0 }
 0xa5e   : > { %3090 = vpow2.f32 %v2267_v12  ;;  %v2264_v17 = vsub.f32 0.0, %v2181_v15 }
 0xa5f   : > { %v2269_v1 = vmul.f32 1.442695, %v2263_v39 }
 0xa60   : > { %v2271_v20 = vmul.f32 1.442695, %v2264_v17 }
 0xa61   : > { %3092 = vpow2.f32 %v2269_v1 }
 0xa62   : > { %3094 = vpow2.f32 %v2271_v20 }
 0xa67   : > { %v3089_v21 = vpop.eup %3088 }
 0xa68   : > { %v3091_v28 = vpop.eup %3090  ;;  %v2273_v59 = vadd.f32 1.0, %v3089_v21 }
 0xa69   : > { %v2274_v19 = vadd.f32 1.0, %v3091_v28 }
 0xa6a   : > { %3096 = vrcp.f32 %v2273_v59 }
 0xa6b   : > { %v3093_v0 = vpop.eup %3092  ;;  %3098 = vrcp.f32 %v2274_v19 }
 0xa6c   : > { %v3095_v10 = vpop.eup %3094  ;;  %v2275_v25 = vadd.f32 1.0, %v3093_v0 }
 0xa6d   : > { %v2276_v24 = vadd.f32 1.0, %v3095_v10 }
 0xa6e   : > { %3100 = vrcp.f32 %v2275_v25 }
 0xa6f   : > { %3102 = vrcp.f32 %v2276_v24 }
 0xa74   : > { %v3097_v9 = vpop.eup %3096 }
 0xa75   : > { %v3099_v16 = vpop.eup %3098  ;;  %v2281_v18 = vmul.f32 %v3097_v9, %v2173_v6 }
 0xa76   : > { %v2282_v22 = vmul.f32 %v3099_v16, %v2175_v8 }
 0xa77   : > { %v2285_v26 = vmul.f32 %v2281_v18, %v2250_v7 }
 0xa78   : > { %v3101_v31 = vpop.eup %3100  ;;  %v2286_v34 = vmul.f32 %v2282_v22, %v2252_v47 }
 0xa79   : > { %v3103_v40 = vpop.eup %3102  ;;  %v2283_v42 = vmul.f32 %v3101_v31, %v2179_v13 }
 0xa7a   : > { %v2284_v43 = vmul.f32 %v3103_v40, %v2181_v15  ;;  %2385 = vmatprep.mubr.f32.mxu1 %v2286_v34 }
 0xa7b   : > { %v2287_v44 = vmul.f32 %v2283_v42, %v2256_v14  ;;  %2386 = vmatmul.mubr.f32.vlgmr.msra.gmra.mrb[14].mxu1 %v2285_v26 }
 0xa7c   : > { %v2288_v45 = vmul.f32 %v2284_v43, %v2258_v23 }
 0xa7e   : > { %2390 = vmatprep.mubr.f32.mxu1 %v2288_v45 }
 0xa7f   : > { %2391 = vmatmul.mubr.f32.gmra.mrb[16].mxu1 %v2287_v44 }
 0xb4e   : > { %v2623_v46 = vpop.f32.mrb[14].mxu1 }
 0xb4f   : > { %v2624_v32 = vpop.f32.mrb[15].mxu1 }
 0xb50   : > { %v2625_v48 = vadd.f32 %v2624_v32, %v2623_v46 }
 0xb52   : > { %v2396_v30 = vadd.f32 %v2625_v48, %v3777_v5  ;;  %v2626_v35 = vpop.f32.mrb[16].mxu1 }
 0xb53   : > { %v2627_v37 = vpop.f32.mrb[17].mxu1 }
 0xb54   : > { %2398 = vst [vmem:[%s379_s30] sm:$0xff] %v2396_v30  ;;  %v2628_v38 = vadd.f32 %v2627_v37, %v2626_v35 }
 0xb56   : > { %v2397_v49 = vadd.f32 %v2628_v38, %v3774_v2 }
 0xb58   : > { %2399 = vst [vmem:[%s379_s30 + $0x8] sm:$0xff] %v2397_v49 }
 0xb59 PF: > { %s20_s13 = sadd.s32 1, %s3112_s13  }
 0xb5a   : > { %p17_p4 = scmp.ge.s32.totalorder %s20_s13, 4  }
 0xb5c   :  { %19 = sbr.rel (!%p17_p4) target bundleno = 1 (0x1), region = 93 }

</bundles_post_ra>
